<compile_context>
chip_gen: v5e
topology: v5e:2x2
jax: 0.10.0
libtpu: 0.0.40
codegen_flags: <defaults>
</compile_context>

<pallas_src>
import jax
import jax.numpy as jnp
from jax import lax
from jax.experimental import pallas as pl
from jax.experimental.pallas import tpu as pltpu

_EPS = 1e-5
_LANE = 128


def _pick_row_chunk(H, W):
    """Largest divisor R of H such that R*W <= 256 flattened matmul rows."""
    best = 1
    for d in range(1, H + 1):
        if H % d == 0 and d * W <= max(256, W):
            best = d
    return best


def _resnet_block_kernel(x_ref, w1_ref, w2_ref, o_ref, pad_ref, acc_ref):
    # x_ref  : (H, W, C)  one batch element, NHWC (C zero-padded to lane multiple)
    # w*_ref : (9, Cin, Cout) bf16, tap-major (t = kh*3 + kw)
    # o_ref  : (H, W, C)
    # pad_ref: VMEM scratch (H+2, W, C) bf16 -- ROW-reflect-padded activations.
    #          Column reflection is materialized per chunk at read time, so the
    #          packed bf16 buffer only ever sees aligned (leading-axis) stores.
    # acc_ref: VMEM scratch (H, W, C) f32 -- conv output, written once per chunk.
    H, W, C = x_ref.shape
    R = _pick_row_chunk(H, W)          # static row-chunk size (divides H)
    n_chunks = H // R
    unroll = n_chunks <= 8
    inv_hw = 1.0 / (H * W)

    def fill_pad_from_x():
        # Interior rows + row reflection (ReflectionPad2d(1) along H), bf16 once.
        pad_ref[1:H + 1, :, :] = x_ref[...].astype(jnp.bfloat16)
        pad_ref[0:1, :, :] = x_ref[1:2, :, :].astype(jnp.bfloat16)
        pad_ref[H + 1:H + 2, :, :] = x_ref[H - 2:H - 1, :, :].astype(jnp.bfloat16)

    def reflect_rows():
        # Row reflection for the *current* interior contents of pad_ref.
        pad_ref[0:1, :, :] = pad_ref[2:3, :, :]
        pad_ref[H + 1:H + 2, :, :] = pad_ref[H - 1:H, :, :]

    def conv_pass(w_ref):
        """3x3 conv over pad_ref -> acc_ref, one store per chunk, fused IN stats.

        Returns (sum, sum_sq), each (1, C) f32, over the whole image (no bias:
        with affine-free InstanceNorm the conv bias cancels exactly).
        """
        def body(i, carry):
            s, ss = carry
            r0 = pl.multiple_of(i * R, R)
            # (R+2, W, C) row window; build the 3 column-shifted slabs as values
            # (reflect at the W borders).  The 3 row taps are then free
            # leading-dim slices of those slabs -> 9 MXU matmuls, accumulated in
            # a local f32 value (vreg/short-lived VMEM, not a full-image RMW).
            u = pad_ref[pl.ds(r0, R + 2), :, :]                       # kw = 1
            left = jnp.concatenate([u[:, 1:2, :], u[:, 0:W - 1, :]], axis=1)   # kw = 0
            right = jnp.concatenate([u[:, 1:W, :], u[:, W - 2:W - 1, :]], axis=1)  # kw = 2
            acc = None
            for kw, slab in ((0, left), (1, u), (2, right)):
                for kh in range(3):
                    patch = slab[kh:kh + R].reshape(R * W, C)
                    contrib = jnp.dot(patch, w_ref[kh * 3 + kw],
                                      preferred_element_type=jnp.float32)
                    acc = contrib if acc is None else acc + contrib
            acc_ref[pl.ds(r0, R), :, :] = acc.reshape(R, W, C)
            s = s + jnp.sum(acc, axis=0, keepdims=True)
            ss = ss + jnp.sum(acc * acc, axis=0, keepdims=True)
            return s, ss

        zero = jnp.zeros((1, C), jnp.float32)
        return lax.fori_loop(0, n_chunks, body, (zero, zero), unroll=unroll)

    def finalize_stats(s, ss):
        mean = s * inv_hw
        var = jnp.maximum(ss * inv_hw - mean * mean, 0.0)
        inv_std = lax.rsqrt(var + _EPS)
        return mean.reshape(1, 1, C), inv_std.reshape(1, 1, C)

    # ---- conv1 -> InstanceNorm -> ReLU, written straight back into pad_ref ----
    fill_pad_from_x()
    s1, ss1 = conv_pass(w1_ref)
    mean1, inv_std1 = finalize_stats(s1, ss1)

    def norm_relu_to_pad(i, carry):
        r0 = pl.multiple_of(i * R, R)
        y = (acc_ref[pl.ds(r0, R), :, :] - mean1) * inv_std1
        y = jnp.maximum(y, 0.0)
        pad_ref[pl.ds(r0 + 1, R), :, :] = y.astype(jnp.bfloat16)
        return carry

    lax.fori_loop(0, n_chunks, norm_relu_to_pad, 0, unroll=unroll)
    # TODO(synk): use_dropout=True (training-mode Dropout(0.5)) not implemented.
    reflect_rows()

    # ---- conv2 -> InstanceNorm, fused with the skip connection into o_ref ----
    s2, ss2 = conv_pass(w2_ref)
    mean2, inv_std2 = finalize_stats(s2, ss2)

    def norm_skip_to_out(i, carry):
        r0 = pl.multiple_of(i * R, R)
        y = (acc_ref[pl.ds(r0, R), :, :] - mean2) * inv_std2
        xc = x_ref[pl.ds(r0, R), :, :].astype(jnp.float32)
        o_ref[pl.ds(r0, R), :, :] = (xc + y).astype(o_ref.dtype)
        return carry

    lax.fori_loop(0, n_chunks, norm_skip_to_out, 0, unroll=unroll)


def _vmem_capacity_bytes():
    """Per-core VMEM capacity; conservative (v7x) fallback if query unavailable."""
    try:
        info = pltpu.get_tpu_info()
        cap = getattr(info, "vmem_capacity_bytes", None)
        if cap:
            return int(cap)
    except Exception:
        pass
    return 64 * 1024 * 1024


def resnet_block(x_nchw, w1, b1, w2, b2):
    """ResnetBlock forward.

    x_nchw: (N, C, H, W); w*: (C, C, 3, 3) [PyTorch OIHW]; b*: (C,).
    The conv biases cancel exactly under InstanceNorm(affine=False), so b1/b2
    are accepted for API parity but not sent to the kernel.
    """
    N, C, H, W = x_nchw.shape
    assert H >= 3 and W >= 3, "ReflectionPad2d(1) + 3x3 conv needs H, W >= 3"
    del b1, b2  # mathematically cancelled by affine-free InstanceNorm

    # Pad channels to a multiple of the lane width (dense vst / MXU operands).
    # Zero-padded channels provably stay zero end-to-end.
    Cp = max(_LANE, ((C + _LANE - 1) // _LANE) * _LANE)

    x = jnp.transpose(x_nchw, (0, 2, 3, 1))                   # NCHW -> NHWC
    if Cp != C:
        x = jnp.pad(x, ((0, 0), (0, 0), (0, 0), (0, Cp - C)))

    def prep_w(w):
        wt = jnp.transpose(w, (2, 3, 1, 0)).reshape(9, C, C)   # OIHW -> (9, Cin, Cout)
        if Cp != C:
            wt = jnp.pad(wt, ((0, 0), (0, Cp - C), (0, Cp - C)))
        return wt.astype(jnp.bfloat16)

    w1p, w2p = prep_w(w1), prep_w(w2)

    # Generation-aware VMEM budget: working set (double-buffered IO blocks,
    # double-buffered weight blocks, bf16 pad scratch, f32 acc scratch) plus a
    # margin for per-chunk temporaries, clamped below the chip's capacity
    # (v7x: 64 MiB/TC; v5e/v6e: 128 MiB).
    itemsize = jnp.dtype(x.dtype).itemsize
    io_block = H * W * Cp * itemsize
    w_bytes = 9 * Cp * Cp * 2
    scratch_bytes = (H + 2) * W * Cp * 2 + H * W * Cp * 4
    est = 2 * (2 * io_block) + 2 * 2 * w_bytes + scratch_bytes
    ceiling = max(32 << 20, _vmem_capacity_bytes() - (8 << 20))
    vmem_limit = int(min(max(int(est * 1.5) + (8 << 20), 32 << 20), ceiling))

    out = pl.pallas_call(
        _resnet_block_kernel,
        out_shape=jax.ShapeDtypeStruct((N, H, W, Cp), x.dtype),
        grid_spec=pltpu.PrefetchScalarGridSpec(
            num_scalar_prefetch=0,
            grid=(N,),
            in_specs=[
                pl.BlockSpec((None, H, W, Cp), lambda n: (n, 0, 0, 0)),
                pl.BlockSpec((9, Cp, Cp), lambda n: (0, 0, 0)),
                pl.BlockSpec((9, Cp, Cp), lambda n: (0, 0, 0)),
            ],
            out_specs=pl.BlockSpec((None, H, W, Cp), lambda n: (n, 0, 0, 0)),
            scratch_shapes=[
                pltpu.VMEM((H + 2, W, Cp), jnp.bfloat16),   # row-padded activations
                pltpu.VMEM((H, W, Cp), jnp.float32),        # conv output / IN input
            ],
        ),
        compiler_params=pltpu.CompilerParams(
            dimension_semantics=("parallel",),     # batch elems independent (v7x 2 TCs)
            vmem_limit_bytes=vmem_limit,
        ),
    )(x, w1p, w2p)

    if Cp != C:
        out = out[..., :C]
    return jnp.transpose(out, (0, 3, 1, 2))                   # NHWC -> NCHW


def _ref_resnet_block_nchw(x, w1, b1, w2, b2, eps=_EPS, conv_dtype=jnp.float32):
    """Pure-JAX reference mirroring the PyTorch module semantics.

    conv_dtype=jnp.bfloat16 mirrors the kernel's bf16 MXU feed (f32 accumulate);
    conv_dtype=jnp.float32 is the exact PyTorch-semantics reference.
    """
    def conv3x3_reflect(h, w, b):
        hp = jnp.pad(h, ((0, 0), (0, 0), (1, 1), (1, 1)), mode="reflect")
        y = jax.lax.conv_general_dilated(
            hp.astype(conv_dtype), w.astype(conv_dtype),
            window_strides=(1, 1), padding="VALID",
            dimension_numbers=("NCHW", "OIHW", "NCHW"),
            preferred_element_type=jnp.float32)
        return y + b[None, :, None, None].astype(jnp.float32)

    def inorm(h):
        m = jnp.mean(h, axis=(2, 3), keepdims=True)
        v = jnp.mean(jnp.square(h - m), axis=(2, 3), keepdims=True)
        return (h - m) * jax.lax.rsqrt(v + eps)

    y = jax.nn.relu(inorm(conv3x3_reflect(x, w1, b1)))
    y = inorm(conv3x3_reflect(y, w2, b2))
    return x + y


if __name__ == "__main__":
    N, C, H, W = 2, 4, 16, 16
    key = jax.random.PRNGKey(0)
    kx, kw1, kb1, kw2, kb2 = jax.random.split(key, 5)

    x = jax.random.normal(kx, (N, C, H, W), jnp.float32)
    w1 = jax.random.normal(kw1, (C, C, 3, 3), jnp.float32) * 0.2
    b1 = jax.random.normal(kb1, (C,), jnp.float32) * 0.1
    w2 = jax.random.normal(kw2, (C, C, 3, 3), jnp.float32) * 0.2
    b2 = jax.random.normal(kb2, (C,), jnp.float32) * 0.1

    out = jax.block_until_ready(resnet_block(x, w1, b1, w2, b2))
    assert out.shape == (N, C, H, W), out.shape

    # Tight check vs a reference that also feeds the convs in bf16 (matches the
    # kernel's MXU precision), plus a sanity check vs the exact f32 reference.
    ref_matched = _ref_resnet_block_nchw(x, w1, b1, w2, b2, conv_dtype=jnp.bfloat16)
    ref_exact = _ref_resnet_block_nchw(x, w1, b1, w2, b2, conv_dtype=jnp.float32)
    err_matched = float(jnp.max(jnp.abs(out - ref_matched)))
    err_exact = float(jnp.max(jnp.abs(out - ref_exact)))
    assert err_matched < 1e-2, f"mismatch vs bf16-matched reference: {err_matched}"
    assert err_exact < 1e-1, f"mismatch vs exact f32 reference: {err_exact}"

    print("KERNEL_OK")
</pallas_src>

<mosaic_0001>
module attributes {stable_mosaic.version = 11 : i64} {
  func.func @_resnet_block_kernel(%arg0: i32, %arg1: memref<1x16x16x128xf32, #tpu.memory_space<vmem>>, %arg2: memref<9x128x128xbf16, #tpu.memory_space<vmem>>, %arg3: memref<9x128x128xbf16, #tpu.memory_space<vmem>>, %arg4: memref<1x16x16x128xf32, #tpu.memory_space<vmem>>, %arg5: memref<18x16x128xbf16, #tpu.memory_space<vmem>>, %arg6: memref<16x16x128xf32, #tpu.memory_space<vmem>>) attributes {dimension_semantics = [#tpu.dimension_semantics<parallel>], iteration_bounds = array<i64: 2>, scalar_prefetch = 0 : i64, scratch_operands = 2 : i64, tpu.core_type = #tpu.core_type<tc>, window_params = [{transform_indices = @transform_0, window_bounds = array<i64: 1, 16, 16, 128>}, {pipeline_mode = #tpu.pipeline_mode<synchronous>, transform_indices = @transform_1, window_bounds = array<i64: 9, 128, 128>}, {pipeline_mode = #tpu.pipeline_mode<synchronous>, transform_indices = @transform_2, window_bounds = array<i64: 9, 128, 128>}, {transform_indices = @transform_3, window_bounds = array<i64: 1, 16, 16, 128>}]} {
    %c0 = arith.constant 0 : index
    %c0_0 = arith.constant 0 : index
    %c0_1 = arith.constant 0 : index
    %c0_2 = arith.constant 0 : index
    %0 = vector.load %arg1[%c0, %c0_0, %c0_1, %c0_2] : memref<1x16x16x128xf32, #tpu.memory_space<vmem>>, vector<1x16x16x128xf32>
    %1 = vector.shape_cast %0 : vector<1x16x16x128xf32> to vector<16x16x128xf32>
    %2 = arith.truncf %1 : vector<16x16x128xf32> to vector<16x16x128xbf16>
    %c1 = arith.constant 1 : index
    %c0_3 = arith.constant 0 : index
    %c0_4 = arith.constant 0 : index
    %3 = vector.load %arg5[%c1, %c0_3, %c0_4] : memref<18x16x128xbf16, #tpu.memory_space<vmem>>, vector<16x16x128xbf16>
    tpu.vector_store %arg5[%c1, %c0_3, %c0_4], %2 {strides = array<i32>} : memref<18x16x128xbf16, #tpu.memory_space<vmem>>, vector<16x16x128xbf16>,
    %c0_5 = arith.constant 0 : index
    %c1_6 = arith.constant 1 : index
    %c0_7 = arith.constant 0 : index
    %c0_8 = arith.constant 0 : index
    %4 = vector.load %arg1[%c0_5, %c1_6, %c0_7, %c0_8] : memref<1x16x16x128xf32, #tpu.memory_space<vmem>>, vector<1x1x16x128xf32>
    %5 = vector.shape_cast %4 : vector<1x1x16x128xf32> to vector<1x16x128xf32>
    %6 = arith.truncf %5 : vector<1x16x128xf32> to vector<1x16x128xbf16>
    %c0_9 = arith.constant 0 : index
    %c0_10 = arith.constant 0 : index
    %c0_11 = arith.constant 0 : index
    %7 = vector.load %arg5[%c0_9, %c0_10, %c0_11] : memref<18x16x128xbf16, #tpu.memory_space<vmem>>, vector<1x16x128xbf16>
    tpu.vector_store %arg5[%c0_9, %c0_10, %c0_11], %6 {strides = array<i32>} : memref<18x16x128xbf16, #tpu.memory_space<vmem>>, vector<1x16x128xbf16>,
    %c0_12 = arith.constant 0 : index
    %c14 = arith.constant 14 : index
    %c0_13 = arith.constant 0 : index
    %c0_14 = arith.constant 0 : index
    %8 = vector.load %arg1[%c0_12, %c14, %c0_13, %c0_14] : memref<1x16x16x128xf32, #tpu.memory_space<vmem>>, vector<1x1x16x128xf32>
    %9 = vector.shape_cast %8 : vector<1x1x16x128xf32> to vector<1x16x128xf32>
    %10 = arith.truncf %9 : vector<1x16x128xf32> to vector<1x16x128xbf16>
    %c17 = arith.constant 17 : index
    %c0_15 = arith.constant 0 : index
    %c0_16 = arith.constant 0 : index
    %11 = vector.load %arg5[%c17, %c0_15, %c0_16] : memref<18x16x128xbf16, #tpu.memory_space<vmem>>, vector<1x16x128xbf16>
    tpu.vector_store %arg5[%c17, %c0_15, %c0_16], %10 {strides = array<i32>} : memref<18x16x128xbf16, #tpu.memory_space<vmem>>, vector<1x16x128xbf16>,
    %cst = arith.constant 0.000000e+00 : f32
    %12 = vector.broadcast %cst : f32 to vector<1x128xf32>
    %c0_i32 = arith.constant 0 : i32
    %c16_i32 = arith.constant 16 : i32
    %13 = arith.muli %c0_i32, %c16_i32 : i32
    %14 = tpu.assume_multiple %13, 16 : i32
    %15 = arith.index_cast %14 : i32 to index
    %c0_17 = arith.constant 0 : index
    %c0_18 = arith.constant 0 : index
    %16 = vector.load %arg5[%15, %c0_17, %c0_18] : memref<18x16x128xbf16, #tpu.memory_space<vmem>>, vector<18x16x128xbf16>
    %17 = vector.extract_strided_slice %16 {offsets = [0, 1, 0], sizes = [18, 1, 128], strides = [1, 1, 1]} : vector<18x16x128xbf16> to vector<18x1x128xbf16>
    %18 = vector.extract_strided_slice %16 {offsets = [0, 0, 0], sizes = [18, 15, 128], strides = [1, 1, 1]} : vector<18x16x128xbf16> to vector<18x15x128xbf16>
    %19 = tpu.concatenate %17, %18 in 1 : vector<18x1x128xbf16>, vector<18x15x128xbf16> -> vector<18x16x128xbf16>
    %20 = vector.extract_strided_slice %16 {offsets = [0, 1, 0], sizes = [18, 15, 128], strides = [1, 1, 1]} : vector<18x16x128xbf16> to vector<18x15x128xbf16>
    %21 = vector.extract_strided_slice %16 {offsets = [0, 14, 0], sizes = [18, 1, 128], strides = [1, 1, 1]} : vector<18x16x128xbf16> to vector<18x1x128xbf16>
    %22 = tpu.concatenate %20, %21 in 1 : vector<18x15x128xbf16>, vector<18x1x128xbf16> -> vector<18x16x128xbf16>
    %23 = vector.extract_strided_slice %19 {offsets = [0, 0, 0], sizes = [16, 16, 128], strides = [1, 1, 1]} : vector<18x16x128xbf16> to vector<16x16x128xbf16>
    %24 = vector.shape_cast %23 : vector<16x16x128xbf16> to vector<256x128xbf16>
    %c0_19 = arith.constant 0 : index
    %c0_20 = arith.constant 0 : index
    %c0_21 = arith.constant 0 : index
    %25 = vector.load %arg2[%c0_19, %c0_20, %c0_21] : memref<9x128x128xbf16, #tpu.memory_space<vmem>>, vector<1x128x128xbf16>
    %26 = vector.shape_cast %25 : vector<1x128x128xbf16> to vector<128x128xbf16>
    %cst_22 = arith.constant dense<0.000000e+00> : vector<256x128xf32>
    %27 = tpu.matmul %24, %26, %cst_22 {dimension_numbers = #tpu.dot_dimension_numbers<[1], [0], [0], [1], [0, 0, 1, 1], [], []>} : vector<256x128xbf16>, vector<128x128xbf16>, vector<256x128xf32> -> vector<256x128xf32>
    %28 = vector.extract_strided_slice %19 {offsets = [1, 0, 0], sizes = [16, 16, 128], strides = [1, 1, 1]} : vector<18x16x128xbf16> to vector<16x16x128xbf16>
    %29 = vector.shape_cast %28 : vector<16x16x128xbf16> to vector<256x128xbf16>
    %c3 = arith.constant 3 : index
    %c0_23 = arith.constant 0 : index
    %c0_24 = arith.constant 0 : index
    %30 = vector.load %arg2[%c3, %c0_23, %c0_24] : memref<9x128x128xbf16, #tpu.memory_space<vmem>>, vector<1x128x128xbf16>
    %31 = vector.shape_cast %30 : vector<1x128x128xbf16> to vector<128x128xbf16>
    %cst_25 = arith.constant dense<0.000000e+00> : vector<256x128xf32>
    %32 = tpu.matmul %29, %31, %cst_25 {dimension_numbers = #tpu.dot_dimension_numbers<[1], [0], [0], [1], [0, 0, 1, 1], [], []>} : vector<256x128xbf16>, vector<128x128xbf16>, vector<256x128xf32> -> vector<256x128xf32>
    %33 = arith.addf %27, %32 : vector<256x128xf32>
    %34 = vector.extract_strided_slice %19 {offsets = [2, 0, 0], sizes = [16, 16, 128], strides = [1, 1, 1]} : vector<18x16x128xbf16> to vector<16x16x128xbf16>
    %35 = vector.shape_cast %34 : vector<16x16x128xbf16> to vector<256x128xbf16>
    %c6 = arith.constant 6 : index
    %c0_26 = arith.constant 0 : index
    %c0_27 = arith.constant 0 : index
    %36 = vector.load %arg2[%c6, %c0_26, %c0_27] : memref<9x128x128xbf16, #tpu.memory_space<vmem>>, vector<1x128x128xbf16>
    %37 = vector.shape_cast %36 : vector<1x128x128xbf16> to vector<128x128xbf16>
    %cst_28 = arith.constant dense<0.000000e+00> : vector<256x128xf32>
    %38 = tpu.matmul %35, %37, %cst_28 {dimension_numbers = #tpu.dot_dimension_numbers<[1], [0], [0], [1], [0, 0, 1, 1], [], []>} : vector<256x128xbf16>, vector<128x128xbf16>, vector<256x128xf32> -> vector<256x128xf32>
    %39 = arith.addf %33, %38 : vector<256x128xf32>
    %40 = vector.extract_strided_slice %16 {offsets = [0, 0, 0], sizes = [16, 16, 128], strides = [1, 1, 1]} : vector<18x16x128xbf16> to vector<16x16x128xbf16>
    %41 = vector.shape_cast %40 : vector<16x16x128xbf16> to vector<256x128xbf16>
    %c1_29 = arith.constant 1 : index
    %c0_30 = arith.constant 0 : index
    %c0_31 = arith.constant 0 : index
    %42 = vector.load %arg2[%c1_29, %c0_30, %c0_31] : memref<9x128x128xbf16, #tpu.memory_space<vmem>>, vector<1x128x128xbf16>
    %43 = vector.shape_cast %42 : vector<1x128x128xbf16> to vector<128x128xbf16>
    %cst_32 = arith.constant dense<0.000000e+00> : vector<256x128xf32>
    %44 = tpu.matmul %41, %43, %cst_32 {dimension_numbers = #tpu.dot_dimension_numbers<[1], [0], [0], [1], [0, 0, 1, 1], [], []>} : vector<256x128xbf16>, vector<128x128xbf16>, vector<256x128xf32> -> vector<256x128xf32>
    %45 = arith.addf %39, %44 : vector<256x128xf32>
    %46 = vector.extract_strided_slice %16 {offsets = [1, 0, 0], sizes = [16, 16, 128], strides = [1, 1, 1]} : vector<18x16x128xbf16> to vector<16x16x128xbf16>
    %47 = vector.shape_cast %46 : vector<16x16x128xbf16> to vector<256x128xbf16>
    %c4 = arith.constant 4 : index
    %c0_33 = arith.constant 0 : index
    %c0_34 = arith.constant 0 : index
    %48 = vector.load %arg2[%c4, %c0_33, %c0_34] : memref<9x128x128xbf16, #tpu.memory_space<vmem>>, vector<1x128x128xbf16>
    %49 = vector.shape_cast %48 : vector<1x128x128xbf16> to vector<128x128xbf16>
    %cst_35 = arith.constant dense<0.000000e+00> : vector<256x128xf32>
    %50 = tpu.matmul %47, %49, %cst_35 {dimension_numbers = #tpu.dot_dimension_numbers<[1], [0], [0], [1], [0, 0, 1, 1], [], []>} : vector<256x128xbf16>, vector<128x128xbf16>, vector<256x128xf32> -> vector<256x128xf32>
    %51 = arith.addf %45, %50 : vector<256x128xf32>
    %52 = vector.extract_strided_slice %16 {offsets = [2, 0, 0], sizes = [16, 16, 128], strides = [1, 1, 1]} : vector<18x16x128xbf16> to vector<16x16x128xbf16>
    %53 = vector.shape_cast %52 : vector<16x16x128xbf16> to vector<256x128xbf16>
    %c7 = arith.constant 7 : index
    %c0_36 = arith.constant 0 : index
    %c0_37 = arith.constant 0 : index
    %54 = vector.load %arg2[%c7, %c0_36, %c0_37] : memref<9x128x128xbf16, #tpu.memory_space<vmem>>, vector<1x128x128xbf16>
    %55 = vector.shape_cast %54 : vector<1x128x128xbf16> to vector<128x128xbf16>
    %cst_38 = arith.constant dense<0.000000e+00> : vector<256x128xf32>
    %56 = tpu.matmul %53, %55, %cst_38 {dimension_numbers = #tpu.dot_dimension_numbers<[1], [0], [0], [1], [0, 0, 1, 1], [], []>} : vector<256x128xbf16>, vector<128x128xbf16>, vector<256x128xf32> -> vector<256x128xf32>
    %57 = arith.addf %51, %56 : vector<256x128xf32>
    %58 = vector.extract_strided_slice %22 {offsets = [0, 0, 0], sizes = [16, 16, 128], strides = [1, 1, 1]} : vector<18x16x128xbf16> to vector<16x16x128xbf16>
    %59 = vector.shape_cast %58 : vector<16x16x128xbf16> to vector<256x128xbf16>
    %c2 = arith.constant 2 : index
    %c0_39 = arith.constant 0 : index
    %c0_40 = arith.constant 0 : index
    %60 = vector.load %arg2[%c2, %c0_39, %c0_40] : memref<9x128x128xbf16, #tpu.memory_space<vmem>>, vector<1x128x128xbf16>
    %61 = vector.shape_cast %60 : vector<1x128x128xbf16> to vector<128x128xbf16>
    %cst_41 = arith.constant dense<0.000000e+00> : vector<256x128xf32>
    %62 = tpu.matmul %59, %61, %cst_41 {dimension_numbers = #tpu.dot_dimension_numbers<[1], [0], [0], [1], [0, 0, 1, 1], [], []>} : vector<256x128xbf16>, vector<128x128xbf16>, vector<256x128xf32> -> vector<256x128xf32>
    %63 = arith.addf %57, %62 : vector<256x128xf32>
    %64 = vector.extract_strided_slice %22 {offsets = [1, 0, 0], sizes = [16, 16, 128], strides = [1, 1, 1]} : vector<18x16x128xbf16> to vector<16x16x128xbf16>
    %65 = vector.shape_cast %64 : vector<16x16x128xbf16> to vector<256x128xbf16>
    %c5 = arith.constant 5 : index
    %c0_42 = arith.constant 0 : index
    %c0_43 = arith.constant 0 : index
    %66 = vector.load %arg2[%c5, %c0_42, %c0_43] : memref<9x128x128xbf16, #tpu.memory_space<vmem>>, vector<1x128x128xbf16>
    %67 = vector.shape_cast %66 : vector<1x128x128xbf16> to vector<128x128xbf16>
    %cst_44 = arith.constant dense<0.000000e+00> : vector<256x128xf32>
    %68 = tpu.matmul %65, %67, %cst_44 {dimension_numbers = #tpu.dot_dimension_numbers<[1], [0], [0], [1], [0, 0, 1, 1], [], []>} : vector<256x128xbf16>, vector<128x128xbf16>, vector<256x128xf32> -> vector<256x128xf32>
    %69 = arith.addf %63, %68 : vector<256x128xf32>
    %70 = vector.extract_strided_slice %22 {offsets = [2, 0, 0], sizes = [16, 16, 128], strides = [1, 1, 1]} : vector<18x16x128xbf16> to vector<16x16x128xbf16>
    %71 = vector.shape_cast %70 : vector<16x16x128xbf16> to vector<256x128xbf16>
    %c8 = arith.constant 8 : index
    %c0_45 = arith.constant 0 : index
    %c0_46 = arith.constant 0 : index
    %72 = vector.load %arg2[%c8, %c0_45, %c0_46] : memref<9x128x128xbf16, #tpu.memory_space<vmem>>, vector<1x128x128xbf16>
    %73 = vector.shape_cast %72 : vector<1x128x128xbf16> to vector<128x128xbf16>
    %cst_47 = arith.constant dense<0.000000e+00> : vector<256x128xf32>
    %74 = tpu.matmul %71, %73, %cst_47 {dimension_numbers = #tpu.dot_dimension_numbers<[1], [0], [0], [1], [0, 0, 1, 1], [], []>} : vector<256x128xbf16>, vector<128x128xbf16>, vector<256x128xf32> -> vector<256x128xf32>
    %75 = arith.addf %69, %74 : vector<256x128xf32>
    %76 = vector.shape_cast %75 : vector<256x128xf32> to vector<16x16x128xf32>
    %77 = arith.index_cast %14 : i32 to index
    %c0_48 = arith.constant 0 : index
    %c0_49 = arith.constant 0 : index
    %78 = vector.load %arg6[%77, %c0_48, %c0_49] : memref<16x16x128xf32, #tpu.memory_space<vmem>>, vector<16x16x128xf32>
    tpu.vector_store %arg6[%77, %c0_48, %c0_49], %76 {strides = array<i32>} : memref<16x16x128xf32, #tpu.memory_space<vmem>>, vector<16x16x128xf32>,
    %cst_50 = arith.constant dense<0.000000e+00> : vector<128xf32>
    %79 = vector.multi_reduction <add>, %75, %cst_50 [0] : vector<256x128xf32> to vector<128xf32>
    %80 = vector.shape_cast %79 : vector<128xf32> to vector<1x128xf32>
    %81 = arith.addf %12, %80 : vector<1x128xf32>
    %82 = arith.mulf %75, %75 : vector<256x128xf32>
    %cst_51 = arith.constant dense<0.000000e+00> : vector<128xf32>
    %83 = vector.multi_reduction <add>, %82, %cst_51 [0] : vector<256x128xf32> to vector<128xf32>
    %84 = vector.shape_cast %83 : vector<128xf32> to vector<1x128xf32>
    %85 = arith.addf %12, %84 : vector<1x128xf32>
    %c1_i32 = arith.constant 1 : i32
    %cst_52 = arith.constant 3.906250e-03 : f32
    %86 = vector.broadcast %cst_52 : f32 to vector<1x128xf32>
    %87 = arith.mulf %81, %86 : vector<1x128xf32>
    %cst_53 = arith.constant 3.906250e-03 : f32
    %88 = vector.broadcast %cst_53 : f32 to vector<1x128xf32>
    %89 = arith.mulf %85, %88 : vector<1x128xf32>
    %90 = arith.mulf %87, %87 : vector<1x128xf32>
    %91 = arith.subf %89, %90 : vector<1x128xf32>
    %cst_54 = arith.constant 0.000000e+00 : f32
    %92 = vector.broadcast %cst_54 : f32 to vector<1x128xf32>
    %93 = arith.maximumf %91, %92 : vector<1x128xf32>
    %cst_55 = arith.constant 9.99999974E-6 : f32
    %94 = vector.broadcast %cst_55 : f32 to vector<1x128xf32>
    %95 = arith.addf %93, %94 : vector<1x128xf32>
    %96 = math.rsqrt %95 : vector<1x128xf32>
    %97 = vector.shape_cast %87 : vector<1x128xf32> to vector<1x1x128xf32>
    %98 = vector.shape_cast %96 : vector<1x128xf32> to vector<1x1x128xf32>
    %c0_i32_56 = arith.constant 0 : i32
    %c16_i32_57 = arith.constant 16 : i32
    %99 = arith.muli %c0_i32_56, %c16_i32_57 : i32
    %100 = tpu.assume_multiple %99, 16 : i32
    %101 = arith.index_cast %100 : i32 to index
    %c0_58 = arith.constant 0 : index
    %c0_59 = arith.constant 0 : index
    %102 = vector.load %arg6[%101, %c0_58, %c0_59] : memref<16x16x128xf32, #tpu.memory_space<vmem>>, vector<16x16x128xf32>
    %103 = vector.broadcast %97 : vector<1x1x128xf32> to vector<16x16x128xf32>
    %104 = arith.subf %102, %103 : vector<16x16x128xf32>
    %105 = vector.broadcast %98 : vector<1x1x128xf32> to vector<16x16x128xf32>
    %106 = arith.mulf %104, %105 : vector<16x16x128xf32>
    %cst_60 = arith.constant 0.000000e+00 : f32
    %107 = vector.broadcast %cst_60 : f32 to vector<16x16x128xf32>
    %108 = arith.maximumf %106, %107 : vector<16x16x128xf32>
    %109 = arith.truncf %108 : vector<16x16x128xf32> to vector<16x16x128xbf16>
    %c1_i32_61 = arith.constant 1 : i32
    %110 = arith.addi %100, %c1_i32_61 : i32
    %111 = arith.index_cast %110 : i32 to index
    %c0_62 = arith.constant 0 : index
    %c0_63 = arith.constant 0 : index
    %112 = vector.load %arg5[%111, %c0_62, %c0_63] : memref<18x16x128xbf16, #tpu.memory_space<vmem>>, vector<16x16x128xbf16>
    tpu.vector_store %arg5[%111, %c0_62, %c0_63], %109 {strides = array<i32>} : memref<18x16x128xbf16, #tpu.memory_space<vmem>>, vector<16x16x128xbf16>,
    %c1_i32_64 = arith.constant 1 : i32
    %c2_65 = arith.constant 2 : index
    %c0_66 = arith.constant 0 : index
    %c0_67 = arith.constant 0 : index
    %113 = vector.load %arg5[%c2_65, %c0_66, %c0_67] : memref<18x16x128xbf16, #tpu.memory_space<vmem>>, vector<1x16x128xbf16>
    %c0_68 = arith.constant 0 : index
    %c0_69 = arith.constant 0 : index
    %c0_70 = arith.constant 0 : index
    %114 = vector.load %arg5[%c0_68, %c0_69, %c0_70] : memref<18x16x128xbf16, #tpu.memory_space<vmem>>, vector<1x16x128xbf16>
    tpu.vector_store %arg5[%c0_68, %c0_69, %c0_70], %113 {strides = array<i32>} : memref<18x16x128xbf16, #tpu.memory_space<vmem>>, vector<1x16x128xbf16>,
    %c15 = arith.constant 15 : index
    %c0_71 = arith.constant 0 : index
    %c0_72 = arith.constant 0 : index
    %115 = vector.load %arg5[%c15, %c0_71, %c0_72] : memref<18x16x128xbf16, #tpu.memory_space<vmem>>, vector<1x16x128xbf16>
    %c17_73 = arith.constant 17 : index
    %c0_74 = arith.constant 0 : index
    %c0_75 = arith.constant 0 : index
    %116 = vector.load %arg5[%c17_73, %c0_74, %c0_75] : memref<18x16x128xbf16, #tpu.memory_space<vmem>>, vector<1x16x128xbf16>
    tpu.vector_store %arg5[%c17_73, %c0_74, %c0_75], %115 {strides = array<i32>} : memref<18x16x128xbf16, #tpu.memory_space<vmem>>, vector<1x16x128xbf16>,
    %cst_76 = arith.constant 0.000000e+00 : f32
    %117 = vector.broadcast %cst_76 : f32 to vector<1x128xf32>
    %c0_i32_77 = arith.constant 0 : i32
    %c16_i32_78 = arith.constant 16 : i32
    %118 = arith.muli %c0_i32_77, %c16_i32_78 : i32
    %119 = tpu.assume_multiple %118, 16 : i32
    %120 = arith.index_cast %119 : i32 to index
    %c0_79 = arith.constant 0 : index
    %c0_80 = arith.constant 0 : index
    %121 = vector.load %arg5[%120, %c0_79, %c0_80] : memref<18x16x128xbf16, #tpu.memory_space<vmem>>, vector<18x16x128xbf16>
    %122 = vector.extract_strided_slice %121 {offsets = [0, 1, 0], sizes = [18, 1, 128], strides = [1, 1, 1]} : vector<18x16x128xbf16> to vector<18x1x128xbf16>
    %123 = vector.extract_strided_slice %121 {offsets = [0, 0, 0], sizes = [18, 15, 128], strides = [1, 1, 1]} : vector<18x16x128xbf16> to vector<18x15x128xbf16>
    %124 = tpu.concatenate %122, %123 in 1 : vector<18x1x128xbf16>, vector<18x15x128xbf16> -> vector<18x16x128xbf16>
    %125 = vector.extract_strided_slice %121 {offsets = [0, 1, 0], sizes = [18, 15, 128], strides = [1, 1, 1]} : vector<18x16x128xbf16> to vector<18x15x128xbf16>
    %126 = vector.extract_strided_slice %121 {offsets = [0, 14, 0], sizes = [18, 1, 128], strides = [1, 1, 1]} : vector<18x16x128xbf16> to vector<18x1x128xbf16>
    %127 = tpu.concatenate %125, %126 in 1 : vector<18x15x128xbf16>, vector<18x1x128xbf16> -> vector<18x16x128xbf16>
    %128 = vector.extract_strided_slice %124 {offsets = [0, 0, 0], sizes = [16, 16, 128], strides = [1, 1, 1]} : vector<18x16x128xbf16> to vector<16x16x128xbf16>
    %129 = vector.shape_cast %128 : vector<16x16x128xbf16> to vector<256x128xbf16>
    %c0_81 = arith.constant 0 : index
    %c0_82 = arith.constant 0 : index
    %c0_83 = arith.constant 0 : index
    %130 = vector.load %arg3[%c0_81, %c0_82, %c0_83] : memref<9x128x128xbf16, #tpu.memory_space<vmem>>, vector<1x128x128xbf16>
    %131 = vector.shape_cast %130 : vector<1x128x128xbf16> to vector<128x128xbf16>
    %cst_84 = arith.constant dense<0.000000e+00> : vector<256x128xf32>
    %132 = tpu.matmul %129, %131, %cst_84 {dimension_numbers = #tpu.dot_dimension_numbers<[1], [0], [0], [1], [0, 0, 1, 1], [], []>} : vector<256x128xbf16>, vector<128x128xbf16>, vector<256x128xf32> -> vector<256x128xf32>
    %133 = vector.extract_strided_slice %124 {offsets = [1, 0, 0], sizes = [16, 16, 128], strides = [1, 1, 1]} : vector<18x16x128xbf16> to vector<16x16x128xbf16>
    %134 = vector.shape_cast %133 : vector<16x16x128xbf16> to vector<256x128xbf16>
    %c3_85 = arith.constant 3 : index
    %c0_86 = arith.constant 0 : index
    %c0_87 = arith.constant 0 : index
    %135 = vector.load %arg3[%c3_85, %c0_86, %c0_87] : memref<9x128x128xbf16, #tpu.memory_space<vmem>>, vector<1x128x128xbf16>
    %136 = vector.shape_cast %135 : vector<1x128x128xbf16> to vector<128x128xbf16>
    %cst_88 = arith.constant dense<0.000000e+00> : vector<256x128xf32>
    %137 = tpu.matmul %134, %136, %cst_88 {dimension_numbers = #tpu.dot_dimension_numbers<[1], [0], [0], [1], [0, 0, 1, 1], [], []>} : vector<256x128xbf16>, vector<128x128xbf16>, vector<256x128xf32> -> vector<256x128xf32>
    %138 = arith.addf %132, %137 : vector<256x128xf32>
    %139 = vector.extract_strided_slice %124 {offsets = [2, 0, 0], sizes = [16, 16, 128], strides = [1, 1, 1]} : vector<18x16x128xbf16> to vector<16x16x128xbf16>
    %140 = vector.shape_cast %139 : vector<16x16x128xbf16> to vector<256x128xbf16>
    %c6_89 = arith.constant 6 : index
    %c0_90 = arith.constant 0 : index
    %c0_91 = arith.constant 0 : index
    %141 = vector.load %arg3[%c6_89, %c0_90, %c0_91] : memref<9x128x128xbf16, #tpu.memory_space<vmem>>, vector<1x128x128xbf16>
    %142 = vector.shape_cast %141 : vector<1x128x128xbf16> to vector<128x128xbf16>
    %cst_92 = arith.constant dense<0.000000e+00> : vector<256x128xf32>
    %143 = tpu.matmul %140, %142, %cst_92 {dimension_numbers = #tpu.dot_dimension_numbers<[1], [0], [0], [1], [0, 0, 1, 1], [], []>} : vector<256x128xbf16>, vector<128x128xbf16>, vector<256x128xf32> -> vector<256x128xf32>
    %144 = arith.addf %138, %143 : vector<256x128xf32>
    %145 = vector.extract_strided_slice %121 {offsets = [0, 0, 0], sizes = [16, 16, 128], strides = [1, 1, 1]} : vector<18x16x128xbf16> to vector<16x16x128xbf16>
    %146 = vector.shape_cast %145 : vector<16x16x128xbf16> to vector<256x128xbf16>
    %c1_93 = arith.constant 1 : index
    %c0_94 = arith.constant 0 : index
    %c0_95 = arith.constant 0 : index
    %147 = vector.load %arg3[%c1_93, %c0_94, %c0_95] : memref<9x128x128xbf16, #tpu.memory_space<vmem>>, vector<1x128x128xbf16>
    %148 = vector.shape_cast %147 : vector<1x128x128xbf16> to vector<128x128xbf16>
    %cst_96 = arith.constant dense<0.000000e+00> : vector<256x128xf32>
    %149 = tpu.matmul %146, %148, %cst_96 {dimension_numbers = #tpu.dot_dimension_numbers<[1], [0], [0], [1], [0, 0, 1, 1], [], []>} : vector<256x128xbf16>, vector<128x128xbf16>, vector<256x128xf32> -> vector<256x128xf32>
    %150 = arith.addf %144, %149 : vector<256x128xf32>
    %151 = vector.extract_strided_slice %121 {offsets = [1, 0, 0], sizes = [16, 16, 128], strides = [1, 1, 1]} : vector<18x16x128xbf16> to vector<16x16x128xbf16>
    %152 = vector.shape_cast %151 : vector<16x16x128xbf16> to vector<256x128xbf16>
    %c4_97 = arith.constant 4 : index
    %c0_98 = arith.constant 0 : index
    %c0_99 = arith.constant 0 : index
    %153 = vector.load %arg3[%c4_97, %c0_98, %c0_99] : memref<9x128x128xbf16, #tpu.memory_space<vmem>>, vector<1x128x128xbf16>
    %154 = vector.shape_cast %153 : vector<1x128x128xbf16> to vector<128x128xbf16>
    %cst_100 = arith.constant dense<0.000000e+00> : vector<256x128xf32>
    %155 = tpu.matmul %152, %154, %cst_100 {dimension_numbers = #tpu.dot_dimension_numbers<[1], [0], [0], [1], [0, 0, 1, 1], [], []>} : vector<256x128xbf16>, vector<128x128xbf16>, vector<256x128xf32> -> vector<256x128xf32>
    %156 = arith.addf %150, %155 : vector<256x128xf32>
    %157 = vector.extract_strided_slice %121 {offsets = [2, 0, 0], sizes = [16, 16, 128], strides = [1, 1, 1]} : vector<18x16x128xbf16> to vector<16x16x128xbf16>
    %158 = vector.shape_cast %157 : vector<16x16x128xbf16> to vector<256x128xbf16>
    %c7_101 = arith.constant 7 : index
    %c0_102 = arith.constant 0 : index
    %c0_103 = arith.constant 0 : index
    %159 = vector.load %arg3[%c7_101, %c0_102, %c0_103] : memref<9x128x128xbf16, #tpu.memory_space<vmem>>, vector<1x128x128xbf16>
    %160 = vector.shape_cast %159 : vector<1x128x128xbf16> to vector<128x128xbf16>
    %cst_104 = arith.constant dense<0.000000e+00> : vector<256x128xf32>
    %161 = tpu.matmul %158, %160, %cst_104 {dimension_numbers = #tpu.dot_dimension_numbers<[1], [0], [0], [1], [0, 0, 1, 1], [], []>} : vector<256x128xbf16>, vector<128x128xbf16>, vector<256x128xf32> -> vector<256x128xf32>
    %162 = arith.addf %156, %161 : vector<256x128xf32>
    %163 = vector.extract_strided_slice %127 {offsets = [0, 0, 0], sizes = [16, 16, 128], strides = [1, 1, 1]} : vector<18x16x128xbf16> to vector<16x16x128xbf16>
    %164 = vector.shape_cast %163 : vector<16x16x128xbf16> to vector<256x128xbf16>
    %c2_105 = arith.constant 2 : index
    %c0_106 = arith.constant 0 : index
    %c0_107 = arith.constant 0 : index
    %165 = vector.load %arg3[%c2_105, %c0_106, %c0_107] : memref<9x128x128xbf16, #tpu.memory_space<vmem>>, vector<1x128x128xbf16>
    %166 = vector.shape_cast %165 : vector<1x128x128xbf16> to vector<128x128xbf16>
    %cst_108 = arith.constant dense<0.000000e+00> : vector<256x128xf32>
    %167 = tpu.matmul %164, %166, %cst_108 {dimension_numbers = #tpu.dot_dimension_numbers<[1], [0], [0], [1], [0, 0, 1, 1], [], []>} : vector<256x128xbf16>, vector<128x128xbf16>, vector<256x128xf32> -> vector<256x128xf32>
    %168 = arith.addf %162, %167 : vector<256x128xf32>
    %169 = vector.extract_strided_slice %127 {offsets = [1, 0, 0], sizes = [16, 16, 128], strides = [1, 1, 1]} : vector<18x16x128xbf16> to vector<16x16x128xbf16>
    %170 = vector.shape_cast %169 : vector<16x16x128xbf16> to vector<256x128xbf16>
    %c5_109 = arith.constant 5 : index
    %c0_110 = arith.constant 0 : index
    %c0_111 = arith.constant 0 : index
    %171 = vector.load %arg3[%c5_109, %c0_110, %c0_111] : memref<9x128x128xbf16, #tpu.memory_space<vmem>>, vector<1x128x128xbf16>
    %172 = vector.shape_cast %171 : vector<1x128x128xbf16> to vector<128x128xbf16>
    %cst_112 = arith.constant dense<0.000000e+00> : vector<256x128xf32>
    %173 = tpu.matmul %170, %172, %cst_112 {dimension_numbers = #tpu.dot_dimension_numbers<[1], [0], [0], [1], [0, 0, 1, 1], [], []>} : vector<256x128xbf16>, vector<128x128xbf16>, vector<256x128xf32> -> vector<256x128xf32>
    %174 = arith.addf %168, %173 : vector<256x128xf32>
    %175 = vector.extract_strided_slice %127 {offsets = [2, 0, 0], sizes = [16, 16, 128], strides = [1, 1, 1]} : vector<18x16x128xbf16> to vector<16x16x128xbf16>
    %176 = vector.shape_cast %175 : vector<16x16x128xbf16> to vector<256x128xbf16>
    %c8_113 = arith.constant 8 : index
    %c0_114 = arith.constant 0 : index
    %c0_115 = arith.constant 0 : index
    %177 = vector.load %arg3[%c8_113, %c0_114, %c0_115] : memref<9x128x128xbf16, #tpu.memory_space<vmem>>, vector<1x128x128xbf16>
    %178 = vector.shape_cast %177 : vector<1x128x128xbf16> to vector<128x128xbf16>
    %cst_116 = arith.constant dense<0.000000e+00> : vector<256x128xf32>
    %179 = tpu.matmul %176, %178, %cst_116 {dimension_numbers = #tpu.dot_dimension_numbers<[1], [0], [0], [1], [0, 0, 1, 1], [], []>} : vector<256x128xbf16>, vector<128x128xbf16>, vector<256x128xf32> -> vector<256x128xf32>
    %180 = arith.addf %174, %179 : vector<256x128xf32>
    %181 = vector.shape_cast %180 : vector<256x128xf32> to vector<16x16x128xf32>
    %182 = arith.index_cast %119 : i32 to index
    %c0_117 = arith.constant 0 : index
    %c0_118 = arith.constant 0 : index
    %183 = vector.load %arg6[%182, %c0_117, %c0_118] : memref<16x16x128xf32, #tpu.memory_space<vmem>>, vector<16x16x128xf32>
    tpu.vector_store %arg6[%182, %c0_117, %c0_118], %181 {strides = array<i32>} : memref<16x16x128xf32, #tpu.memory_space<vmem>>, vector<16x16x128xf32>,
    %cst_119 = arith.constant dense<0.000000e+00> : vector<128xf32>
    %184 = vector.multi_reduction <add>, %180, %cst_119 [0] : vector<256x128xf32> to vector<128xf32>
    %185 = vector.shape_cast %184 : vector<128xf32> to vector<1x128xf32>
    %186 = arith.addf %117, %185 : vector<1x128xf32>
    %187 = arith.mulf %180, %180 : vector<256x128xf32>
    %cst_120 = arith.constant dense<0.000000e+00> : vector<128xf32>
    %188 = vector.multi_reduction <add>, %187, %cst_120 [0] : vector<256x128xf32> to vector<128xf32>
    %189 = vector.shape_cast %188 : vector<128xf32> to vector<1x128xf32>
    %190 = arith.addf %117, %189 : vector<1x128xf32>
    %c1_i32_121 = arith.constant 1 : i32
    %cst_122 = arith.constant 3.906250e-03 : f32
    %191 = vector.broadcast %cst_122 : f32 to vector<1x128xf32>
    %192 = arith.mulf %186, %191 : vector<1x128xf32>
    %cst_123 = arith.constant 3.906250e-03 : f32
    %193 = vector.broadcast %cst_123 : f32 to vector<1x128xf32>
    %194 = arith.mulf %190, %193 : vector<1x128xf32>
    %195 = arith.mulf %192, %192 : vector<1x128xf32>
    %196 = arith.subf %194, %195 : vector<1x128xf32>
    %cst_124 = arith.constant 0.000000e+00 : f32
    %197 = vector.broadcast %cst_124 : f32 to vector<1x128xf32>
    %198 = arith.maximumf %196, %197 : vector<1x128xf32>
    %cst_125 = arith.constant 9.99999974E-6 : f32
    %199 = vector.broadcast %cst_125 : f32 to vector<1x128xf32>
    %200 = arith.addf %198, %199 : vector<1x128xf32>
    %201 = math.rsqrt %200 : vector<1x128xf32>
    %202 = vector.shape_cast %192 : vector<1x128xf32> to vector<1x1x128xf32>
    %203 = vector.shape_cast %201 : vector<1x128xf32> to vector<1x1x128xf32>
    %c0_i32_126 = arith.constant 0 : i32
    %c16_i32_127 = arith.constant 16 : i32
    %204 = arith.muli %c0_i32_126, %c16_i32_127 : i32
    %205 = tpu.assume_multiple %204, 16 : i32
    %206 = arith.index_cast %205 : i32 to index
    %c0_128 = arith.constant 0 : index
    %c0_129 = arith.constant 0 : index
    %207 = vector.load %arg6[%206, %c0_128, %c0_129] : memref<16x16x128xf32, #tpu.memory_space<vmem>>, vector<16x16x128xf32>
    %208 = vector.broadcast %202 : vector<1x1x128xf32> to vector<16x16x128xf32>
    %209 = arith.subf %207, %208 : vector<16x16x128xf32>
    %210 = vector.broadcast %203 : vector<1x1x128xf32> to vector<16x16x128xf32>
    %211 = arith.mulf %209, %210 : vector<16x16x128xf32>
    %c0_130 = arith.constant 0 : index
    %212 = arith.index_cast %205 : i32 to index
    %c0_131 = arith.constant 0 : index
    %c0_132 = arith.constant 0 : index
    %213 = vector.load %arg1[%c0_130, %212, %c0_131, %c0_132] : memref<1x16x16x128xf32, #tpu.memory_space<vmem>>, vector<1x16x16x128xf32>
    %214 = vector.shape_cast %213 : vector<1x16x16x128xf32> to vector<16x16x128xf32>
    %215 = arith.addf %214, %211 : vector<16x16x128xf32>
    %c0_133 = arith.constant 0 : index
    %216 = arith.index_cast %205 : i32 to index
    %c0_134 = arith.constant 0 : index
    %c0_135 = arith.constant 0 : index
    %217 = vector.load %arg4[%c0_133, %216, %c0_134, %c0_135] : memref<1x16x16x128xf32, #tpu.memory_space<vmem>>, vector<1x16x16x128xf32>
    %218 = vector.shape_cast %217 : vector<1x16x16x128xf32> to vector<16x16x128xf32>
    %219 = vector.shape_cast %215 : vector<16x16x128xf32> to vector<1x16x16x128xf32>
    tpu.vector_store %arg4[%c0_133, %216, %c0_134, %c0_135], %219 {strides = array<i32>} : memref<1x16x16x128xf32, #tpu.memory_space<vmem>>, vector<1x16x16x128xf32>,
    %c1_i32_136 = arith.constant 1 : i32
    return
  }
  func.func @transform_0(%arg0: i32) -> (i32, i32, i32, i32) {
    %c0_i32 = arith.constant 0 : i32
    %c0_i32_0 = arith.constant 0 : i32
    %c0_i32_1 = arith.constant 0 : i32
    %c0_i32_2 = arith.constant 0 : i32
    return %arg0, %c0_i32, %c0_i32_0, %c0_i32_1 : i32, i32, i32, i32
  }
  func.func @transform_1(%arg0: i32) -> (i32, i32, i32) {
    %c0_i32 = arith.constant 0 : i32
    %c0_i32_0 = arith.constant 0 : i32
    %c0_i32_1 = arith.constant 0 : i32
    %c0_i32_2 = arith.constant 0 : i32
    return %c0_i32, %c0_i32_0, %c0_i32_1 : i32, i32, i32
  }
  func.func @transform_2(%arg0: i32) -> (i32, i32, i32) {
    %c0_i32 = arith.constant 0 : i32
    %c0_i32_0 = arith.constant 0 : i32
    %c0_i32_1 = arith.constant 0 : i32
    %c0_i32_2 = arith.constant 0 : i32
    return %c0_i32, %c0_i32_0, %c0_i32_1 : i32, i32, i32
  }
  func.func @transform_3(%arg0: i32) -> (i32, i32, i32, i32) {
    %c0_i32 = arith.constant 0 : i32
    %c0_i32_0 = arith.constant 0 : i32
    %c0_i32_1 = arith.constant 0 : i32
    %c0_i32_2 = arith.constant 0 : i32
    return %arg0, %c0_i32, %c0_i32_0, %c0_i32_1 : i32, i32, i32, i32
  }
}

</mosaic_0001>

<bundles_post_ra>
// kernel: tpu_custom_call.1
= control target key start
LH: loop header
LB: loop body
LE: loop exit
PB: predicated region body
PF: predicated region fallthrough
CT: control target
= control target key end

     0   :  { %8 = vsyncpa [#allocation5], 0  ;;  %s9333_s0 = inlined_call_operand.hbm [shape: f32[2,16,16,128], index: 0, kind: input, shape index: {}]   ;;  %s9334_s1 = inlined_call_operand.hbm [shape: bf16[9,128,128], index: 1, kind: input, shape index: {}]   ;;  %s9335_s2 = inlined_call_operand.hbm [shape: bf16[9,128,128], index: 2, kind: input, shape index: {}]   ;;  %s9336_s3 = inlined_call_operand.hbm [shape: f32[2,16,16,128], index: 3, kind: output, shape index: {}]  }
   0x1   :  { %10 = vsyncpa [#allocation5 + $0x1], 0 }
   0x2   :  { %11 = vsyncpa [#allocation8], 0 }
   0x3   :  { %12 = vsyncpa [#allocation6], 0 }
   0x4   :  { %14 = vsyncpa [#allocation6 + $0x1], 0  ;;  %s6958_s12 = smov 0   ;;  %s6960_s13 = smov 0  }
   0x5   :  { %s6962_s14 = smov 0   ;;  %s6964_s15 = smov 0  }
   0x6 LB: > { %s6979_s16 = sadd.s32 4294967295, %s6928_s15   ;;  %s5538_s17 = sadd.s32 4294967294, %s6928_s15   ;;  %s6928_s15 = sphi %s6964_s15, %s9526_s15   ;;  %s6924_s14 = sphi %s6962_s14, %s9525_s14   ;;  %s6920_s13 = sphi %s6960_s13, %s9524_s13   ;;  %s6916_s12 = sphi %s6958_s12, %s9523_s12  }
   0x7   : > { %p40_p0 = scmp.ne.s32.totalorder %s6920_s13, %s6916_s12  ;;  %p41_p1 = scmp.eq.s32.totalorder %s6979_s16, 0 }
   0x8   : > { %p106_p2 = scmp.eq.s32.totalorder %s6979_s16, 1  ;;  %p112_p3 = scmp.eq.s32.totalorder %s5538_s17, 1 }
   0x9   : > { %p6988_p4 = por %p41_p1, %p40_p0  ;;  %p5539_p5 = scmp.ge.s32.totalorder %s6928_s15, 1 }
   0xa   : > { %p6993_p6 = por %p112_p3, %p40_p0  ;;  %p119_p7 = scmp.lt.s32.totalorder %s6928_s15, 3 }
   0xb   : > { %s130_s22 = sshll.u32 %s9334_s1, 4  ;;  %s6930_s24 = smov [#allocation7]   ;;  %s131_s22 = int_to_ptr.hbm [resolvable:$true] %s130_s22 }
   0xc   : > { %p7001_p8 = pnand %p5539_p5, %p119_p7  ;;  %s132_s25 = sshll.u32 %s6930_s24, 4  ;;  %s133_s25 = int_to_ptr.vmem [resolvable:$true] %s132_s25 }
   0xd   : > { %s144_s28 = sshll.u32 %s9335_s2, 4  ;;  %s6931_s29 = smov 64   ;;  %s145_s28 = int_to_ptr.hbm [resolvable:$true] %s144_s28 }
   0xe   : > { %p6688_p9 = pneg %p7001_p8  ;;  %s6932_s30 = smov 4  }
   0xf   : > { %s6933_s4 = smov [#allocation9]   ;;  %s7014_s6 = sadd.s32 1, %s6928_s15  }
  0x10   : > { %p6689_p10 = pnand %p6688_p9, %p41_p1  ;;  %s146_s5 = sshll.u32 %s6933_s4, 4  ;;  %s147_s5 = int_to_ptr.vmem [resolvable:$true] %s146_s5 }
  0x11   : > { %s27_s7 = sadd.s32 1, %s6924_s14  ;;  %s24_s8 = ssub.s32 %s6928_s15, %s7014_s6 }
  0x12   : > { %6691 = dma.hbm_to_vmem [thread:$0]  (!%p6689_p10), %s131_s22, 9216, %s133_s25, [#allocation8], %s6931_s29, %s6931_s29, %s6932_s30  }
  0x13   : > { %6694 = dma.hbm_to_vmem [thread:$0]  (!%p6689_p10), %s145_s28, 9216, %s147_s5, [#allocation8], %s6931_s29, %s6931_s29, %s6932_s30  }
  0x14   : > { %p34_p12 = scmp.ne.s32.totalorder %s6924_s14, %s6920_s13  ;;  %p25_p13 = scmp.eq.s32.totalorder %s24_s8, 0 }
  0x15   : > { %p35_p0 = scmp.eq.s32.totalorder %s6928_s15, 0  ;;  %p6705_p5 = scmp.lt.s32.totalorder %s6928_s15, 2 }
  0x16   : > { %p7024_p3 = por %p106_p2, %p34_p12  ;;  %s160_s11 = sand.u32 1, %s6924_s14  }
  0x17   : > { %s7030_s10 = scalar_select %p25_p13, %s6924_s14, %s27_s7  }
  0x18   : > { %p36_p7 = por %p35_p0, %p34_p12  ;;  %s5543_s17 = sshll.u32 %s160_s11, 8 }
  0x19   : > { %s6136_s20 = sshll.u32 %s6928_s15, 8  ;;  %s164_s25 = scalar_lea.vmem [#allocation4], %s5543_s17 }
  0x1a   : > { %s169_s24 = scalar_lea.hbm %s9333_s0, %s6136_s20  ;;  %s172_s26 = sshll.u32 %s164_s25, 4  ;;  %s173_s26 = int_to_ptr.vmem [resolvable:$true] %s172_s26 }
  0x1b   : > { %s170_s27 = sshll.u32 %s169_s24, 4  ;;  %p7037_p2 = pnand %p6705_p5, %p36_p7  ;;  %s171_s27 = int_to_ptr.hbm [resolvable:$true] %s170_s27 }
  0x1c   : > { %s161_s29 = scalar_lea.sflag [#allocation5], %s160_s11  ;;  %s6828_s30 = sshra.s32 %s171_s27, 4  ;;  %s6829_s30 = int_to_ptr.hbm [resolvable:$true] %s6828_s30 }
  0x1d   : > { %s6830_s4 = scalar_lea.hbm %s6829_s30, 256  ;;  %p6832_p10 = pneg %p7037_p2 }
  0x1e   : > { %p6831_p9 = scmp.ne.s32.totalorder %s6829_s30, %s6830_s4  ;;  %s6835_s8 = scalar_lea.hbm %s9333_s0, 512 }
  0x1f   : > { %p6836_p0 = scmp.lt.s32.totalorder %s6829_s30, %s9333_s0  ;;  %p6837_p5 = scmp.lt.s32.totalorder %s6835_s8, %s6830_s4 }
  0x20   : > { %p6833_p12 = pnand %p6832_p10, %p6831_p9 }
  0x21   : > { %p6838_p7 = por %p6837_p5, %p6836_p0 }
  0x22   : > { %p6834_p13 = pneg %p6833_p12 }
  0x24   : > { %p6839_p11 = pnand %p6838_p7, %p6834_p13 }
  0x26   : > { %6842 = shalt.err (!%p6839_p11)
}
  0x27   : > { %s6934_s11 = smov 128   ;;  %s6935_s21 = smov 8  }
  0x28   : > { %6698 = dma.hbm_to_vmem [thread:$0]  (!%p7037_p2), %s171_s27, 4096, %s173_s26, %s161_s29, %s6934_s11, %s6934_s11, %s6935_s21  }
  0x29   : > { %184 = sbr.rel (%p7001_p8) target bundleno = 1897 (0x769), region = 32 }
  0x2e   : > { %s7054_s22 = sand.u32 1, %s6920_s13  }
  0x2f   : > { %s5547_s24 = sshll.u32 %s7054_s22, 8  ;;  %s187_s25 = scalar_lea.sflag [#allocation5], %s7054_s22 }
  0x30   : > { %s7060_s30 = scalar_lea.vmem [#allocation4], %s5547_s24 }
  0x31   : > { %6903 = dma.done.wait (%p6988_p4), %s187_s25, 4096  }
  0x32   : > { %6905 = vsyncadd (%p6988_p4), %s187_s25, 4294963200 }
  0x33   : > { %6907 = dma.done.wait (%p41_p1), [#allocation8], 18432  }
  0x34   : > { %6909 = vsyncadd (%p41_p1), [#allocation8], 4294948864  ;;  %v6152_v0 = vld [vmem:[#allocation7 + $0xf8] sm:$0xff]  ;;  %v6151_v2 = vld [vmem:[#allocation7 + $0xf0] sm:$0xff]  ;;  %vm699_vm0 = vcmask 1040384   ;;  %v9402_v52 = vmov 0 }
  0x35   : > { %v6144_v1 = vld [vmem:[#allocation7 + $0x38] sm:$0xff]  ;;  %6660 = vmatpush.bf16.msra.mxu2 %v6152_v0  ;;  %v6143_v3 = vld [vmem:[#allocation7 + $0x30] sm:$0xff]  ;;  %984 = vmatpush.bf16.msra.mxu0 %v6152_v0  ;;  %v6150_v4 = vld [vmem:[#allocation7 + $0xe8] sm:$0xff]  ;;  %vm700_vm1 = vsmask.f32 256  ;;  %vm882_vm3 = vcmask 1047552  }
  0x36   : > { %6668 = vmatpush.bf16.msra.mxu3 %v6144_v1  ;;  %1121 = vmatpush.bf16.msra.mxu1 %v6144_v1  ;;  %v6142_v5 = vld [vmem:[#allocation7 + $0x28] sm:$0xff]  ;;  %v5551_v6 = vld [vmem:[%s7060_s30 + $0x10] sm:$0xff]  ;;  %v5552_v7 = vld [vmem:[%s7060_s30 + $0x18] sm:$0xff]  ;;  %vm883_vm4 = vsmask.f32 7424  ;;  %s9174_s18 = scalar_lea.vmem [#allocation10], %s5547_s24 }
  0x37   : > { %v6149_v8 = vld [vmem:[#allocation7 + $0xe0] sm:$0xff]  ;;  %v7072_v10 = vpack.c.bf16 %v5552_v7, %v5551_v6  ;;  %v241_v12 = vld [vmem:[%s7060_s30 + $0x88] sm:$0xff]  ;;  %v238_v13 = vld [vmem:[%s7060_s30 + $0x70] sm:$0xff]  ;;  %s6281_s23 = sshll.u32 %s6979_s16, 8  ;;  %s5442_s28 = sshll.u32 %s9174_s18, 4  ;;  %s5443_s28 = int_to_ptr.vmem [resolvable:$true] %s5442_s28 }
  0x38   : > { %v6141_v9 = vld [vmem:[#allocation7 + $0x20] sm:$0xff]  ;;  %v239_v14 = vld [vmem:[%s7060_s30 + $0x78] sm:$0xff]  ;;  %v225_v16 = vld [vmem:[%s7060_s30 + $0x8] sm:$0xff]  ;;  %s5441_s16 = scalar_lea.hbm %s9336_s3, %s6281_s23  ;;  %s5430_s4 = scalar_lea.sflag [#allocation6], %s7054_s22 }
  0x39   : > { %6661 = vmatpush.bf16.msra.mxu2 %v6151_v2  ;;  %985 = vmatpush.bf16.msra.mxu0 %v6151_v2  ;;  %v240_v11 = vld [vmem:[%s7060_s30 + $0x80] sm:$0xff]  ;;  %6366 = vst [vmem:[#allocation2] sm:$0xff] %v7072_v10   ;;  %v6148_v18 = vld [vmem:[#allocation7 + $0xd8] sm:$0xff]  ;;  %v7083_v20 = vpack.c.bf16 %v239_v14, %v238_v13  ;;  %v6147_v24 = vld [vmem:[#allocation7 + $0xd0] sm:$0xff]  ;;  %v6374_v30 = vunpack.c.l.b16 %v7072_v10  ;;  %v9366_v31 = vshrl.u32 %v7072_v10, 16  ;;  %v9367_v45 = vshll.u32 %v7072_v10, 16 }
  0x3a   : > { %6669 = vmatpush.bf16.msra.mxu3 %v6143_v3  ;;  %1122 = vmatpush.bf16.msra.mxu1 %v6143_v3  ;;  %v224_v15 = vld [vmem:[%s7060_s30] sm:$0xff]  ;;  %v7081_v17 = vpack.c.bf16 %v241_v12, %v240_v11  ;;  %v6140_v19 = vld [vmem:[#allocation7 + $0x18] sm:$0xff]  ;;  %v6139_v25 = vld [vmem:[#allocation7 + $0x10] sm:$0xff]  ;;  %s5444_s29 = sshll.u32 %s5441_s16, 4  ;;  %s6878_s20 = scalar_lea.hbm %s9336_s3, 512  ;;  %s5445_s29 = int_to_ptr.hbm [resolvable:$true] %s5444_s29 }
  0x3b   : > { %9401 = vst [vmem:[#allocation14_spill] sm:$0xff] %v7083_v20  ;;  %v7085_v21 = vpack.c.bf16 %v225_v16, %v224_v15  ;;  %v6406_v26 = vunpack.c.l.b16 %v7083_v20  ;;  %v9353_v27 = vshrl.u32 %v7083_v20, 16  ;;  %v9354_v35 = vshll.u32 %v7083_v20, 16  ;;  %v6146_v36 = vld [vmem:[#allocation7 + $0xc8] sm:$0xff]  ;;  %v6145_v46 = vld [vmem:[#allocation7 + $0xc0] sm:$0xff]  ;;  %vm7111_vm2 = vmand %vm699_vm0, %vm700_vm1  ;;  %s6872_s5 = sshra.s32 %s5445_s29, 4  ;;  %s6873_s5 = int_to_ptr.hbm [resolvable:$true] %s6872_s5 }
  0x3c   : > { %v6410_v22 = vunpack.c.l.b16 %v7081_v17  ;;  %v9351_v23 = vshrl.u32 %v7081_v17, 16  ;;  %v9352_v34 = vshll.u32 %v7081_v17, 16  ;;  %v6138_v37 = vld [vmem:[#allocation7 + $0x8] sm:$0xff]  ;;  %v411_v43 = vpack.c.b16 %v6374_v30, %v6374_v30  ;;  %v6137_v47 = vld [vmem:[#allocation7] sm:$0xff]  ;;  %v242_v57 = vld [vmem:[%s7060_s30 + $0x90] sm:$0xff]  ;;  %s6874_s7 = scalar_lea.hbm %s6873_s5, 256  ;;  %p6879_p11 = scmp.lt.s32.totalorder %s6873_s5, %s9336_s3 }
  0x3d   : > { %6662 = vmatpush.bf16.msra.mxu2 %v6150_v4  ;;  %986 = vmatpush.bf16.msra.mxu0 %v6150_v4  ;;  %v6378_v28 = vunpack.c.l.b16 %v7085_v21  ;;  %v9365_v29 = vshrl.u32 %v7085_v21, 16  ;;  %v419_v38 = vpack.c.b16 %v6406_v26, %v6406_v26  ;;  %v614_v39 = vrot.slane %v9353_v27, 7  ;;  %v243_v58 = vld [vmem:[%s7060_s30 + $0x98] sm:$0xff]  ;;  %v6159_v3 = vld [vmem:[#allocation7 + $0x1b0] sm:$0xff]  ;;  %v6174_v14 = vld [vmem:[#allocation7 + $0x128] sm:$0xff]  ;;  %p6875_p1 = scmp.ne.s32.totalorder %s6873_s5, %s6874_s7  ;;  %p6880_p2 = scmp.lt.s32.totalorder %s6878_s20, %s6874_s7 }
  0x3e   : > { %6670 = vmatpush.bf16.msra.mxu3 %v6142_v5  ;;  %1123 = vmatpush.bf16.msra.mxu1 %v6142_v5  ;;  %v420_v32 = vpack.c.b16 %v6410_v22, %v6410_v22  ;;  %v621_v33 = vrot.slane %v9351_v23, 7  ;;  %v9368_v41 = vshll.u32 %v7085_v21, 16  ;;  %v558_v44 = vrot.slane %v9366_v31, 7  ;;  %v6160_v59 = vld [vmem:[#allocation7 + $0x1b8] sm:$0xff]  ;;  %v6167_v4 = vld [vmem:[#allocation7 + $0x70] sm:$0xff]  ;;  %v228_v22 = vld [vmem:[%s7060_s30 + $0x20] sm:$0xff] }
  0x3f   : > { %v412_v40 = vpack.c.b16 %v6378_v28, %v6378_v28  ;;  %v565_v42 = vrot.slane %v9365_v29, 7  ;;  %v454_v50 = vshrl.u32 %v419_v38, 16  ;;  %v617_v51 = vor.u32 %v9354_v35, %v614_v39  ;;  %v6168_v60 = vld [vmem:[#allocation7 + $0x78] sm:$0xff]  ;;  %v6175_v7 = vld [vmem:[#allocation7 + $0x130] sm:$0xff]  ;;  %v6157_v30 = vld [vmem:[#allocation7 + $0x1a0] sm:$0xff]  ;;  %p6876_p4 = pnand %p6875_p1, %p7024_p3  ;;  %p6881_p9 = por %p6880_p2, %p6879_p11 }
  0x40   : > { %v457_v48 = vshrl.u32 %v420_v32, 16  ;;  %v624_v49 = vor.u32 %v9352_v34, %v621_v33  ;;  %v9403_v52 = vsel %vm7111_vm2, 4294967295, %v9402_v52  ;;  %v430_v55 = vshrl.u32 %v411_v43, 16  ;;  %v6176_v2 = vld [vmem:[#allocation7 + $0x138] sm:$0xff]  ;;  %v6190_v34 = vld [vmem:[#allocation7 + $0xa8] sm:$0xff]  ;;  %vm7534_vm5 = vmand %vm882_vm3, %vm883_vm4 }
  0x41   : > { %6663 = vmatpush.bf16.msra.mxu2 %v6149_v8  ;;  %987 = vmatpush.bf16.msra.mxu0 %v6149_v8  ;;  %9404 = vst [vmem:[#allocation15_spill] sm:$0xff] %v9403_v52  ;;  %v433_v53 = vshrl.u32 %v412_v40, 16  ;;  %v568_v54 = vor.u32 %v9368_v41, %v565_v42  ;;  %v561_v56 = vor.u32 %v9367_v45, %v558_v44  ;;  %v6158_v8 = vld [vmem:[#allocation7 + $0x1a8] sm:$0xff]  ;;  %p6877_p8 = pneg %p6876_p4 }
  0x42   : > { %6671 = vmatpush.bf16.msra.mxu3 %v6141_v9  ;;  %1124 = vmatpush.bf16.msra.mxu1 %v6141_v9  ;;  %v7123_v61 = vsel %vm7111_vm2, %v457_v48, %v624_v49  ;;  %v7127_v62 = vsel %vm7111_vm2, %v454_v50, %v617_v51  ;;  %v7129_v63 = vpack.c.bf16 %v243_v58, %v242_v57  ;;  %v6166_v9 = vld [vmem:[#allocation7 + $0x68] sm:$0xff] }
  0x43   : > { %v703_v0 = vsel %vm7111_vm2, %v433_v53, %v568_v54  ;;  %v7135_v1 = vsel %vm7111_vm2, %v430_v55, %v561_v56  ;;  %v246_v53 = vld [vmem:[%s7060_s30 + $0xb0] sm:$0xff]  ;;  %v247_v54 = vld [vmem:[%s7060_s30 + $0xb8] sm:$0xff]  ;;  %p6882_p10 = pnand %p6881_p9, %p6877_p8 }
  0x44   : > { %v6414_v5 = vunpack.c.l.b16 %v7129_v63  ;;  %v9349_v6 = vshrl.u32 %v7129_v63, 16  ;;  %v9350_v13 = vshll.u32 %v7129_v63, 16  ;;  %v230_v55 = vld [vmem:[%s7060_s30 + $0x30] sm:$0xff]  ;;  %v231_v56 = vld [vmem:[%s7060_s30 + $0x38] sm:$0xff]  ;;  %v7184_v58 = vpack.c.bf16 %v247_v54, %v246_v53  ;;  %v252_v53 = vld [vmem:[%s7060_s30 + $0xe0] sm:$0xff] }
  0x45   : > { %6664 = vmatpush.bf16.msra.mxu2 %v6148_v18  ;;  %988 = vmatpush.bf16.msra.mxu0 %v6148_v18  ;;  %v244_v18 = vld [vmem:[%s7060_s30 + $0xa0] sm:$0xff] }
  0x46   : > { %6672 = vmatpush.bf16.msra.mxu3 %v6140_v19  ;;  %1125 = vmatpush.bf16.msra.mxu1 %v6140_v19  ;;  %v421_v11 = vpack.c.b16 %v6414_v5, %v6414_v5  ;;  %v628_v12 = vrot.slane %v9349_v6, 7  ;;  %v245_v19 = vld [vmem:[%s7060_s30 + $0xa8] sm:$0xff]  ;;  %v6172_v5 = vld [vmem:[#allocation7 + $0x118] sm:$0xff] }
  0x47   : > { %v7155_v26 = vpack.c.bf16 %v245_v19, %v244_v18 }
  0x48   : > { %v460_v15 = vshrl.u32 %v421_v11, 16  ;;  %v631_v16 = vor.u32 %v9350_v13, %v628_v12  ;;  %v9342_v12 = vshll.u32 %v7184_v58, 16 }
  0x49   : > { %6665 = vmatpush.bf16.msra.mxu2 %v6147_v24  ;;  %989 = vmatpush.bf16.msra.mxu0 %v6147_v24  ;;  %v229_v24 = vld [vmem:[%s7060_s30 + $0x28] sm:$0xff]  ;;  %v6418_v32 = vunpack.c.l.b16 %v7155_v26  ;;  %v9344_v33 = vshrl.u32 %v7155_v26, 16  ;;  %v9345_v43 = vshll.u32 %v7155_v26, 16 }
  0x4a   : > { %6673 = vmatpush.bf16.msra.mxu3 %v6139_v25  ;;  %1126 = vmatpush.bf16.msra.mxu1 %v6139_v25  ;;  %v7153_v25 = vsel %vm7111_vm2, %v460_v15, %v631_v16  ;;  %v7157_v28 = vpack.c.bf16 %v229_v24, %v228_v22 }
  0x4b   : > { %v422_v40 = vpack.c.b16 %v6418_v32, %v6418_v32  ;;  %v635_v42 = vrot.slane %v9344_v33, 7  ;;  %v249_v32 = vld [vmem:[%s7060_s30 + $0xc8] sm:$0xff]  ;;  %v6180_v33 = vld [vmem:[#allocation7 + $0x1d8] sm:$0xff] }
  0x4c   : > { %v6386_v38 = vunpack.c.l.b16 %v7157_v28  ;;  %v9363_v39 = vshrl.u32 %v7157_v28, 16 }
  0x4d   : > { %6666 = vmatpush.bf16.msra.mxu2 %v6146_v36  ;;  %990 = vmatpush.bf16.msra.mxu0 %v6146_v36  ;;  %v6165_v36 = vld [vmem:[#allocation7 + $0x60] sm:$0xff]  ;;  %v463_v48 = vshrl.u32 %v422_v40, 16  ;;  %v638_v49 = vor.u32 %v9345_v43, %v635_v42 }
  0x4e   : > { %6674 = vmatpush.bf16.msra.mxu3 %v6138_v37  ;;  %1127 = vmatpush.bf16.msra.mxu1 %v6138_v37  ;;  %v6173_v37 = vld [vmem:[#allocation7 + $0x120] sm:$0xff]  ;;  %v414_v44 = vpack.c.b16 %v6386_v38, %v6386_v38 }
  0x4f   : > { %v7182_v57 = vsel %vm7111_vm2, %v463_v48, %v638_v49 }
  0x50   : > { %v439_v50 = vshrl.u32 %v414_v44, 16 }
  0x51   : > { %6667 = vmatpush.bf16.msra.mxu2 %v6145_v46  ;;  %991 = vmatpush.bf16.msra.mxu0 %v6145_v46  ;;  %v579_v46 = vrot.slane %v9363_v39, 7 }
  0x52   : > { %6675 = vmatpush.bf16.msra.mxu3 %v6137_v47  ;;  %1128 = vmatpush.bf16.msra.mxu1 %v6137_v47  ;;  %v9364_v47 = vshll.u32 %v7157_v28, 16 }
  0x54   : > { %1032 = vmatmul.bf16.vlgmr.msra.gmra.mxu2 %v7123_v61  ;;  %992 = vmatmul.bf16.vlgmr.msra.gmra.mxu0 %v703_v0  ;;  %v582_v51 = vor.u32 %v9364_v47, %v579_v46  ;;  %v6155_v46 = vld [vmem:[#allocation7 + $0x190] sm:$0xff]  ;;  %v6188_v47 = vld [vmem:[#allocation7 + $0x98] sm:$0xff] }
  0x55   : > { %1275 = vmatpush.bf16.msrb.mxu2 %v6160_v59  ;;  %1169 = vmatmul.bf16.vlgmr.msra.gmra.mxu3 %v7127_v62 }
  0x56   : > { %1477 = vmatpush.bf16.msrb.mxu3 %v6168_v60  ;;  %1129 = vmatmul.bf16.vlgmr.msra.gmra.mxu1 %v7135_v1  ;;  %v7188_v59 = vsel %vm7111_vm2, %v439_v50, %v582_v51  ;;  %v7190_v60 = vpack.c.bf16 %v231_v56, %v230_v55  ;;  %v6163_v50 = vld [vmem:[#allocation7 + $0x50] sm:$0xff]  ;;  %v253_v56 = vld [vmem:[%s7060_s30 + $0xe8] sm:$0xff] }
  0x57   : > { %1664 = vmatpush.bf16.msrb.mxu0 %v6176_v2  ;;  %v6422_v2 = vunpack.c.l.b16 %v7184_v58  ;;  %v6171_v51 = vld [vmem:[#allocation7 + $0x110] sm:$0xff] }
  0x58   : > { %v9362_v16 = vshll.u32 %v7190_v60, 16 }
  0x59   : > { %1276 = vmatpush.bf16.msrb.mxu2 %v6159_v3  ;;  %v9341_v3 = vshrl.u32 %v7184_v58, 16 }
  0x5a   : > { %1478 = vmatpush.bf16.msrb.mxu3 %v6167_v4  ;;  %v6164_v4 = vld [vmem:[#allocation7 + $0x58] sm:$0xff] }
  0x5b   : > { %1665 = vmatpush.bf16.msrb.mxu0 %v6175_v7  ;;  %v6390_v7 = vunpack.c.l.b16 %v7190_v60  ;;  %v642_v11 = vrot.slane %v9341_v3, 7 }
  0x5d   : > { %1277 = vmatpush.bf16.msrb.mxu2 %v6158_v8  ;;  %v9361_v8 = vshrl.u32 %v7190_v60, 16  ;;  %v645_v19 = vor.u32 %v9342_v12, %v642_v11 }
  0x5e   : > { %1479 = vmatpush.bf16.msrb.mxu3 %v6166_v9  ;;  %v423_v9 = vpack.c.b16 %v6422_v2, %v6422_v2 }
  0x5f   : > { %1666 = vmatpush.bf16.msrb.mxu0 %v6174_v14  ;;  %v415_v14 = vpack.c.b16 %v6390_v7, %v6390_v7  ;;  %v586_v15 = vrot.slane %v9361_v8, 7 }
  0x60   : > { %v466_v18 = vshrl.u32 %v423_v9, 16 }
  0x61   : > { %1278 = vmatpush.bf16.msrb.mxu2 %v6157_v30  ;;  %v442_v22 = vshrl.u32 %v415_v14, 16  ;;  %v589_v24 = vor.u32 %v9362_v16, %v586_v15  ;;  %v248_v30 = vld [vmem:[%s7060_s30 + $0xc0] sm:$0xff] }
  0x62   : > { %1480 = vmatpush.bf16.msrb.mxu3 %v6165_v36  ;;  %v232_v36 = vld [vmem:[%s7060_s30 + $0x40] sm:$0xff]  ;;  %v7216_v38 = vsel %vm7111_vm2, %v466_v18, %v645_v19  ;;  %v7218_v40 = vpack.c.bf16 %v249_v32, %v248_v30  ;;  %v234_v30 = vld [vmem:[%s7060_s30 + $0x50] sm:$0xff]  ;;  %v235_v32 = vld [vmem:[%s7060_s30 + $0x58] sm:$0xff] }
  0x63   : > { %1667 = vmatpush.bf16.msrb.mxu0 %v6173_v37  ;;  %v233_v37 = vld [vmem:[%s7060_s30 + $0x48] sm:$0xff]  ;;  %v7222_v42 = vsel %vm7111_vm2, %v442_v22, %v589_v24  ;;  %v250_v22 = vld [vmem:[%s7060_s30 + $0xd0] sm:$0xff]  ;;  %v251_v24 = vld [vmem:[%s7060_s30 + $0xd8] sm:$0xff] }
  0x64   : > { %1037 = vmatmul.bf16.gmra.mxu2 %v7153_v25  ;;  %997 = vmatmul.bf16.gmra.mxu0 %v7135_v1  ;;  %v7224_v44 = vpack.c.bf16 %v233_v37, %v232_v36  ;;  %v6426_v48 = vunpack.c.l.b16 %v7218_v40  ;;  %v9339_v49 = vshrl.u32 %v7218_v40, 16  ;;  %v7257_v37 = vpack.c.bf16 %v251_v24, %v250_v22 }
  0x65   : > { %1174 = vmatmul.bf16.gmra.mxu3 %v7123_v61 }
  0x66   : > { %1134 = vmatmul.bf16.gmra.mxu1 %v703_v0  ;;  %v6156_v0 = vld [vmem:[#allocation7 + $0x198] sm:$0xff]  ;;  %1481 = vmatpush.bf16.msrb.mxu3 %v6164_v4  ;;  %v6394_v54 = vunpack.c.l.b16 %v7224_v44  ;;  %v9359_v55 = vshrl.u32 %v7224_v44, 16  ;;  %v424_v2 = vpack.c.b16 %v6426_v48, %v6426_v48  ;;  %v649_v4 = vrot.slane %v9339_v49, 7 }
  0x67   : > { %1279 = vmatpush.bf16.msrb.mxu2 %v6156_v0  ;;  %1668 = vmatpush.bf16.msrb.mxu0 %v6172_v5  ;;  %v7236_v0 = vpack.c.bf16 %v253_v56, %v252_v53  ;;  %v9340_v5 = vshll.u32 %v7218_v40, 16  ;;  %v9360_v11 = vshll.u32 %v7224_v44, 16  ;;  %v7263_v48 = vpack.c.bf16 %v235_v32, %v234_v30  ;;  %v6170_v56 = vld [vmem:[#allocation7 + $0x108] sm:$0xff] }
  0x68   : > { %v416_v7 = vpack.c.b16 %v6394_v54, %v6394_v54  ;;  %v593_v9 = vrot.slane %v9359_v55, 7  ;;  %v469_v14 = vshrl.u32 %v424_v2, 16  ;;  %v9337_v53 = vshrl.u32 %v7257_v37, 16  ;;  %v6162_v54 = vld [vmem:[#allocation7 + $0x48] sm:$0xff]  ;;  %v6184_v2 = vld [vmem:[#allocation7 + $0x1f8] sm:$0xff] }
  0x69   : > { %6371 = vst [vmem:[#allocation2 + $0x88] sm:$0xff] %v7236_v0   ;;  %v652_v15 = vor.u32 %v9340_v5, %v649_v4  ;;  %v6398_v4 = vunpack.c.l.b16 %v7263_v48  ;;  %1851 = vmatpush.bf16.msrb.mxu1 %v6184_v2  ;;  %v9358_v22 = vshll.u32 %v7263_v48, 16 }
  0x6a   : > { %1482 = vmatpush.bf16.msrb.mxu3 %v6163_v50  ;;  %v445_v18 = vshrl.u32 %v416_v7, 16  ;;  %v596_v19 = vor.u32 %v9360_v11, %v593_v9  ;;  %v6154_v50 = vld [vmem:[#allocation7 + $0x188] sm:$0xff]  ;;  %v9357_v7 = vshrl.u32 %v7263_v48, 16 }
  0x6b   : > { %1280 = vmatpush.bf16.msrb.mxu2 %v6155_v46  ;;  %1669 = vmatpush.bf16.msrb.mxu0 %v6171_v51  ;;  %v7255_v36 = vsel %vm7111_vm2, %v469_v14, %v652_v15  ;;  %v6430_v51 = vunpack.c.l.b16 %v7257_v37  ;;  %v656_v14 = vrot.slane %v9337_v53, 7  ;;  %v9338_v15 = vshll.u32 %v7257_v37, 16 }
  0x6c   : > { %v7261_v46 = vsel %vm7111_vm2, %v445_v18, %v596_v19  ;;  %v417_v18 = vpack.c.b16 %v6398_v4, %v6398_v4  ;;  %v600_v19 = vrot.slane %v9357_v7, 7 }
  0x6d   : > { %v425_v9 = vpack.c.b16 %v6430_v51, %v6430_v51  ;;  %v659_v30 = vor.u32 %v9338_v15, %v656_v14  ;;  %v236_v51 = vld [vmem:[%s7060_s30 + $0x60] sm:$0xff]  ;;  %v9346_v15 = vshll.u32 %v7236_v0, 16 }
  0x6e   : > { %1483 = vmatpush.bf16.msrb.mxu3 %v6162_v54  ;;  %v448_v32 = vshrl.u32 %v417_v18, 16  ;;  %v237_v54 = vld [vmem:[%s7060_s30 + $0x68] sm:$0xff]  ;;  %v6153_v14 = vld [vmem:[#allocation7 + $0x180] sm:$0xff]  ;;  %v6434_v18 = vunpack.c.l.b16 %v7236_v0 }
  0x6f   : > { %1281 = vmatpush.bf16.msrb.mxu2 %v6154_v50  ;;  %1670 = vmatpush.bf16.msrb.mxu0 %v6170_v56  ;;  %v472_v24 = vshrl.u32 %v425_v9, 16  ;;  %v603_v50 = vor.u32 %v9358_v22, %v600_v19  ;;  %v7293_v4 = vpack.c.bf16 %v237_v54, %v236_v51  ;;  %v6183_v9 = vld [vmem:[#allocation7 + $0x1f0] sm:$0xff]  ;;  %v9343_v19 = vshrl.u32 %v7236_v0, 16  ;;  %v6169_v51 = vld [vmem:[#allocation7 + $0x100] sm:$0xff] }
  0x70   : > { %1852 = vmatpush.bf16.msrb.mxu1 %v6183_v9  ;;  %v426_v54 = vpack.c.b16 %v6434_v18, %v6434_v18  ;;  %v6181_v9 = vld [vmem:[#allocation7 + $0x1e0] sm:$0xff] }
  0x71   : > { %v7287_v56 = vsel %vm7111_vm2, %v472_v24, %v659_v30  ;;  %v7291_v2 = vsel %vm7111_vm2, %v448_v32, %v603_v50  ;;  %v6161_v24 = vld [vmem:[#allocation7 + $0x40] sm:$0xff]  ;;  %v6402_v30 = vunpack.c.l.b16 %v7293_v4  ;;  %v9355_v32 = vshrl.u32 %v7293_v4, 16  ;;  %v6182_v50 = vld [vmem:[#allocation7 + $0x1e8] sm:$0xff] }
  0x72   : > { %1484 = vmatpush.bf16.msrb.mxu3 %v6161_v24  ;;  %v663_v53 = vrot.slane %v9343_v19, 7  ;;  %v9356_v3 = vshll.u32 %v7293_v4, 16  ;;  %v255_v19 = vld [vmem:[%s7060_s30 + $0xf8] sm:$0xff]  ;;  %v6189_v22 = vld [vmem:[#allocation7 + $0xa0] sm:$0xff] }
  0x73   : > { %1282 = vmatpush.bf16.msrb.mxu2 %v6153_v14  ;;  %1671 = vmatpush.bf16.msrb.mxu0 %v6169_v51  ;;  %v418_v49 = vpack.c.b16 %v6402_v30, %v6402_v30  ;;  %v607_v5 = vrot.slane %v9355_v32, 7  ;;  %v475_v14 = vshrl.u32 %v426_v54, 16  ;;  %v254_v51 = vld [vmem:[%s7060_s30 + $0xf0] sm:$0xff]  ;;  %v6178_v54 = vld [vmem:[#allocation7 + $0x1c8] sm:$0xff] }
  0x74   : > { %1042 = vmatmul.bf16.gmra.mxu2 %v7182_v57  ;;  %1002 = vmatmul.bf16.gmra.mxu0 %v7188_v59  ;;  %v666_v12 = vor.u32 %v9346_v15, %v663_v53  ;;  %v7319_v43 = vpack.c.bf16 %v255_v19, %v254_v51  ;;  %v6179_v53 = vld [vmem:[#allocation7 + $0x1d0] sm:$0xff]  ;;  %v6200_v19 = vld [vmem:[#allocation7 + $0x178] sm:$0xff] }
  0x75   : > { %1179 = vmatmul.bf16.gmra.mxu3 %v7153_v25  ;;  %1853 = vmatpush.bf16.msrb.mxu1 %v6182_v50  ;;  %v451_v24 = vshrl.u32 %v418_v49, 16  ;;  %v610_v18 = vor.u32 %v9356_v3, %v607_v5  ;;  %v6192_v49 = vld [vmem:[#allocation7 + $0xb8] sm:$0xff] }
  0x76   : > { %1139 = vmatmul.bf16.gmra.mxu1 %v7135_v1  ;;  %v7317_v30 = vsel %vm7111_vm2, %v475_v14, %v666_v12  ;;  %v6438_v12 = vunpack.c.l.b16 %v7319_v43  ;;  %v9347_v5 = vshrl.u32 %v7319_v43, 16  ;;  %2223 = vmatpush.bf16.msra.mxu3 %v6200_v19  ;;  %v9348_v14 = vshll.u32 %v7319_v43, 16 }
  0x77   : > { %v7323_v50 = vsel %vm7111_vm2, %v451_v24, %v610_v18  ;;  %2037 = vmatpush.bf16.msra.mxu2 %v6192_v49  ;;  %v6177_v24 = vld [vmem:[#allocation7 + $0x1c0] sm:$0xff]  ;;  %v6208_v18 = vld [vmem:[#allocation7 + $0x238] sm:$0xff] }
  0x78   : > { %2409 = vmatpush.bf16.msra.mxu0 %v6208_v18 }
  0x79   : > { %1854 = vmatpush.bf16.msrb.mxu1 %v6181_v9  ;;  %v670_v9 = vrot.slane %v9347_v5, 7 }
  0x7b   : > { %v673_v15 = vor.u32 %v9348_v14, %v670_v9 }
  0x7d   : > { %1855 = vmatpush.bf16.msrb.mxu1 %v6180_v33  ;;  %v427_v33 = vpack.c.b16 %v6438_v12, %v6438_v12 }
  0x7f   : > { %v478_v51 = vshrl.u32 %v427_v33, 16 }
  0x81   : > { %1856 = vmatpush.bf16.msrb.mxu1 %v6179_v53  ;;  %v7338_v53 = vsel %vm7111_vm2, %v478_v51, %v673_v15  ;;  %v6199_v15 = vld [vmem:[#allocation7 + $0x170] sm:$0xff] }
  0x82   : > { %2224 = vmatpush.bf16.msra.mxu3 %v6199_v15 }
  0x84   : > { %1047 = vmatmul.bf16.gmra.mxu2 %v7216_v38  ;;  %1007 = vmatmul.bf16.gmra.mxu0 %v7222_v42 }
  0x85   : > { %1184 = vmatmul.bf16.gmra.mxu3 %v7182_v57  ;;  %1857 = vmatpush.bf16.msrb.mxu1 %v6178_v54  ;;  %v6191_v54 = vld [vmem:[#allocation7 + $0xb0] sm:$0xff] }
  0x86   : > { %1144 = vmatmul.bf16.gmra.mxu1 %v7188_v59  ;;  %2038 = vmatpush.bf16.msra.mxu2 %v6191_v54 }
  0x89   : > { %1858 = vmatpush.bf16.msrb.mxu1 %v6177_v24 }
  0x8a   : > { %2039 = vmatpush.bf16.msra.mxu2 %v6190_v34 }
  0x8e   : > { %2040 = vmatpush.bf16.msra.mxu2 %v6189_v22 }
  0x92   : > { %2041 = vmatpush.bf16.msra.mxu2 %v6188_v47 }
  0x94   : > { %1052 = vmatmul.bf16.gmra.mxu2 %v7255_v36  ;;  %1012 = vmatmul.bf16.gmra.mxu0 %v7261_v46 }
  0x95   : > { %1189 = vmatmul.bf16.gmra.mxu3 %v7216_v38 }
  0x96   : > { %1149 = vmatmul.bf16.gmra.mxu1 %v7222_v42 }
  0xa4   : > { %1057 = vmatmul.bf16.gmra.mxu2 %v7287_v56  ;;  %1017 = vmatmul.bf16.gmra.mxu0 %v7291_v2 }
  0xa5   : > { %1194 = vmatmul.bf16.gmra.mxu3 %v7255_v36 }
  0xa6   : > { %1154 = vmatmul.bf16.gmra.mxu1 %v7261_v46 }
  0xb4   : > { %1062 = vmatmul.bf16.gmra.mxu2 %v7317_v30  ;;  %1022 = vmatmul.bf16.gmra.mxu0 %v7323_v50 }
  0xb5   : > { %1199 = vmatmul.bf16.gmra.mxu3 %v7287_v56 }
  0xb6   : > { %1159 = vmatmul.bf16.gmra.mxu1 %v7291_v2 }
  0xc4   : > { %1067 = vmatmul.bf16.gmra.mxu2 %v7338_v53  ;;  %1027 = vmatmul.bf16.gmra.mxu0 %v7127_v62 }
  0xc5   : > { %1204 = vmatmul.bf16.gmra.mxu3 %v7317_v30 }
  0xc6   : > { %1164 = vmatmul.bf16.gmra.mxu1 %v7323_v50 }
  0xd1   : > { %v993_v49 = vpop.f32.mrf.mxu0 }
  0xd3   : > { %v1130_v12 = vpop.f32.mrf.mxu1 }
  0xd4   : > { %v7344_v19 = vadd.f32 %v1130_v12, %v993_v49  ;;  %1283 = vmatmul.bf16.vlgmr.msrb.gmra.mxu2 %v7135_v1  ;;  %1672 = vmatmul.bf16.vlgmr.msrb.gmra.mxu0 %v7085_v21  ;;  %v6207_v12 = vld [vmem:[#allocation7 + $0x230] sm:$0xff] }
  0xd5   : > { %1485 = vmatmul.bf16.vlgmr.msrb.gmra.mxu3 %v7072_v10  ;;  %2410 = vmatpush.bf16.msra.mxu0 %v6207_v12 }
  0xd6   : > { %1859 = vmatmul.bf16.vlgmr.msrb.gmra.mxu1 %v7072_v10 }
  0xd7   : > { %v1033_v33 = vpop.f32.mrf.mxu2 }
  0xd8   : > { %v1170_v9 = vpop.f32.mrf.mxu3 }
  0xd9   : > { %v7350_v24 = vadd.f32 %v1170_v9, %v1033_v33  ;;  %v995_v18 = vpop.f32.mrf.mxu0 }
  0xdb   : > { %v1132_v51 = vpop.f32.mrf.mxu1 }
  0xdc   : > { %v7352_v49 = vadd.f32 %v1132_v51, %v995_v18 }
  0xdf   : > { %v1035_v1 = vpop.f32.mrf.mxu2 }
  0xe0   : > { %v1172_v5 = vpop.f32.mrf.mxu3 }
  0xe1   : > { %v7354_v14 = vadd.f32 %v1172_v5, %v1035_v1  ;;  %v998_v6 = vpop.f32.mrf.mxu0 }
  0xe3   : > { %v1135_v13 = vpop.f32.mrf.mxu1 }
  0xe4   : > { %v7356_v23 = vadd.f32 %v1135_v13, %v998_v6  ;;  %1288 = vmatmul.bf16.gmra.mxu2 %v7188_v59  ;;  %1677 = vmatmul.bf16.gmra.mxu0 %v7072_v10 }
  0xe5   : > { %1490 = vmatmul.bf16.gmra.mxu3 %v7085_v21 }
  0xe6   : > { %1864 = vmatmul.bf16.gmra.mxu1 %v7157_v28 }
  0xe7   : > { %v1038_v54 = vpop.f32.mrf.mxu2 }
  0xe8   : > { %v1175_v15 = vpop.f32.mrf.mxu3 }
  0xe9   : > { %v7362_v33 = vadd.f32 %v1175_v15, %v1038_v54  ;;  %v1000_v9 = vpop.f32.mrf.mxu0  ;;  %v6198_v54 = vld [vmem:[#allocation7 + $0x168] sm:$0xff] }
  0xea   : > { %2225 = vmatpush.bf16.msra.mxu3 %v6198_v54 }
  0xeb   : > { %v1137_v18 = vpop.f32.mrf.mxu1 }
  0xec   : > { %v7364_v5 = vadd.f32 %v1137_v18, %v1000_v9 }
  0xef   : > { %v1040_v51 = vpop.f32.mrf.mxu2 }
  0xf0   : > { %v1177_v12 = vpop.f32.mrf.mxu3 }
  0xf1   : > { %v7366_v6 = vadd.f32 %v1177_v12, %v1040_v51  ;;  %v1003_v13 = vpop.f32.mrf.mxu0 }
  0xf3   : > { %v1140_v59 = vpop.f32.mrf.mxu1 }
  0xf4   : > { %v7368_v1 = vadd.f32 %v1140_v59, %v1003_v13  ;;  %1293 = vmatmul.bf16.gmra.mxu2 %v7222_v42  ;;  %1682 = vmatmul.bf16.gmra.mxu0 %v7157_v28  ;;  %v6206_v59 = vld [vmem:[#allocation7 + $0x228] sm:$0xff] }
  0xf5   : > { %1495 = vmatmul.bf16.gmra.mxu3 %v7072_v10  ;;  %2411 = vmatpush.bf16.msra.mxu0 %v6206_v59 }
  0xf6   : > { %1869 = vmatmul.bf16.gmra.mxu1 %v7190_v60 }
  0xf7   : > { %v1043_v15 = vpop.f32.mrf.mxu2 }
  0xf8   : > { %v1180_v9 = vpop.f32.mrf.mxu3 }
  0xf9   : > { %v7374_v18 = vadd.f32 %v1180_v9, %v1043_v15  ;;  %v1005_v51 = vpop.f32.mrf.mxu0 }
  0xfb   : > { %v1142_v12 = vpop.f32.mrf.mxu1 }
  0xfc   : > { %v7376_v13 = vadd.f32 %v1142_v12, %v1005_v51 }
  0xff   : > { %v1045_v42 = vpop.f32.mrf.mxu2 }
 0x100   : > { %v1182_v27 = vpop.f32.mrf.mxu3 }
 0x101   : > { %v7378_v35 = vadd.f32 %v1182_v27, %v1045_v42  ;;  %v1008_v32 = vpop.f32.mrf.mxu0 }
 0x103   : > { %v1145_v3 = vpop.f32.mrf.mxu1 }
 0x104   : > { %v7380_v7 = vadd.f32 %v1145_v3, %v1008_v32  ;;  %1298 = vmatmul.bf16.gmra.mxu2 %v7261_v46  ;;  %1687 = vmatmul.bf16.gmra.mxu0 %v7190_v60 }
 0x105   : > { %1500 = vmatmul.bf16.gmra.mxu3 %v7157_v28 }
 0x106   : > { %1874 = vmatmul.bf16.gmra.mxu1 %v7224_v44 }
 0x107   : > { %v1048_v34 = vpop.f32.mrf.mxu2 }
 0x108   : > { %v1185_v54 = vpop.f32.mrf.mxu3 }
 0x109   : > { %v7386_v15 = vadd.f32 %v1185_v54, %v1048_v34  ;;  %v1010_v9 = vpop.f32.mrf.mxu0  ;;  %v6197_v34 = vld [vmem:[#allocation7 + $0x160] sm:$0xff] }
 0x10a   : > { %2226 = vmatpush.bf16.msra.mxu3 %v6197_v34 }
 0x10b   : > { %v1147_v51 = vpop.f32.mrf.mxu1 }
 0x10c   : > { %v7388_v27 = vadd.f32 %v1147_v51, %v1010_v9 }
 0x10f   : > { %v1050_v12 = vpop.f32.mrf.mxu2 }
 0x110   : > { %v1187_v59 = vpop.f32.mrf.mxu3 }
 0x111   : > { %v7390_v3 = vadd.f32 %v1187_v59, %v1050_v12  ;;  %v1013_v32 = vpop.f32.mrf.mxu0 }
 0x113   : > { %v1150_v46 = vpop.f32.mrf.mxu1 }
 0x114   : > { %v7392_v42 = vadd.f32 %v1150_v46, %v1013_v32  ;;  %1303 = vmatmul.bf16.gmra.mxu2 %v7291_v2  ;;  %1692 = vmatmul.bf16.gmra.mxu0 %v7224_v44  ;;  %v6205_v46 = vld [vmem:[#allocation7 + $0x220] sm:$0xff] }
 0x115   : > { %1505 = vmatmul.bf16.gmra.mxu3 %v7190_v60  ;;  %2412 = vmatpush.bf16.msra.mxu0 %v6205_v46 }
 0x116   : > { %1879 = vmatmul.bf16.gmra.mxu1 %v7263_v48 }
 0x117   : > { %v1053_v54 = vpop.f32.mrf.mxu2 }
 0x118   : > { %v1190_v9 = vpop.f32.mrf.mxu3 }
 0x119   : > { %v7398_v51 = vadd.f32 %v1190_v9, %v1053_v54  ;;  %v1015_v12 = vpop.f32.mrf.mxu0 }
 0x11b   : > { %v1152_v59 = vpop.f32.mrf.mxu1 }
 0x11c   : > { %v7400_v32 = vadd.f32 %v1152_v59, %v1015_v12 }
 0x11f   : > { %v1055_v2 = vpop.f32.mrf.mxu2 }
 0x120   : > { %v1192_v55 = vpop.f32.mrf.mxu3 }
 0x121   : > { %v7402_v11 = vadd.f32 %v1192_v55, %v1055_v2  ;;  %v1018_v8 = vpop.f32.mrf.mxu0 }
 0x123   : > { %9405 = vst [vmem:[#allocation16_spill] sm:$0xff] %v7402_v11  ;;  %v1155_v16 = vpop.f32.mrf.mxu1 }
 0x124   : > { %v7404_v39 = vadd.f32 %v1155_v16, %v1018_v8  ;;  %1308 = vmatmul.bf16.gmra.mxu2 %v7323_v50  ;;  %1697 = vmatmul.bf16.gmra.mxu0 %v7263_v48 }
 0x125   : > { %1510 = vmatmul.bf16.gmra.mxu3 %v7224_v44 }
 0x126   : > { %1884 = vmatmul.bf16.gmra.mxu1 %v7293_v4 }
 0x127   : > { %v1058_v22 = vpop.f32.mrf.mxu2 }
 0x128   : > { %v1195_v34 = vpop.f32.mrf.mxu3 }
 0x129   : > { %v7410_v54 = vadd.f32 %v1195_v34, %v1058_v22  ;;  %v1020_v9 = vpop.f32.mrf.mxu0  ;;  %v6196_v22 = vld [vmem:[#allocation7 + $0x158] sm:$0xff] }
 0x12a   : > { %2227 = vmatpush.bf16.msra.mxu3 %v6196_v22 }
 0x12b   : > { %9406 = vst [vmem:[#allocation17_spill] sm:$0xff] %v7410_v54  ;;  %v1157_v12 = vpop.f32.mrf.mxu1 }
 0x12c   : > { %v7412_v55 = vadd.f32 %v1157_v12, %v1020_v9 }
 0x12f   : > { %v1060_v59 = vpop.f32.mrf.mxu2 }
 0x130   : > { %v1197_v46 = vpop.f32.mrf.mxu3 }
 0x131   : > { %v7414_v8 = vadd.f32 %v1197_v46, %v1060_v59  ;;  %v1023_v16 = vpop.f32.mrf.mxu0 }
 0x133   : > { %9407 = vst [vmem:[#allocation18_spill] sm:$0xff] %v7414_v8  ;;  %v1160_v50 = vpop.f32.mrf.mxu1 }
 0x134   : > { %v7416_v2 = vadd.f32 %v1160_v50, %v1023_v16  ;;  %1313 = vmatmul.bf16.gmra.mxu2 %v7127_v62  ;;  %1702 = vmatmul.bf16.gmra.mxu0 %v7293_v4  ;;  %v6204_v50 = vld [vmem:[#allocation7 + $0x218] sm:$0xff] }
 0x135   : > { %1515 = vmatmul.bf16.gmra.mxu3 %v7263_v48  ;;  %2413 = vmatpush.bf16.msra.mxu0 %v6204_v50 }
 0x136   : > { %1889 = vmatmul.bf16.gmra.mxu1 %v7083_v20 }
 0x137   : > { %v1063_v34 = vpop.f32.mrf.mxu2 }
 0x138   : > { %v1200_v9 = vpop.f32.mrf.mxu3 }
 0x139   : > { %v7422_v12 = vadd.f32 %v1200_v9, %v1063_v34  ;;  %v1025_v59 = vpop.f32.mrf.mxu0 }
 0x13b   : > { %9408 = vst [vmem:[#allocation19_spill] sm:$0xff] %v7422_v12  ;;  %v1162_v46 = vpop.f32.mrf.mxu1 }
 0x13c   : > { %v7424_v16 = vadd.f32 %v1162_v46, %v1025_v59 }
 0x13f   : > { %v1065_v62 = vpop.f32.mrf.mxu2 }
 0x140   : > { %v1202_v29 = vpop.f32.mrf.mxu3 }
 0x141   : > { %v7426_v31 = vadd.f32 %v1202_v29, %v1065_v62  ;;  %v1028_v45 = vpop.f32.mrf.mxu0  ;;  %v6187_v62 = vld [vmem:[#allocation7 + $0x90] sm:$0xff] }
 0x142   : > { %2042 = vmatpush.bf16.msra.mxu2 %v6187_v62 }
 0x143   : > { %9409 = vst [vmem:[#allocation20_spill] sm:$0xff] %v7426_v31  ;;  %v1165_v41 = vpop.f32.mrf.mxu1 }
 0x144   : > { %v7428_v52 = vadd.f32 %v1165_v41, %v1028_v45  ;;  %1318 = vmatmul.bf16.gmra.mxu2 %v7123_v61  ;;  %1707 = vmatmul.bf16.gmra.mxu0 %v7083_v20 }
 0x145   : > { %1520 = vmatmul.bf16.gmra.mxu3 %v7293_v4 }
 0x146   : > { %1894 = vmatmul.bf16.gmra.mxu1 %v7081_v17 }
 0x147   : > { %v1068_v47 = vpop.f32.mrf.mxu2 }
 0x148   : > { %v1205_v22 = vpop.f32.mrf.mxu3 }
 0x149   : > { %v7434_v34 = vadd.f32 %v1205_v22, %v1068_v47  ;;  %v1030_v9 = vpop.f32.mrf.mxu0  ;;  %v6195_v47 = vld [vmem:[#allocation7 + $0x150] sm:$0xff] }
 0x14a   : > { %2228 = vmatpush.bf16.msra.mxu3 %v6195_v47 }
 0x14b   : > { %9410 = vst [vmem:[#allocation21_spill] sm:$0xff] %v7434_v34  ;;  %v1167_v29 = vpop.f32.mrf.mxu1 }
 0x14c   : > { %v7436_v59 = vadd.f32 %v1167_v29, %v1030_v9 }
 0x14f   : > { %v1070_v46 = vpop.f32.mrf.mxu2 }
 0x150   : > { %v1207_v50 = vpop.f32.mrf.mxu3 }
 0x151   : > { %v7438_v41 = vadd.f32 %v1207_v50, %v1070_v46  ;;  %v1673_v45 = vpop.f32.mrf.mxu0 }
 0x153   : > { %9411 = vst [vmem:[#allocation22_spill] sm:$0xff] %v7438_v41  ;;  %v1860_v61 = vpop.f32.mrf.mxu1 }
 0x154   : > { %1323 = vmatmul.bf16.gmra.mxu2 %v7153_v25  ;;  %1712 = vmatmul.bf16.gmra.mxu0 %v7081_v17  ;;  %v6203_v25 = vld [vmem:[#allocation7 + $0x210] sm:$0xff] }
 0x155   : > { %1525 = vmatmul.bf16.gmra.mxu3 %v7083_v20  ;;  %2414 = vmatpush.bf16.msra.mxu0 %v6203_v25  ;;  %v6186_v25 = vld [vmem:[#allocation7 + $0x88] sm:$0xff] }
 0x156   : > { %1899 = vmatmul.bf16.gmra.mxu1 %v7129_v63  ;;  %2043 = vmatpush.bf16.msra.mxu2 %v6186_v25 }
 0x157   : > { %v1284_v22 = vpop.f32.mrf.mxu2 }
 0x158   : > { %v1486_v9 = vpop.f32.mrf.mxu3  ;;  %v1364_v29 = vadd.f32 %v1284_v22, %v7344_v19 }
 0x159   : > { %v1675_v50 = vpop.f32.mrf.mxu0 }
 0x15a   : > { %v1566_v46 = vadd.f32 %v1486_v9, %v1364_v29 }
 0x15b   : > { %v1862_v41 = vpop.f32.mrf.mxu1 }
 0x15c   : > { %v1753_v34 = vadd.f32 %v1673_v45, %v1566_v46 }
 0x15e   : > { %v7445_v31 = vadd.f32 %v1860_v61, %v1753_v34 }
 0x15f   : > { %v1286_v12 = vpop.f32.mrf.mxu2 }
 0x160   : > { %v1488_v8 = vpop.f32.mrf.mxu3  ;;  %v1365_v54 = vadd.f32 %v1286_v12, %v7352_v49 }
 0x161   : > { %v1678_v62 = vpop.f32.mrf.mxu0 }
 0x162   : > { %v1567_v20 = vadd.f32 %v1488_v8, %v1365_v54 }
 0x163   : > { %v1865_v11 = vpop.f32.mrf.mxu1 }
 0x164   : > { %1328 = vmatmul.bf16.gmra.mxu2 %v7182_v57  ;;  %v1754_v19 = vadd.f32 %v1675_v50, %v1567_v20  ;;  %1717 = vmatmul.bf16.gmra.mxu0 %v7129_v63 }
 0x165   : > { %1530 = vmatmul.bf16.gmra.mxu3 %v7081_v17 }
 0x166   : > { %1904 = vmatmul.bf16.gmra.mxu1 %v7155_v26  ;;  %v7452_v34 = vadd.f32 %v1862_v41, %v1754_v19 }
 0x167   : > { %v1289_v45 = vpop.f32.mrf.mxu2 }
 0x168   : > { %v1491_v61 = vpop.f32.mrf.mxu3  ;;  %v1366_v47 = vadd.f32 %v1289_v45, %v7356_v23 }
 0x169   : > { %v1680_v12 = vpop.f32.mrf.mxu0 }
 0x16a   : > { %v1568_v49 = vadd.f32 %v1491_v61, %v1366_v47 }
 0x16b   : > { %v1867_v54 = vpop.f32.mrf.mxu1 }
 0x16c   : > { %v1755_v8 = vadd.f32 %v1678_v62, %v1568_v49 }
 0x16e   : > { %v7455_v22 = vadd.f32 %v1865_v11, %v1755_v8  ;;  %v6194_v11 = vld [vmem:[#allocation7 + $0x148] sm:$0xff] }
 0x16f   : > { %v1291_v57 = vpop.f32.mrf.mxu2  ;;  %2229 = vmatpush.bf16.msra.mxu3 %v6194_v11 }
 0x170   : > { %v1493_v9 = vpop.f32.mrf.mxu3  ;;  %v1367_v20 = vadd.f32 %v1291_v57, %v7364_v5 }
 0x171   : > { %v1683_v46 = vpop.f32.mrf.mxu0 }
 0x172   : > { %v1569_v29 = vadd.f32 %v1493_v9, %v1367_v20 }
 0x173   : > { %v1870_v50 = vpop.f32.mrf.mxu1 }
 0x174   : > { %1333 = vmatmul.bf16.gmra.mxu2 %v7216_v38  ;;  %v1756_v41 = vadd.f32 %v1680_v12, %v1569_v29  ;;  %1722 = vmatmul.bf16.gmra.mxu0 %v7155_v26  ;;  %v6202_v12 = vld [vmem:[#allocation7 + $0x208] sm:$0xff] }
 0x175   : > { %1535 = vmatmul.bf16.gmra.mxu3 %v7129_v63  ;;  %2415 = vmatpush.bf16.msra.mxu0 %v6202_v12 }
 0x176   : > { %1909 = vmatmul.bf16.gmra.mxu1 %v7184_v58  ;;  %v7462_v23 = vadd.f32 %v1867_v54, %v1756_v41 }
 0x177   : > { %v1294_v62 = vpop.f32.mrf.mxu2 }
 0x178   : > { %v1496_v19 = vpop.f32.mrf.mxu3  ;;  %v1368_v5 = vadd.f32 %v1294_v62, %v7368_v1 }
 0x179   : > { %v1685_v61 = vpop.f32.mrf.mxu0 }
 0x17a   : > { %v1570_v45 = vadd.f32 %v1496_v19, %v1368_v5 }
 0x17b   : > { %v1872_v38 = vpop.f32.mrf.mxu1 }
 0x17c   : > { %v1757_v47 = vadd.f32 %v1683_v46, %v1570_v45 }
 0x17e   : > { %v7465_v49 = vadd.f32 %v1870_v50, %v1757_v47 }
 0x17f   : > { %v1296_v8 = vpop.f32.mrf.mxu2 }
 0x180   : > { %v1498_v57 = vpop.f32.mrf.mxu3  ;;  %v1369_v9 = vadd.f32 %v1296_v8, %v7376_v13 }
 0x181   : > { %v1688_v20 = vpop.f32.mrf.mxu0 }
 0x182   : > { %v1571_v54 = vadd.f32 %v1498_v57, %v1369_v9  ;;  %v6185_v57 = vld [vmem:[#allocation7 + $0x80] sm:$0xff] }
 0x183   : > { %v1875_v29 = vpop.f32.mrf.mxu1  ;;  %2044 = vmatpush.bf16.msra.mxu2 %v6185_v57  ;;  %v6193_v9 = vld [vmem:[#allocation7 + $0x140] sm:$0xff] }
 0x184   : > { %1338 = vmatmul.bf16.gmra.mxu2 %v7255_v36  ;;  %v1758_v1 = vadd.f32 %v1685_v61, %v1571_v54  ;;  %1727 = vmatmul.bf16.gmra.mxu0 %v7184_v58 }
 0x185   : > { %1540 = vmatmul.bf16.gmra.mxu3 %v7155_v26 }
 0x186   : > { %1914 = vmatmul.bf16.gmra.mxu1 %v7218_v40  ;;  %v7472_v46 = vadd.f32 %v1872_v38, %v1758_v1  ;;  %2230 = vmatpush.bf16.msra.mxu3 %v6193_v9 }
 0x187   : > { %v1299_v50 = vpop.f32.mrf.mxu2 }
 0x188   : > { %v1501_v41 = vpop.f32.mrf.mxu3  ;;  %v1370_v25 = vadd.f32 %v1299_v50, %v7380_v7 }
 0x189   : > { %v1690_v11 = vpop.f32.mrf.mxu0 }
 0x18a   : > { %v1572_v13 = vadd.f32 %v1501_v41, %v1370_v25  ;;  %v6201_v25 = vld [vmem:[#allocation7 + $0x200] sm:$0xff] }
 0x18b   : > { %v1877_v62 = vpop.f32.mrf.mxu1  ;;  %2416 = vmatpush.bf16.msra.mxu0 %v6201_v25 }
 0x18c   : > { %v1759_v19 = vadd.f32 %v1688_v20, %v1572_v13 }
 0x18e   : > { %v7475_v5 = vadd.f32 %v1875_v29, %v1759_v19 }
 0x18f   : > { %v1301_v36 = vpop.f32.mrf.mxu2 }
 0x190   : > { %v1503_v45 = vpop.f32.mrf.mxu3  ;;  %v1371_v61 = vadd.f32 %v1301_v36, %v7388_v27 }
 0x191   : > { %v1693_v12 = vpop.f32.mrf.mxu0 }
 0x192   : > { %v1573_v47 = vadd.f32 %v1503_v45, %v1371_v61 }
 0x193   : > { %v1880_v8 = vpop.f32.mrf.mxu1 }
 0x194   : > { %1343 = vmatmul.bf16.gmra.mxu2 %v7287_v56  ;;  %v1760_v38 = vadd.f32 %v1690_v11, %v1573_v47  ;;  %1732 = vmatmul.bf16.gmra.mxu0 %v7218_v40 }
 0x195   : > { %1545 = vmatmul.bf16.gmra.mxu3 %v7184_v58 }
 0x196   : > { %1919 = vmatmul.bf16.gmra.mxu1 %v7257_v37  ;;  %v7482_v7 = vadd.f32 %v1877_v62, %v1760_v38 }
 0x197   : > { %v1304_v54 = vpop.f32.mrf.mxu2 }
 0x198   : > { %v1506_v20 = vpop.f32.mrf.mxu3  ;;  %v1372_v27 = vadd.f32 %v1304_v54, %v7392_v42 }
 0x199   : > { %v1695_v1 = vpop.f32.mrf.mxu0 }
 0x19a   : > { %v1574_v29 = vadd.f32 %v1506_v20, %v1372_v27 }
 0x19b   : > { %v7485_v56 = vpop.f32.mrf.mxu1 }
 0x19c   : > { %v1761_v50 = vadd.f32 %v1693_v12, %v1574_v29 }
 0x19e   : > { %v7487_v41 = vadd.f32 %v1880_v8, %v1761_v50 }
 0x19f   : > { %v1306_v13 = vpop.f32.mrf.mxu2 }
 0x1a0   : > { %v1508_v11 = vpop.f32.mrf.mxu3  ;;  %v1373_v62 = vadd.f32 %v1306_v13, %v7400_v32 }
 0x1a1   : > { %v1698_v36 = vpop.f32.mrf.mxu0 }
 0x1a2   : > { %v1575_v19 = vadd.f32 %v1508_v11, %v1373_v62 }
 0x1a3   : > { %v1885_v45 = vpop.f32.mrf.mxu1 }
 0x1a4   : > { %1348 = vmatmul.bf16.gmra.mxu2 %v7317_v30  ;;  %v7492_v42 = vadd.f32 %v1695_v1, %v1575_v19  ;;  %1737 = vmatmul.bf16.gmra.mxu0 %v7257_v37 }
 0x1a5   : > { %1550 = vmatmul.bf16.gmra.mxu3 %v7218_v40 }
 0x1a6   : > { %1924 = vmatmul.bf16.gmra.mxu1 %v7236_v0 }
 0x1a7   : > { %v1309_v61 = vpop.f32.mrf.mxu2 }
 0x1a8   : > { %v1511_v47 = vpop.f32.mrf.mxu3  ;;  %v1374_v12 = vadd.f32 %v1309_v61, %v7404_v39 }
 0x1a9   : > { %v1700_v32 = vpop.f32.mrf.mxu0 }
 0x1aa   : > { %v1576_v8 = vadd.f32 %v1511_v47, %v1374_v12  ;;  %v6753_v12 = vld [vmem:[#allocation2] sm:$0xff] }
 0x1ab   : > { %v7497_v38 = vpop.f32.mrf.mxu1 }
 0x1ac   : > { %v1763_v57 = vadd.f32 %v1698_v36, %v1576_v8  ;;  %v6375_v8 = vunpack.c.h.b16 %v6753_v12  ;;  %v9415_v12 = vshrl.u32 %v7072_v10, 16 }
 0x1ae   : > { %v7499_v9 = vadd.f32 %v1885_v45, %v1763_v57 }
 0x1af   : > { %v1311_v54 = vpop.f32.mrf.mxu2 }
 0x1b0   : > { %v1513_v20 = vpop.f32.mrf.mxu3  ;;  %v1375_v27 = vadd.f32 %v1311_v54, %v7412_v55 }
 0x1b1   : > { %v1703_v1 = vpop.f32.mrf.mxu0 }
 0x1b2   : > { %v1577_v29 = vadd.f32 %v1513_v20, %v1375_v27  ;;  %v774_v27 = vpack.c.b16 %v6375_v8, %v6375_v8 }
 0x1b3   : > { %v1890_v50 = vpop.f32.mrf.mxu1 }
 0x1b4   : > { %1353 = vmatmul.bf16.gmra.mxu2 %v7338_v53  ;;  %v7504_v25 = vadd.f32 %v1700_v32, %v1577_v29  ;;  %1742 = vmatmul.bf16.gmra.mxu0 %v7236_v0  ;;  %v6379_v32 = vunpack.c.h.b16 %v7085_v21 }
 0x1b5   : > { %1555 = vmatmul.bf16.gmra.mxu3 %v7257_v37 }
 0x1b6   : > { %1929 = vmatmul.bf16.gmra.mxu1 %v7319_v43  ;;  %v775_v29 = vpack.c.b16 %v6379_v32, %v6379_v32 }
 0x1b7   : > { %v1314_v39 = vpop.f32.mrf.mxu2 }
 0x1b8   : > { %v1516_v13 = vpop.f32.mrf.mxu3  ;;  %v1376_v11 = vadd.f32 %v1314_v39, %v7416_v2  ;;  %v9412_v39 = vshll.u32 %v7085_v21, 16 }
 0x1b9   : > { %v1705_v19 = vpop.f32.mrf.mxu0 }
 0x1ba   : > { %v1578_v62 = vadd.f32 %v1516_v13, %v1376_v11  ;;  %v722_v13 = vrot.slane %v9412_v39, 1  ;;  %v9413_v11 = vshll.u32 %v7072_v10, 16 }
 0x1bb   : > { %v7509_v55 = vpop.f32.mrf.mxu1 }
 0x1bc   : > { %v1765_v36 = vadd.f32 %v1703_v1, %v1578_v62  ;;  %v793_v62 = vshll.u32 %v774_v27, 16  ;;  %v9417_v27 = vmov 0 }
 0x1bd   : > { %v9418_v27 = vsel %vm7534_vm5, 4294967295, %v9417_v27 }
 0x1be   : > { %v7511_v45 = vadd.f32 %v1890_v50, %v1765_v36  ;;  %v797_v36 = vshll.u32 %v775_v29, 16  ;;  %v795_v32 = vrot.slane %v793_v62, 4  ;;  %9419 = vst [vmem:[#allocation24_spill] sm:$0xff] %v9418_v27 }
 0x1bf   : > { %v1316_v53 = vpop.f32.mrf.mxu2 }
 0x1c0   : > { %v1518_v61 = vpop.f32.mrf.mxu3  ;;  %v1377_v47 = vadd.f32 %v1316_v53, %v7424_v16 }
 0x1c1   : > { %v1708_v54 = vpop.f32.mrf.mxu0 }
 0x1c2   : > { %v1579_v57 = vadd.f32 %v1518_v61, %v1377_v47 }
 0x1c3   : > { %v1895_v20 = vpop.f32.mrf.mxu1 }
 0x1c4   : > { %1358 = vmatmul.bf16.gmra.mxu2 %v7317_v30  ;;  %v7517_v2 = vadd.f32 %v1705_v19, %v1579_v57  ;;  %1747 = vmatmul.bf16.gmra.mxu0 %v7319_v43  ;;  %v720_v30 = vrot.slane %v9413_v11, 1 }
 0x1c5   : > { %1560 = vmatmul.bf16.gmra.mxu3 %v7236_v0 }
 0x1c6   : > { %1934 = vmatmul.bf16.gmra.mxu1 %v7236_v0  ;;  %v721_v8 = vor.u32 %v720_v30, %v9415_v12 }
 0x1c7   : > { %v1319_v16 = vpop.f32.mrf.mxu2 }
 0x1c8   : > { %v1521_v1 = vpop.f32.mrf.mxu3  ;;  %v1378_v50 = vadd.f32 %v1319_v16, %v7428_v52  ;;  %v9416_v52 = vshrl.u32 %v7085_v21, 16  ;;  %v799_v16 = vrot.slane %v797_v36, 4 }
 0x1c9   : > { %v1710_v53 = vpop.f32.mrf.mxu0 }
 0x1ca   : > { %v1580_v19 = vadd.f32 %v1521_v1, %v1378_v50  ;;  %v723_v57 = vor.u32 %v722_v13, %v9416_v52 }
 0x1cb   : > { %v7526_v61 = vpop.f32.mrf.mxu1 }
 0x1cc   : > { %9414 = vst [vmem:[#allocation23_spill] sm:$0xff] %v7526_v61  ;;  %v1767_v47 = vadd.f32 %v1708_v54, %v1580_v19  ;;  %v885_v54 = vsel %vm7534_vm5, %v721_v8, %v795_v32  ;;  %v886_v10 = vsel %vm7534_vm5, %v723_v57, %v799_v16  ;;  %v9420_v8 = vshll.u32 %v7157_v28, 16 }
 0x1ce   : > { %v7532_v39 = vadd.f32 %v1895_v20, %v1767_v47  ;;  %v6387_v20 = vunpack.c.h.b16 %v7157_v28  ;;  %v726_v32 = vrot.slane %v9420_v8, 1 }
 0x1cf   : > { %v1321_v29 = vpop.f32.mrf.mxu2 }
 0x1d0   : > { %v1523_v1 = vpop.f32.mrf.mxu3  ;;  %v1379_v50 = vadd.f32 %v1321_v29, %v7436_v59  ;;  %v777_v62 = vpack.c.b16 %v6387_v20, %v6387_v20 }
 0x1d1   : > { %v1713_v21 = vpop.f32.mrf.mxu0 }
 0x1d2   : > { %v1581_v11 = vadd.f32 %v1523_v1, %v1379_v50  ;;  %v805_v52 = vshll.u32 %v777_v62, 16  ;;  %v6391_v62 = vunpack.c.h.b16 %v7190_v60 }
 0x1d3   : > { %v1900_v13 = vpop.f32.mrf.mxu1 }
 0x1d4   : > { %2045 = vmatmul.bf16.vlgmr.msra.gmra.mxu2 %v885_v54  ;;  %v7544_v30 = vadd.f32 %v1710_v53, %v1581_v11  ;;  %2417 = vmatmul.bf16.vlgmr.msra.gmra.mxu0 %v885_v54  ;;  %v9421_v53 = vshrl.u32 %v7157_v28, 16  ;;  %v807_v50 = vrot.slane %v805_v52, 4  ;;  %v778_v28 = vpack.c.b16 %v6391_v62, %v6391_v62 }
 0x1d5   : > { %2231 = vmatmul.bf16.vlgmr.msra.gmra.mxu3 %v886_v10 }
 0x1d6   : > { %v727_v1 = vor.u32 %v726_v32, %v9421_v53 }
 0x1d7   : > { %v1324_v36 = vpop.f32.mrf.mxu2 }
 0x1d8   : > { %v1526_v19 = vpop.f32.mrf.mxu3  ;;  %v1380_v59 = vadd.f32 %v1324_v36, %v7350_v24 }
 0x1d9   : > { %v1715_v12 = vpop.f32.mrf.mxu0 }
 0x1da   : > { %v1582_v47 = vadd.f32 %v1526_v19, %v1380_v59  ;;  %v888_v19 = vsel %vm7534_vm5, %v727_v1, %v807_v50 }
 0x1db   : > { %v7549_v16 = vpop.f32.mrf.mxu1 }
 0x1dc   : > { %v1769_v57 = vadd.f32 %v1713_v21, %v1582_v47 }
 0x1de   : > { %v7551_v29 = vadd.f32 %v1900_v13, %v1769_v57  ;;  %v809_v57 = vshll.u32 %v778_v28, 16  ;;  %v6395_v28 = vunpack.c.h.b16 %v7224_v44 }
 0x1df   : > { %v1326_v11 = vpop.f32.mrf.mxu2 }
 0x1e0   : > { %v1528_v20 = vpop.f32.mrf.mxu3  ;;  %v1381_v61 = vadd.f32 %v1326_v11, %v7354_v14  ;;  %v811_v50 = vrot.slane %v809_v57, 4 }
 0x1e1   : > { %v1718_v36 = vpop.f32.mrf.mxu0 }
 0x1e2   : > { %v1583_v24 = vadd.f32 %v1528_v20, %v1381_v61  ;;  %v9422_v61 = vshll.u32 %v7190_v60, 16 }
 0x1e3   : > { %v1905_v13 = vpop.f32.mrf.mxu1 }
 0x1e4   : > { %2050 = vmatmul.bf16.gmra.mxu2 %v886_v10  ;;  %v7559_v21 = vadd.f32 %v1715_v12, %v1583_v24  ;;  %2422 = vmatmul.bf16.gmra.mxu0 %v888_v19  ;;  %v728_v52 = vrot.slane %v9422_v61, 1  ;;  %v9423_v10 = vshrl.u32 %v7190_v60, 16  ;;  %v779_v60 = vpack.c.b16 %v6395_v28, %v6395_v28 }
 0x1e5   : > { %2236 = vmatmul.bf16.gmra.mxu3 %v885_v54 }
 0x1e6   : > { %v729_v12 = vor.u32 %v728_v52, %v9423_v10  ;;  %v9424_v52 = vshll.u32 %v7224_v44, 16 }
 0x1e7   : > { %v1329_v59 = vpop.f32.mrf.mxu2 }
 0x1e8   : > { %v1531_v47 = vpop.f32.mrf.mxu3  ;;  %v1382_v8 = vadd.f32 %v1329_v59, %v7362_v33  ;;  %v730_v57 = vrot.slane %v9424_v52, 1 }
 0x1e9   : > { %v1720_v14 = vpop.f32.mrf.mxu0 }
 0x1ea   : > { %v1584_v32 = vadd.f32 %v1531_v47, %v1382_v8  ;;  %v889_v47 = vsel %vm7534_vm5, %v729_v12, %v811_v50 }
 0x1eb   : > { %v7569_v62 = vpop.f32.mrf.mxu1 }
 0x1ec   : > { %v1771_v53 = vadd.f32 %v1718_v36, %v1584_v32 }
 0x1ee   : > { %v7564_v1 = vadd.f32 %v1905_v13, %v1771_v53  ;;  %v813_v53 = vshll.u32 %v779_v60, 16 }
 0x1ef   : > { %v1331_v11 = vpop.f32.mrf.mxu2 }
 0x1f0   : > { %v1533_v20 = vpop.f32.mrf.mxu3  ;;  %v1383_v24 = vadd.f32 %v1331_v11, %v7366_v6  ;;  %v815_v11 = vrot.slane %v813_v53, 4 }
 0x1f1   : > { %v1723_v59 = vpop.f32.mrf.mxu0 }
 0x1f2   : > { %v1585_v33 = vadd.f32 %v1533_v20, %v1383_v24 }
 0x1f3   : > { %v1910_v10 = vpop.f32.mrf.mxu1 }
 0x1f4   : > { %2055 = vmatmul.bf16.gmra.mxu2 %v885_v54  ;;  %v7574_v36 = vadd.f32 %v1720_v14, %v1585_v33  ;;  %2427 = vmatmul.bf16.gmra.mxu0 %v889_v47  ;;  %v9425_v54 = vshrl.u32 %v7224_v44, 16 }
 0x1f5   : > { %2241 = vmatmul.bf16.gmra.mxu3 %v888_v19 }
 0x1f6   : > { %v731_v14 = vor.u32 %v730_v57, %v9425_v54  ;;  %v9427_v54 = vshrl.u32 %v7263_v48, 16 }
 0x1f7   : > { %v1334_v13 = vpop.f32.mrf.mxu2 }
 0x1f8   : > { %v1536_v8 = vpop.f32.mrf.mxu3  ;;  %v1384_v32 = vadd.f32 %v1334_v13, %v7374_v18  ;;  %v890_v13 = vsel %vm7534_vm5, %v731_v14, %v815_v11 }
 0x1f9   : > { %v1725_v61 = vpop.f32.mrf.mxu0 }
 0x1fa   : > { %v1586_v6 = vadd.f32 %v1536_v8, %v1384_v32  ;;  %v6399_v8 = vunpack.c.h.b16 %v7263_v48 }
 0x1fc   : > { %v1773_v12 = vadd.f32 %v1723_v59, %v1586_v6  ;;  %v780_v60 = vpack.c.b16 %v6399_v8, %v6399_v8 }
 0x1fe   : > { %v7579_v50 = vadd.f32 %v1910_v10, %v1773_v12  ;;  %v817_v10 = vshll.u32 %v780_v60, 16 }
 0x1ff   : > { %v1336_v20 = vpop.f32.mrf.mxu2 }
 0x200   : > { %v1538_v24 = vpop.f32.mrf.mxu3  ;;  %v1385_v33 = vadd.f32 %v1336_v20, %v7378_v35  ;;  %v9426_v35 = vshll.u32 %v7263_v48, 16  ;;  %v819_v14 = vrot.slane %v817_v10, 4  ;;  %v9429_v10 = vshrl.u32 %v7293_v4, 16 }
 0x201   : > { %v1728_v18 = vpop.f32.mrf.mxu0 }
 0x202   : > { %v1587_v28 = vadd.f32 %v1538_v24, %v1385_v33  ;;  %v732_v53 = vrot.slane %v9426_v35, 1 }
 0x204   : > { %2060 = vmatmul.bf16.gmra.mxu2 %v888_v19  ;;  %v7587_v59 = vadd.f32 %v1725_v61, %v1587_v28  ;;  %2432 = vmatmul.bf16.gmra.mxu0 %v890_v13  ;;  %v733_v19 = vor.u32 %v732_v53, %v9427_v54  ;;  %v6403_v28 = vunpack.c.h.b16 %v7293_v4 }
 0x205   : > { %2246 = vmatmul.bf16.gmra.mxu3 %v889_v47 }
 0x207   : > { %v1339_v44 = vpop.f32.mrf.mxu2 }
 0x208   : > { %v1541_v32 = vpop.f32.mrf.mxu3  ;;  %v1386_v6 = vadd.f32 %v1339_v44, %v7386_v15  ;;  %v891_v15 = vsel %vm7534_vm5, %v733_v19, %v819_v14  ;;  %v9430_v14 = vld [vmem:[#allocation16_spill] sm:$0xff] }
 0x209   : > { %v1730_v57 = vpop.f32.mrf.mxu0 }
 0x20a   : > { %v1588_v52 = vadd.f32 %v1541_v32, %v1386_v6 }
 0x20c   : > { %v7592_v12 = vadd.f32 %v1728_v18, %v1588_v52  ;;  %v781_v18 = vpack.c.b16 %v6403_v28, %v6403_v28 }
 0x20e   : > { %v821_v35 = vshll.u32 %v781_v18, 16 }
 0x20f   : > { %v1341_v61 = vpop.f32.mrf.mxu2 }
 0x210   : > { %v1543_v11 = vpop.f32.mrf.mxu3  ;;  %v1387_v20 = vadd.f32 %v1341_v61, %v7390_v3  ;;  %v9428_v3 = vshll.u32 %v7293_v4, 16  ;;  %v823_v54 = vrot.slane %v821_v35, 4 }
 0x211   : > { %v1733_v33 = vpop.f32.mrf.mxu0 }
 0x212   : > { %v1589_v24 = vadd.f32 %v1543_v11, %v1387_v20  ;;  %v734_v52 = vrot.slane %v9428_v3, 1 }
 0x214   : > { %2065 = vmatmul.bf16.gmra.mxu2 %v889_v47  ;;  %v7600_v8 = vadd.f32 %v1730_v57, %v1589_v24  ;;  %2437 = vmatmul.bf16.gmra.mxu0 %v891_v15  ;;  %v735_v47 = vor.u32 %v734_v52, %v9429_v10  ;;  %v9431_v24 = vld [vmem:[#allocation14_spill] sm:$0xff] }
 0x215   : > { %2251 = vmatmul.bf16.gmra.mxu3 %v890_v13  ;;  %v6407_v28 = vunpack.c.h.b16 %v9431_v24  ;;  %v9434_v52 = vshll.u32 %v9431_v24, 16 }
 0x217   : > { %v1344_v48 = vpop.f32.mrf.mxu2  ;;  %v736_v35 = vrot.slane %v9434_v52, 1 }
 0x218   : > { %v1546_v60 = vpop.f32.mrf.mxu3  ;;  %v1388_v44 = vadd.f32 %v1344_v48, %v7398_v51  ;;  %v892_v51 = vsel %vm7534_vm5, %v735_v47, %v823_v54  ;;  %v9436_v47 = vshrl.u32 %v9431_v24, 16 }
 0x219   : > { %v1735_v6 = vpop.f32.mrf.mxu0 }
 0x21a   : > { %v1590_v32 = vadd.f32 %v1546_v60, %v1388_v44  ;;  %v9433_v60 = vld [vmem:[#allocation17_spill] sm:$0xff] }
 0x21c   : > { %v7605_v53 = vadd.f32 %v1733_v33, %v1590_v32  ;;  %v782_v33 = vpack.c.b16 %v6407_v28, %v6407_v28 }
 0x21e   : > { %v825_v10 = vshll.u32 %v782_v33, 16 }
 0x21f   : > { %v1346_v57 = vpop.f32.mrf.mxu2 }
 0x220   : > { %v1548_v19 = vpop.f32.mrf.mxu3  ;;  %v1389_v61 = vadd.f32 %v1346_v57, %v9430_v14  ;;  %v827_v54 = vrot.slane %v825_v10, 4  ;;  %v9437_v14 = vld [vmem:[#allocation18_spill] sm:$0xff]  ;;  %v9440_v10 = vshll.u32 %v7081_v17, 16 }
 0x221   : > { %v1738_v20 = vpop.f32.mrf.mxu0 }
 0x222   : > { %v1591_v11 = vadd.f32 %v1548_v19, %v1389_v61 }
 0x224   : > { %2070 = vmatmul.bf16.gmra.mxu2 %v890_v13  ;;  %v7613_v18 = vadd.f32 %v1735_v6, %v1591_v11  ;;  %2442 = vmatmul.bf16.gmra.mxu0 %v892_v51  ;;  %v737_v13 = vor.u32 %v736_v35, %v9436_v47  ;;  %v738_v47 = vrot.slane %v9440_v10, 1 }
 0x225   : > { %2256 = vmatmul.bf16.gmra.mxu3 %v891_v15 }
 0x226   : > { %9432 = vst [vmem:[#allocation16_spill] sm:$0xff] %v7613_v18 }
 0x227   : > { %v1349_v4 = vpop.f32.mrf.mxu2 }
 0x228   : > { %v1551_v48 = vpop.f32.mrf.mxu3  ;;  %v1390_v44 = vadd.f32 %v1349_v4, %v9433_v60  ;;  %v893_v4 = vsel %vm7534_vm5, %v737_v13, %v827_v54  ;;  %v9442_v13 = vshrl.u32 %v7081_v17, 16 }
 0x229   : > { %v1740_v3 = vpop.f32.mrf.mxu0 }
 0x22a   : > { %v1592_v32 = vadd.f32 %v1551_v48, %v1390_v44  ;;  %v6411_v48 = vunpack.c.h.b16 %v7081_v17  ;;  %v9439_v44 = vld [vmem:[#allocation19_spill] sm:$0xff] }
 0x22c   : > { %v7618_v57 = vadd.f32 %v1738_v20, %v1592_v32  ;;  %v783_v20 = vpack.c.b16 %v6411_v48, %v6411_v48 }
 0x22e   : > { %9435 = vst [vmem:[#allocation14_spill] sm:$0xff] %v7618_v57 }
 0x22f   : > { %v1351_v6 = vpop.f32.mrf.mxu2 }
 0x230   : > { %v1553_v19 = vpop.f32.mrf.mxu3  ;;  %v1391_v61 = vadd.f32 %v1351_v6, %v9437_v14  ;;  %v829_v6 = vshll.u32 %v783_v20, 16 }
 0x231   : > { %v1743_v28 = vpop.f32.mrf.mxu0 }
 0x232   : > { %v1593_v11 = vadd.f32 %v1553_v19, %v1391_v61  ;;  %v831_v54 = vrot.slane %v829_v6, 4  ;;  %v9443_v61 = vld [vmem:[#allocation20_spill] sm:$0xff]  ;;  %v9446_v6 = vshll.u32 %v7129_v63, 16 }
 0x234   : > { %2075 = vmatmul.bf16.gmra.mxu2 %v891_v15  ;;  %v7626_v33 = vadd.f32 %v1740_v3, %v1593_v11  ;;  %2447 = vmatmul.bf16.gmra.mxu0 %v893_v4  ;;  %v739_v15 = vor.u32 %v738_v47, %v9442_v13  ;;  %v740_v13 = vrot.slane %v9446_v6, 1 }
 0x235   : > { %2261 = vmatmul.bf16.gmra.mxu3 %v892_v51 }
 0x236   : > { %9438 = vst [vmem:[#allocation17_spill] sm:$0xff] %v7626_v33 }
 0x237   : > { %v1354_v24 = vpop.f32.mrf.mxu2 }
 0x238   : > { %v1556_v60 = vpop.f32.mrf.mxu3  ;;  %v1392_v32 = vadd.f32 %v1354_v24, %v9439_v44  ;;  %v894_v24 = vsel %vm7534_vm5, %v739_v15, %v831_v54  ;;  %v9448_v15 = vshrl.u32 %v7129_v63, 16 }
 0x239   : > { %v1745_v35 = vpop.f32.mrf.mxu0 }
 0x23a   : > { %v1594_v52 = vadd.f32 %v1556_v60, %v1392_v32  ;;  %v6415_v60 = vunpack.c.h.b16 %v7129_v63  ;;  %v9445_v32 = vld [vmem:[#allocation21_spill] sm:$0xff] }
 0x23c   : > { %v7631_v19 = vadd.f32 %v1743_v28, %v1594_v52  ;;  %v784_v28 = vpack.c.b16 %v6415_v60, %v6415_v60 }
 0x23e   : > { %9441 = vst [vmem:[#allocation18_spill] sm:$0xff] %v7631_v19 }
 0x23f   : > { %v1356_v3 = vpop.f32.mrf.mxu2 }
 0x240   : > { %v1558_v14 = vpop.f32.mrf.mxu3  ;;  %v1393_v11 = vadd.f32 %v1356_v3, %v9443_v61  ;;  %v833_v3 = vshll.u32 %v784_v28, 16 }
 0x241   : > { %v1748_v33 = vpop.f32.mrf.mxu0 }
 0x242   : > { %v1595_v48 = vadd.f32 %v1558_v14, %v1393_v11  ;;  %v835_v54 = vrot.slane %v833_v3, 4  ;;  %v9449_v11 = vld [vmem:[#allocation22_spill] sm:$0xff] }
 0x244   : > { %2080 = vmatmul.bf16.gmra.mxu2 %v892_v51  ;;  %v7639_v20 = vadd.f32 %v1745_v35, %v1595_v48  ;;  %2452 = vmatmul.bf16.gmra.mxu0 %v894_v24  ;;  %v741_v51 = vor.u32 %v740_v13, %v9448_v15  ;;  %v9451_v13 = vshll.u32 %v7155_v26, 16 }
 0x245   : > { %2266 = vmatmul.bf16.gmra.mxu3 %v893_v4 }
 0x246   : > { %9444 = vst [vmem:[#allocation19_spill] sm:$0xff] %v7639_v20  ;;  %v742_v3 = vrot.slane %v9451_v13, 1 }
 0x247   : > { %v1359_v17 = vpop.f32.mrf.mxu2 }
 0x248   : > { %v1561_v44 = vpop.f32.mrf.mxu3  ;;  %v1394_v52 = vadd.f32 %v1359_v17, %v9445_v32  ;;  %v895_v17 = vsel %vm7534_vm5, %v741_v51, %v835_v54  ;;  %v9452_v51 = vshrl.u32 %v7155_v26, 16 }
 0x249   : > { %v1750_v47 = vpop.f32.mrf.mxu0 }
 0x24a   : > { %v1596_v10 = vadd.f32 %v1561_v44, %v1394_v52  ;;  %v6419_v44 = vunpack.c.h.b16 %v7155_v26 }
 0x24c   : > { %v7644_v14 = vadd.f32 %v1748_v33, %v1596_v10  ;;  %v785_v33 = vpack.c.b16 %v6419_v44, %v6419_v44  ;;  %v6423_v44 = vunpack.c.h.b16 %v7184_v58 }
 0x24e   : > { %9447 = vst [vmem:[#allocation20_spill] sm:$0xff] %v7644_v14  ;;  %v837_v15 = vshll.u32 %v785_v33, 16  ;;  %v6220_v14 = vld [vmem:[#allocation9 + $0xd8] sm:$0xff] }
 0x24f   : > { %v1361_v35 = vpop.f32.mrf.mxu2 }
 0x250   : > { %v1563_v61 = vpop.f32.mrf.mxu3  ;;  %v1395_v48 = vadd.f32 %v1361_v35, %v9449_v11  ;;  %v839_v54 = vrot.slane %v837_v15, 4 }
 0x251   : > { %v2418_v20 = vpop.f32.mrf.mxu0 }
 0x252   : > { %v1597_v60 = vadd.f32 %v1563_v61, %v1395_v48 }
 0x254   : > { %2085 = vmatmul.bf16.gmra.mxu2 %v893_v4  ;;  %v7652_v28 = vadd.f32 %v1750_v47, %v1597_v60  ;;  %2457 = vmatmul.bf16.gmra.mxu0 %v895_v17  ;;  %v743_v4 = vor.u32 %v742_v3, %v9452_v51  ;;  %v9456_v51 = vshrl.u32 %v7184_v58, 16 }
 0x255   : > { %2271 = vmatmul.bf16.gmra.mxu3 %v894_v24 }
 0x256   : > { %9450 = vst [vmem:[#allocation21_spill] sm:$0xff] %v7652_v28 }
 0x257   : > { %v2046_v63 = vpop.f32.mrf.mxu2 }
 0x258   : > { %v2232_v32 = vpop.f32.mrf.mxu3  ;;  %v2126_v52 = vadd.f32 %v2046_v63, %v7445_v31  ;;  %v896_v31 = vsel %vm7534_vm5, %v743_v4, %v839_v54 }
 0x259   : > { %v2420_v6 = vpop.f32.mrf.mxu0 }
 0x25a   : > { %v2312_v10 = vadd.f32 %v2232_v32, %v2126_v52 }
 0x25c   : > { %v7657_v35 = vadd.f32 %v2418_v20, %v2312_v10  ;;  %v786_v20 = vpack.c.b16 %v6423_v44, %v6423_v44 }
 0x25e   : > { %v841_v3 = vshll.u32 %v786_v20, 16 }
 0x25f   : > { %v2048_v47 = vpop.f32.mrf.mxu2 }
 0x260   : > { %v2234_v61 = vpop.f32.mrf.mxu3  ;;  %v2127_v11 = vadd.f32 %v2048_v47, %v7452_v34  ;;  %v9454_v34 = vshll.u32 %v7184_v58, 16  ;;  %v843_v4 = vrot.slane %v841_v3, 4 }
 0x261   : > { %v2423_v60 = vpop.f32.mrf.mxu0 }
 0x262   : > { %v2313_v48 = vadd.f32 %v2234_v61, %v2127_v11  ;;  %v744_v13 = vrot.slane %v9454_v34, 1 }
 0x264   : > { %v7665_v63 = vadd.f32 %v2420_v6, %v2313_v48  ;;  %2090 = vmatmul.bf16.gmra.mxu2 %v894_v24  ;;  %2462 = vmatmul.bf16.gmra.mxu0 %v896_v31  ;;  %v745_v6 = vor.u32 %v744_v13, %v9456_v51  ;;  %v6427_v48 = vunpack.c.h.b16 %v7218_v40 }
 0x265   : > { %2276 = vmatmul.bf16.gmra.mxu3 %v895_v17 }
 0x266   : > { %9453 = vst [vmem:[#allocation22_spill] sm:$0xff] %v7665_v63 }
 0x267   : > { %v2051_v26 = vpop.f32.mrf.mxu2 }
 0x268   : > { %v2237_v33 = vpop.f32.mrf.mxu3  ;;  %v2128_v32 = vadd.f32 %v2051_v26, %v7455_v22  ;;  %v897_v22 = vsel %vm7534_vm5, %v745_v6, %v843_v4 }
 0x269   : > { %v2425_v10 = vpop.f32.mrf.mxu0 }
 0x26a   : > { %v2314_v52 = vadd.f32 %v2237_v33, %v2128_v32  ;;  %v6224_v33 = vld [vmem:[#allocation9 + $0xf8] sm:$0xff] }
 0x26b   : > { %3533 = vmatpush.bf16.msra.mxu1 %v6224_v33 }
 0x26c   : > { %v7670_v15 = vadd.f32 %v2423_v60, %v2314_v52  ;;  %v787_v60 = vpack.c.b16 %v6427_v48, %v6427_v48  ;;  %v9457_v52 = vshll.u32 %v7218_v40, 16 }
 0x26e   : > { %9455 = vst [vmem:[#allocation25_spill] sm:$0xff] %v7670_v15  ;;  %v746_v34 = vrot.slane %v9457_v52, 1  ;;  %v845_v13 = vshll.u32 %v787_v60, 16 }
 0x26f   : > { %v2053_v24 = vpop.f32.mrf.mxu2 }
 0x270   : > { %v2239_v54 = vpop.f32.mrf.mxu3  ;;  %v2129_v47 = vadd.f32 %v2053_v24, %v7462_v23  ;;  %v847_v51 = vrot.slane %v845_v13, 4 }
 0x271   : > { %v2428_v11 = vpop.f32.mrf.mxu0 }
 0x272   : > { %v2315_v61 = vadd.f32 %v2239_v54, %v2129_v47 }
 0x274   : > { %v7678_v44 = vadd.f32 %v2425_v10, %v2315_v61  ;;  %2095 = vmatmul.bf16.gmra.mxu2 %v895_v17  ;;  %2467 = vmatmul.bf16.gmra.mxu0 %v897_v22  ;;  %v9458_v10 = vshrl.u32 %v7218_v40, 16  ;;  %v6431_v61 = vunpack.c.h.b16 %v7257_v37 }
 0x275   : > { %2281 = vmatmul.bf16.gmra.mxu3 %v896_v31 }
 0x276   : > { %v747_v17 = vor.u32 %v746_v34, %v9458_v10  ;;  %v9460_v34 = vshrl.u32 %v7257_v37, 16 }
 0x277   : > { %v2056_v58 = vpop.f32.mrf.mxu2 }
 0x278   : > { %v2242_v20 = vpop.f32.mrf.mxu3  ;;  %v2130_v26 = vadd.f32 %v2056_v58, %v7465_v49  ;;  %v898_v47 = vsel %vm7534_vm5, %v747_v17, %v847_v51 }
 0x279   : > { %v2430_v23 = vpop.f32.mrf.mxu0 }
 0x27a   : > { %v2316_v32 = vadd.f32 %v2242_v20, %v2130_v26 }
 0x27c   : > { %v7683_v3 = vadd.f32 %v2428_v11, %v2316_v32  ;;  %v788_v11 = vpack.c.b16 %v6431_v61, %v6431_v61 }
 0x27e   : > { %v849_v32 = vshll.u32 %v788_v11, 16  ;;  %v2606_v18 = vmul.f32 %v7683_v3, %v7683_v3 }
 0x27f   : > { %v2058_v6 = vpop.f32.mrf.mxu2 }
 0x280   : > { %v2244_v4 = vpop.f32.mrf.mxu3  ;;  %v2131_v24 = vadd.f32 %v2058_v6, %v7472_v46  ;;  %v9459_v46 = vshll.u32 %v7257_v37, 16  ;;  %v851_v13 = vrot.slane %v849_v32, 4 }
 0x281   : > { %v2433_v49 = vpop.f32.mrf.mxu0 }
 0x282   : > { %v2317_v54 = vadd.f32 %v2244_v4, %v2131_v24  ;;  %v748_v33 = vrot.slane %v9459_v46, 1  ;;  %v6754_v4 = vld [vmem:[#allocation2 + $0x88] sm:$0xff] }
 0x283   : > { %v6435_v24 = vunpack.c.h.b16 %v6754_v4 }
 0x284   : > { %v7691_v48 = vadd.f32 %v2430_v23, %v2317_v54  ;;  %2100 = vmatmul.bf16.gmra.mxu2 %v896_v31  ;;  %2472 = vmatmul.bf16.gmra.mxu0 %v898_v47  ;;  %v749_v23 = vor.u32 %v748_v33, %v9460_v34 }
 0x285   : > { %2286 = vmatmul.bf16.gmra.mxu3 %v897_v22 }
 0x287   : > { %v2061_v40 = vpop.f32.mrf.mxu2 }
 0x288   : > { %v2247_v60 = vpop.f32.mrf.mxu3  ;;  %v2132_v58 = vadd.f32 %v2061_v40, %v7475_v5  ;;  %v899_v5 = vsel %vm7534_vm5, %v749_v23, %v851_v13  ;;  %v6223_v40 = vld [vmem:[#allocation9 + $0xf0] sm:$0xff] }
 0x289   : > { %v2435_v26 = vpop.f32.mrf.mxu0  ;;  %3534 = vmatpush.bf16.msra.mxu1 %v6223_v40 }
 0x28a   : > { %v2318_v20 = vadd.f32 %v2247_v60, %v2132_v58  ;;  %v9461_v58 = vshll.u32 %v7236_v0, 16 }
 0x28c   : > { %v7696_v52 = vadd.f32 %v2433_v49, %v2318_v20  ;;  %v789_v49 = vpack.c.b16 %v6435_v24, %v6435_v24  ;;  %v750_v20 = vrot.slane %v9461_v58, 1  ;;  %v9463_v24 = vshll.u32 %v7319_v43, 16 }
 0x28e   : > { %v853_v46 = vshll.u32 %v789_v49, 16  ;;  %v752_v49 = vrot.slane %v9463_v24, 1 }
 0x28f   : > { %v2063_v31 = vpop.f32.mrf.mxu2 }
 0x290   : > { %v2249_v10 = vpop.f32.mrf.mxu3  ;;  %v2133_v17 = vadd.f32 %v2063_v31, %v7482_v7  ;;  %v855_v32 = vrot.slane %v853_v46, 4  ;;  %v6439_v31 = vunpack.c.h.b16 %v7319_v43 }
 0x291   : > { %v2438_v6 = vpop.f32.mrf.mxu0 }
 0x292   : > { %v2319_v51 = vadd.f32 %v2249_v10, %v2133_v17  ;;  %v790_v10 = vpack.c.b16 %v6439_v31, %v6439_v31 }
 0x294   : > { %v7703_v54 = vadd.f32 %v2435_v26, %v2319_v51  ;;  %2105 = vmatmul.bf16.gmra.mxu2 %v897_v22  ;;  %2477 = vmatmul.bf16.gmra.mxu0 %v899_v5  ;;  %v9462_v22 = vshrl.u32 %v7236_v0, 16 }
 0x295   : > { %2291 = vmatmul.bf16.gmra.mxu3 %v898_v47 }
 0x296   : > { %v751_v26 = vor.u32 %v750_v20, %v9462_v22 }
 0x297   : > { %v2066_v37 = vpop.f32.mrf.mxu2 }
 0x298   : > { %v2252_v61 = vpop.f32.mrf.mxu3  ;;  %v2134_v11 = vadd.f32 %v2066_v37, %v7487_v41  ;;  %v900_v13 = vsel %vm7534_vm5, %v751_v26, %v855_v32  ;;  %v857_v37 = vshll.u32 %v790_v10, 16  ;;  %v6222_v32 = vld [vmem:[#allocation9 + $0xe8] sm:$0xff] }
 0x299   : > { %v7706_v7 = vpop.f32.mrf.mxu0  ;;  %3535 = vmatpush.bf16.msra.mxu1 %v6222_v32 }
 0x29a   : > { %v2320_v60 = vadd.f32 %v2252_v61, %v2134_v11  ;;  %v9464_v11 = vshrl.u32 %v7319_v43, 16 }
 0x29c   : > { %v7710_v33 = vadd.f32 %v2438_v6, %v2320_v60  ;;  %v753_v40 = vor.u32 %v752_v49, %v9464_v11 }
 0x29f   : > { %v7714_v34 = vpop.f32.mrf.mxu2 }
 0x2a0   : > { %v7716_v23 = vpop.f32.mrf.mxu3 }
 0x2a1   : > { %v2443_v41 = vpop.f32.mrf.mxu0 }
 0x2a4   : > { %2110 = vmatmul.bf16.gmra.mxu2 %v898_v47  ;;  %2482 = vmatmul.bf16.gmra.mxu0 %v900_v13  ;;  %v859_v47 = vrot.slane %v857_v37, 4 }
 0x2a5   : > { %2296 = vmatmul.bf16.gmra.mxu3 %v899_v5 }
 0x2a7   : > { %v2071_v17 = vpop.f32.mrf.mxu2 }
 0x2a8   : > { %v2257_v51 = vpop.f32.mrf.mxu3  ;;  %v2136_v0 = vadd.f32 %v2071_v17, %v7499_v9  ;;  %v901_v9 = vsel %vm7534_vm5, %v753_v40, %v859_v47 }
 0x2a9   : > { %v7722_v4 = vpop.f32.mrf.mxu0 }
 0x2aa   : > { %v2322_v6 = vadd.f32 %v2257_v51, %v2136_v0 }
 0x2ac   : > { %v7726_v61 = vadd.f32 %v2443_v41, %v2322_v6 }
 0x2af   : > { %v7730_v60 = vpop.f32.mrf.mxu2 }
 0x2b0   : > { %v7732_v58 = vpop.f32.mrf.mxu3 }
 0x2b1   : > { %v2448_v20 = vpop.f32.mrf.mxu0 }
 0x2b4   : > { %2115 = vmatmul.bf16.gmra.mxu2 %v899_v5  ;;  %2487 = vmatmul.bf16.gmra.mxu0 %v901_v9 }
 0x2b5   : > { %2301 = vmatmul.bf16.gmra.mxu3 %v900_v13 }
 0x2b7   : > { %v2076_v46 = vpop.f32.mrf.mxu2 }
 0x2b8   : > { %v2262_v22 = vpop.f32.mrf.mxu3  ;;  %v2138_v26 = vadd.f32 %v2076_v46, %v7511_v45 }
 0x2b9   : > { %v7737_v43 = vpop.f32.mrf.mxu0 }
 0x2ba   : > { %v2324_v41 = vadd.f32 %v2262_v22, %v2138_v26 }
 0x2bc   : > { %v7739_v31 = vadd.f32 %v2448_v20, %v2324_v41 }
 0x2bf   : > { %v7741_v10 = vpop.f32.mrf.mxu2 }
 0x2c0   : > { %v7743_v17 = vpop.f32.mrf.mxu3 }
 0x2c1   : > { %v2453_v51 = vpop.f32.mrf.mxu0 }
 0x2c4   : > { %2120 = vmatmul.bf16.gmra.mxu2 %v900_v13  ;;  %2492 = vmatmul.bf16.gmra.mxu0 %v900_v13 }
 0x2c5   : > { %2306 = vmatmul.bf16.gmra.mxu3 %v901_v9  ;;  %v6221_v9 = vld [vmem:[#allocation9 + $0xe0] sm:$0xff] }
 0x2c6   : > { %3536 = vmatpush.bf16.msra.mxu1 %v6221_v9 }
 0x2c7   : > { %v2081_v5 = vpop.f32.mrf.mxu2 }
 0x2c8   : > { %v2267_v0 = vpop.f32.mrf.mxu3  ;;  %v2140_v6 = vadd.f32 %v2081_v5, %v7532_v39 }
 0x2c9   : > { %v7746_v24 = vpop.f32.mrf.mxu0 }
 0x2ca   : > { %v2326_v45 = vadd.f32 %v2267_v0, %v2140_v6  ;;  %3537 = vmatpush.bf16.msra.mxu1 %v6220_v14  ;;  %v2564_v14 = vadd.f32 %v7665_v63, %v7657_v35 }
 0x2cc   : > { %v7748_v49 = vadd.f32 %v2453_v51, %v2326_v45  ;;  %v7763_v51 = vpop.f32.mrf.mxu1 }
 0x2cf   : > { %v7750_v37 = vpop.f32.mrf.mxu2 }
 0x2d0   : > { %v7752_v11 = vpop.f32.mrf.mxu3 }
 0x2d1   : > { %v2458_v40 = vpop.f32.mrf.mxu0 }
 0x2d7   : > { %v2086_v47 = vpop.f32.mrf.mxu2 }
 0x2d8   : > { %v2272_v20 = vpop.f32.mrf.mxu3  ;;  %v2142_v46 = vadd.f32 %v2086_v47, %v7551_v29 }
 0x2d9   : > { %v7755_v22 = vpop.f32.mrf.mxu0 }
 0x2da   : > { %v2328_v13 = vadd.f32 %v2272_v20, %v2142_v46  ;;  %v7774_v46 = vpop.f32.mrf.mxu1 }
 0x2dc   : > { %v7757_v39 = vadd.f32 %v2458_v40, %v2328_v13 }
 0x2df   : > { %v7759_v26 = vpop.f32.mrf.mxu2 }
 0x2e0   : > { %v7761_v32 = vpop.f32.mrf.mxu3 }
 0x2e1   : > { %v2463_v41 = vpop.f32.mrf.mxu0 }
 0x2e2   : > { %v7777_v19 = vpop.f32.mrf.mxu1 }
 0x2e7   : > { %v2091_v5 = vpop.f32.mrf.mxu2 }
 0x2e8   : > { %v2277_v0 = vpop.f32.mrf.mxu3  ;;  %v2144_v6 = vadd.f32 %v2091_v5, %v7564_v1 }
 0x2e9   : > { %v7766_v29 = vpop.f32.mrf.mxu0 }
 0x2ea   : > { %v2330_v45 = vadd.f32 %v2277_v0, %v2144_v6  ;;  %v2603_v0 = vmul.f32 %v7665_v63, %v7665_v63  ;;  %v2602_v6 = vmul.f32 %v7657_v35, %v7657_v35  ;;  %v2607_v63 = vmul.f32 %v7691_v48, %v7691_v48 }
 0x2ec   : > { %v7768_v47 = vadd.f32 %v2463_v41, %v2330_v45  ;;  %v2604_v45 = vmul.f32 %v7670_v15, %v7670_v15 }
 0x2ef   : > { %v7770_v20 = vpop.f32.mrf.mxu2 }
 0x2f0   : > { %v7772_v40 = vpop.f32.mrf.mxu3 }
 0x2f1   : > { %v2468_v9 = vpop.f32.mrf.mxu0 }
 0x2f7   : > { %v2096_v13 = vpop.f32.mrf.mxu2 }
 0x2f8   : > { %v2282_v27 = vpop.f32.mrf.mxu3  ;;  %v2146_v28 = vadd.f32 %v2096_v13, %v7579_v50 }
 0x2f9   : > { %v7779_v5 = vpop.f32.mrf.mxu0 }
 0x2fa   : > { %v2332_v1 = vadd.f32 %v2282_v27, %v2146_v28  ;;  %9465 = vst [vmem:[#allocation26_spill] sm:$0xff] %v7779_v5  ;;  %v1949_v27 = vadd.f32 %v7485_v56, %v7492_v42  ;;  %v2634_v28 = vadd.f32 %v2603_v0, %v2602_v6  ;;  %v1951_v56 = vadd.f32 %v7497_v38, %v7504_v25  ;;  %v7807_v42 = vpop.f32.mrf.mxu1 }
 0x2fb   : > { %v1953_v38 = vadd.f32 %v7509_v55, %v7517_v2  ;;  %v2608_v25 = vmul.f32 %v7696_v52, %v7696_v52 }
 0x2fc   : > { %v7781_v41 = vadd.f32 %v2468_v9, %v2332_v1  ;;  %v2605_v9 = vmul.f32 %v7678_v44, %v7678_v44  ;;  %v2135_v13 = vadd.f32 %v7714_v34, %v1949_v27  ;;  %v2635_v5 = vadd.f32 %v2634_v28, %v2604_v45 }
 0x2fd   : > { %v2137_v27 = vadd.f32 %v7730_v60, %v1951_v56  ;;  %v2610_v56 = vmul.f32 %v7710_v33, %v7710_v33 }
 0x2fe   : > { %9466 = vst [vmem:[#allocation27_spill] sm:$0xff] %v7781_v41  ;;  %v2565_v41 = vadd.f32 %v2564_v14, %v7670_v15  ;;  %v2636_v6 = vadd.f32 %v2635_v5, %v2605_v9  ;;  %v2321_v34 = vadd.f32 %v7716_v23, %v2135_v13  ;;  %v2609_v23 = vmul.f32 %v7703_v54, %v7703_v54 }
 0x2ff   : > { %v7789_v57 = vpop.f32.mrf.mxu2  ;;  %v2139_v9 = vadd.f32 %v7741_v10, %v1953_v38 }
 0x300   : > { %v7791_v50 = vpop.f32.mrf.mxu3  ;;  %v2566_v0 = vadd.f32 %v2565_v41, %v7678_v44  ;;  %v2637_v14 = vadd.f32 %v2636_v6, %v2606_v18  ;;  %v7827_v60 = vadd.f32 %v7706_v7, %v2321_v34  ;;  %v2323_v18 = vadd.f32 %v7732_v58, %v2137_v27 }
 0x301   : > { %v7800_v1 = vpop.f32.mrf.mxu0  ;;  %v2325_v34 = vadd.f32 %v7743_v17, %v2139_v9 }
 0x302   : > { %v2567_v45 = vadd.f32 %v2566_v0, %v7683_v3  ;;  %v2638_v41 = vadd.f32 %v2637_v14, %v2607_v63  ;;  %v9467_v63 = vld [vmem:[#allocation23_spill] sm:$0xff]  ;;  %v2611_v58 = vmul.f32 %v7827_v60, %v7827_v60  ;;  %v7844_v10 = vadd.f32 %v7722_v4, %v2323_v18 }
 0x303   : > { %v1955_v0 = vadd.f32 %v9467_v63, %v7544_v30  ;;  %v7859_v18 = vadd.f32 %v7737_v43, %v2325_v34 }
 0x304   : > { %v2568_v5 = vadd.f32 %v2567_v45, %v7691_v48  ;;  %v2639_v2 = vadd.f32 %v2638_v41, %v2608_v25  ;;  %v7839_v45 = vpop.f32.mrf.mxu1  ;;  %v1957_v41 = vadd.f32 %v7549_v16, %v7559_v21  ;;  %v2613_v17 = vmul.f32 %v7844_v10, %v7844_v10 }
 0x305   : > { %v2141_v14 = vadd.f32 %v7750_v37, %v1955_v0  ;;  %v2614_v16 = vmul.f32 %v7739_v31, %v7739_v31  ;;  %v1959_v21 = vadd.f32 %v7569_v62, %v7574_v36  ;;  %v2615_v43 = vmul.f32 %v7859_v18, %v7859_v18  ;;  %v6219_v62 = vld [vmem:[#allocation9 + $0xd0] sm:$0xff] }
 0x306   : > { %v2569_v55 = vadd.f32 %v2568_v5, %v7696_v52  ;;  %v2640_v7 = vadd.f32 %v2639_v2, %v2609_v23  ;;  %v2612_v5 = vmul.f32 %v7726_v61, %v7726_v61  ;;  %v2143_v2 = vadd.f32 %v7759_v26, %v1957_v41  ;;  %3538 = vmatpush.bf16.msra.mxu1 %v6219_v62 }
 0x307   : > { %v7815_v28 = vpop.f32.mrf.mxu2  ;;  %v2145_v26 = vadd.f32 %v7770_v20, %v1959_v21  ;;  %v1964_v21 = vadd.f32 %v7807_v42, %v7605_v53  ;;  %v9469_v42 = vld [vmem:[#allocation26_spill] sm:$0xff] }
 0x308   : > { %v7817_v15 = vpop.f32.mrf.mxu3  ;;  %v2570_v6 = vadd.f32 %v2569_v55, %v7703_v54  ;;  %v2641_v30 = vadd.f32 %v2640_v7, %v2610_v56  ;;  %v2327_v55 = vadd.f32 %v7752_v11, %v2141_v14  ;;  %v2329_v11 = vadd.f32 %v7761_v32, %v2143_v2 }
 0x309   : > { %v7831_v13 = vpop.f32.mrf.mxu0  ;;  %v1963_v2 = vadd.f32 %v7777_v19, %v7600_v8 }
 0x30a   : > { %v2571_v27 = vadd.f32 %v2570_v6, %v7710_v33  ;;  %v2642_v4 = vadd.f32 %v2641_v30, %v2611_v58  ;;  %v7875_v7 = vadd.f32 %v7746_v24, %v2327_v55  ;;  %v2616_v30 = vmul.f32 %v7748_v49, %v7748_v49 }
 0x30c   : > { %v2572_v23 = vadd.f32 %v2571_v27, %v7827_v60  ;;  %v2643_v56 = vadd.f32 %v2642_v4, %v2612_v5  ;;  %v1925_v27 = vpop.f32.mrf.mxu1  ;;  %v1961_v5 = vadd.f32 %v7763_v51, %v7587_v59  ;;  %v2617_v20 = vmul.f32 %v7875_v7, %v7875_v7 }
 0x30d   : > { %v2331_v4 = vadd.f32 %v7772_v40, %v2145_v26  ;;  %v2618_v51 = vmul.f32 %v7757_v39, %v7757_v39 }
 0x30e   : > { %v2573_v9 = vadd.f32 %v2572_v23, %v7726_v61  ;;  %v2644_v0 = vadd.f32 %v2643_v56, %v2613_v17  ;;  %v7888_v23 = vadd.f32 %v7755_v22, %v2329_v11  ;;  %v1962_v17 = vadd.f32 %v7774_v46, %v7592_v12 }
 0x30f   : > { %v2103_v38 = vpop.f32.mrf.mxu2  ;;  %v7904_v12 = vadd.f32 %v7766_v29, %v2331_v4 }
 0x310   : > { %v7849_v25 = vpop.f32.mrf.mxu3  ;;  %v2574_v63 = vadd.f32 %v2573_v9, %v7844_v10  ;;  %v2645_v14 = vadd.f32 %v2644_v0, %v2614_v16  ;;  %v2147_v9 = vadd.f32 %v7789_v57, %v1961_v5  ;;  %v2148_v56 = vadd.f32 %v7815_v28, %v1962_v17 }
 0x311   : > { %v7861_v37 = vpop.f32.mrf.mxu0  ;;  %v2619_v40 = vmul.f32 %v7888_v23, %v7888_v23  ;;  %v2149_v0 = vadd.f32 %v2103_v38, %v1963_v2  ;;  %v2620_v28 = vmul.f32 %v7768_v47, %v7768_v47 }
 0x312   : > { %v2575_v6 = vadd.f32 %v2574_v63, %v7739_v31  ;;  %v2646_v41 = vadd.f32 %v2645_v14, %v2615_v43  ;;  %v2333_v63 = vadd.f32 %v7791_v50, %v2147_v9  ;;  %v9468_v43 = vld [vmem:[#allocation16_spill] sm:$0xff]  ;;  %v2334_v29 = vadd.f32 %v7817_v15, %v2148_v56 }
 0x313   : > { %v2621_v50 = vmul.f32 %v7904_v12, %v7904_v12 }
 0x314   : > { %v2576_v36 = vadd.f32 %v2575_v6, %v7859_v18  ;;  %v2647_v55 = vadd.f32 %v2646_v41, %v2616_v30  ;;  %v1965_v6 = vadd.f32 %v7839_v45, %v9468_v43  ;;  %v1927_v11 = vpop.f32.mrf.mxu1  ;;  %v7919_v38 = vadd.f32 %v9469_v42, %v2333_v63  ;;  %v9470_v41 = vld [vmem:[#allocation27_spill] sm:$0xff] }
 0x315   : > { %v2622_v15 = vmul.f32 %v9470_v41, %v9470_v41 }
 0x316   : > { %v2577_v32 = vadd.f32 %v2576_v36, %v7748_v49  ;;  %v2648_v22 = vadd.f32 %v2647_v55, %v2617_v20  ;;  %v2335_v36 = vadd.f32 %v7849_v25, %v2149_v0  ;;  %v7927_v20 = vadd.f32 %v7800_v1, %v2334_v29  ;;  %v9472_v0 = vld [vmem:[#allocation17_spill] sm:$0xff] }
 0x317   : > { %v2106_v58 = vpop.f32.mrf.mxu2  ;;  %v2623_v25 = vmul.f32 %v7919_v38, %v7919_v38 }
 0x318   : > { %v2292_v34 = vpop.f32.mrf.mxu3  ;;  %v2578_v59 = vadd.f32 %v2577_v32, %v7875_v7  ;;  %v2649_v8 = vadd.f32 %v2648_v22, %v2618_v51  ;;  %v2150_v26 = vadd.f32 %v2106_v58, %v1964_v21  ;;  %v9471_v58 = vld [vmem:[#allocation14_spill] sm:$0xff]  ;;  %v7933_v51 = vadd.f32 %v7831_v13, %v2335_v36 }
 0x319   : > { %v2480_v24 = vpop.f32.mrf.mxu0  ;;  %v1966_v32 = vadd.f32 %v1925_v27, %v9471_v58  ;;  %v2624_v1 = vmul.f32 %v7927_v20, %v7927_v20 }
 0x31a   : > { %v2579_v16 = vadd.f32 %v2578_v59, %v7757_v39  ;;  %v2650_v62 = vadd.f32 %v2649_v8, %v2619_v40  ;;  %v2336_v4 = vadd.f32 %v2292_v34, %v2150_v26  ;;  %v2625_v13 = vmul.f32 %v7933_v51, %v7933_v51 }
 0x31b   : > { %v1967_v8 = vadd.f32 %v1927_v11, %v9472_v0 }
 0x31c   : > { %v2580_v19 = vadd.f32 %v2579_v16, %v7888_v23  ;;  %v2651_v5 = vadd.f32 %v2650_v62, %v2620_v28  ;;  %v7939_v34 = vadd.f32 %v7861_v37, %v2336_v4 }
 0x31e   : > { %v2581_v53 = vadd.f32 %v2580_v19, %v7768_v47  ;;  %v2652_v17 = vadd.f32 %v2651_v5, %v2621_v50  ;;  %v2626_v37 = vmul.f32 %v7939_v34, %v7939_v34 }
 0x31f   : > { %v2108_v57 = vpop.f32.mrf.mxu2 }
 0x320   : > { %v2294_v46 = vpop.f32.mrf.mxu3  ;;  %v2151_v30 = vadd.f32 %v2108_v57, %v1965_v6  ;;  %v2582_v45 = vadd.f32 %v2581_v53, %v7904_v12  ;;  %v2653_v22 = vadd.f32 %v2652_v17, %v2622_v15  ;;  %v1930_v57 = vpop.f32.mrf.mxu1  ;;  %v9473_v15 = vld [vmem:[#allocation18_spill] sm:$0xff] }
 0x321   : > { %v2483_v14 = vpop.f32.mrf.mxu0  ;;  %v1968_v58 = vadd.f32 %v1930_v57, %v9473_v15 }
 0x322   : > { %v2583_v9 = vadd.f32 %v2582_v45, %v9470_v41  ;;  %v2337_v2 = vadd.f32 %v2294_v46, %v2151_v30  ;;  %v2654_v21 = vadd.f32 %v2653_v22, %v2623_v25 }
 0x324   : > { %v2584_v27 = vadd.f32 %v2583_v9, %v7919_v38  ;;  %v7944_v46 = vadd.f32 %v2480_v24, %v2337_v2  ;;  %v2655_v19 = vadd.f32 %v2654_v21, %v2624_v1 }
 0x326   : > { %v2585_v63 = vadd.f32 %v2584_v27, %v7927_v20  ;;  %v2656_v26 = vadd.f32 %v2655_v19, %v2625_v13  ;;  %v2627_v53 = vmul.f32 %v7944_v46, %v7944_v46  ;;  %v9474_v27 = vld [vmem:[#allocation19_spill] sm:$0xff] }
 0x327   : > { %v2111_v55 = vpop.f32.mrf.mxu2 }
 0x328   : > { %v2297_v59 = vpop.f32.mrf.mxu3  ;;  %v2152_v56 = vadd.f32 %v2111_v55, %v1966_v32  ;;  %v2586_v28 = vadd.f32 %v2585_v63, %v7933_v51  ;;  %v2657_v50 = vadd.f32 %v2656_v26, %v2626_v37  ;;  %v1932_v32 = vpop.f32.mrf.mxu1  ;;  %v9475_v37 = vld [vmem:[#allocation20_spill] sm:$0xff] }
 0x329   : > { %v2485_v40 = vpop.f32.mrf.mxu0  ;;  %v1969_v1 = vadd.f32 %v1932_v32, %v9474_v27 }
 0x32a   : > { %v2338_v16 = vadd.f32 %v2297_v59, %v2152_v56  ;;  %v2587_v62 = vadd.f32 %v2586_v28, %v7939_v34  ;;  %v2658_v30 = vadd.f32 %v2657_v50, %v2627_v53 }
 0x32c   : > { %v7950_v43 = vadd.f32 %v2483_v14, %v2338_v16  ;;  %v2588_v11 = vadd.f32 %v2587_v62, %v7944_v46 }
 0x32e   : > { %v2628_v42 = vmul.f32 %v7950_v43, %v7950_v43  ;;  %v2589_v14 = vadd.f32 %v2588_v11, %v7950_v43 }
 0x32f   : > { %v2113_v6 = vpop.f32.mrf.mxu2 }
 0x330   : > { %v2299_v29 = vpop.f32.mrf.mxu3  ;;  %v2153_v24 = vadd.f32 %v2113_v6, %v1967_v8  ;;  %v2659_v4 = vadd.f32 %v2658_v30, %v2628_v42  ;;  %v1935_v8 = vpop.f32.mrf.mxu1 }
 0x331   : > { %v2488_v45 = vpop.f32.mrf.mxu0  ;;  %v1970_v6 = vadd.f32 %v1935_v8, %v9475_v37 }
 0x332   : > { %v2339_v36 = vadd.f32 %v2299_v29, %v2153_v24 }
 0x334   : > { %v7959_v5 = vadd.f32 %v2485_v40, %v2339_v36 }
 0x336   : > { %v2590_v17 = vadd.f32 %v2589_v14, %v7959_v5  ;;  %v2629_v9 = vmul.f32 %v7959_v5, %v7959_v5  ;;  %v9476_v14 = vld [vmem:[#allocation21_spill] sm:$0xff] }
 0x337   : > { %v2116_v55 = vpop.f32.mrf.mxu2 }
 0x338   : > { %v2302_v59 = vpop.f32.mrf.mxu3  ;;  %v2660_v25 = vadd.f32 %v2659_v4, %v2629_v9  ;;  %v2154_v2 = vadd.f32 %v2116_v55, %v1968_v58  ;;  %v1937_v36 = vpop.f32.mrf.mxu1 }
 0x339   : > { %v2490_v57 = vpop.f32.mrf.mxu0 }
 0x33a   : > { %v2340_v56 = vadd.f32 %v2302_v59, %v2154_v2 }
 0x33c   : > { %v7965_v22 = vadd.f32 %v2488_v45, %v2340_v56  ;;  %v1971_v45 = vadd.f32 %v1937_v36, %v9476_v14  ;;  %v6231_v36 = vld [vmem:[#allocation9 + $0x1b0] sm:$0xff] }
 0x33e   : > { %v2591_v16 = vadd.f32 %v2590_v17, %v7965_v22  ;;  %v2630_v40 = vmul.f32 %v7965_v22, %v7965_v22 }
 0x33f   : > { %v2118_v21 = vpop.f32.mrf.mxu2 }
 0x340   : > { %v2304_v63 = vpop.f32.mrf.mxu3  ;;  %v2661_v13 = vadd.f32 %v2660_v25, %v2630_v40  ;;  %v2155_v0 = vadd.f32 %v2118_v21, %v1969_v1 }
 0x341   : > { %v2493_v11 = vpop.f32.mrf.mxu0 }
 0x342   : > { %v2341_v19 = vadd.f32 %v2304_v63, %v2155_v0 }
 0x344   : > { %v7971_v28 = vadd.f32 %v2490_v57, %v2341_v19 }
 0x346   : > { %v2592_v29 = vadd.f32 %v2591_v16, %v7971_v28  ;;  %v2631_v26 = vmul.f32 %v7971_v28, %v7971_v28 }
 0x347   : > { %v2121_v62 = vpop.f32.mrf.mxu2 }
 0x348   : > { %v2307_v53 = vpop.f32.mrf.mxu3  ;;  %v2662_v24 = vadd.f32 %v2661_v13, %v2631_v26  ;;  %v2156_v50 = vadd.f32 %v2121_v62, %v1970_v6 }
 0x349   : > { %v2495_v59 = vpop.f32.mrf.mxu0 }
 0x34a   : > { %v2342_v42 = vadd.f32 %v2307_v53, %v2156_v50  ;;  %v6232_v50 = vld [vmem:[#allocation9 + $0x1b8] sm:$0xff] }
 0x34b   : > { %3824 = vmatpush.bf16.msrb.mxu3 %v6232_v50  ;;  %v6227_v50 = vld [vmem:[#allocation9 + $0x190] sm:$0xff] }
 0x34c   : > { %v7977_v30 = vadd.f32 %v2493_v11, %v2342_v42 }
 0x34e   : > { %v2593_v15 = vadd.f32 %v2592_v29, %v7977_v30  ;;  %v2632_v58 = vmul.f32 %v7977_v30, %v7977_v30 }
 0x34f   : > { %v2123_v32 = vpop.f32.mrf.mxu2  ;;  %3825 = vmatpush.bf16.msrb.mxu3 %v6231_v36 }
 0x350   : > { %v2663_v4 = vadd.f32 %v2662_v24, %v2632_v58  ;;  %v2157_v17 = vadd.f32 %v2123_v32, %v1971_v45  ;;  %v2309_v9 = vpop.f32.mrf.mxu3 }
 0x352   : > { %v2343_v55 = vadd.f32 %v2309_v9, %v2157_v17  ;;  %v6240_v17 = vld [vmem:[#allocation9 + $0x78] sm:$0xff]  ;;  %v6229_v9 = vld [vmem:[#allocation9 + $0x1a0] sm:$0xff] }
 0x353   : > { %4026 = vmatpush.bf16.msrb.mxu0 %v6240_v17  ;;  %v6226_v17 = vld [vmem:[#allocation9 + $0x188] sm:$0xff] }
 0x354   : > { %v7983_v25 = vadd.f32 %v2495_v59, %v2343_v55  ;;  %v6239_v55 = vld [vmem:[#allocation9 + $0x70] sm:$0xff] }
 0x356   : > { %v2594_v2 = vadd.f32 %v2593_v15, %v7983_v25  ;;  %v2633_v56 = vmul.f32 %v7983_v25, %v7983_v25  ;;  %v6230_v15 = vld [vmem:[#allocation9 + $0x1a8] sm:$0xff] }
 0x357   : > { %3826 = vmatpush.bf16.msrb.mxu3 %v6230_v15  ;;  %4027 = vmatpush.bf16.msrb.mxu0 %v6239_v55  ;;  %v6214_v15 = vld [vmem:[#allocation9 + $0x28] sm:$0xff] }
 0x358   : > { %v2595_v27 = vrot.slane %v2594_v2, 4  ;;  %v2664_v1 = vadd.f32 %v2663_v4, %v2633_v56  ;;  %v6216_v56 = vld [vmem:[#allocation9 + $0x38] sm:$0xff] }
 0x359   : > { %3670 = vmatpush.bf16.msrb.mxu2 %v6216_v56 }
 0x35a   : > { %v2596_v16 = vadd.f32 %v2595_v27, %v2594_v2  ;;  %v2665_v40 = vrot.slane %v2664_v1, 4  ;;  %v6228_v27 = vld [vmem:[#allocation9 + $0x198] sm:$0xff] }
 0x35b   : > { %3827 = vmatpush.bf16.msrb.mxu3 %v6229_v9 }
 0x35c   : > { %v2597_v57 = vrot.slane %v2596_v16, 2  ;;  %v2666_v21 = vadd.f32 %v2665_v40, %v2664_v1  ;;  %v6238_v40 = vld [vmem:[#allocation9 + $0x68] sm:$0xff] }
 0x35d   : > { %4028 = vmatpush.bf16.msrb.mxu0 %v6238_v40 }
 0x35e   : > { %v2598_v63 = vadd.f32 %v2597_v57, %v2596_v16  ;;  %v2667_v13 = vrot.slane %v2666_v21, 2  ;;  %v9477_v57 = vld [vmem:[#allocation22_spill] sm:$0xff] }
 0x35f   : > { %3828 = vmatpush.bf16.msrb.mxu3 %v6228_v27 }
 0x360   : > { %v2599_v0 = vrot.slane %v2598_v63, 1  ;;  %v2668_v8 = vadd.f32 %v2667_v13, %v2666_v21 }
 0x362   : > { %v2600_v19 = vadd.f32 %v2599_v0, %v2598_v63  ;;  %v2669_v37 = vrot.slane %v2668_v8, 1  ;;  %v9478_v63 = vld [vmem:[#allocation25_spill] sm:$0xff] }
 0x363   : > { %3829 = vmatpush.bf16.msrb.mxu3 %v6227_v50 }
 0x364   : > { %v2670_v6 = vadd.f32 %v2669_v37, %v2668_v8  ;;  %v7988_v29 = vmul.f32 0.00390625, %v2600_v19 }
 0x366   : > { %v2673_v26 = vmul.f32 0.00390625, %v2670_v6  ;;  %v2674_v62 = vmul.f32 %v7988_v29, %v7988_v29  ;;  %v2750_v53 = vsub.f32 %v7977_v30, %v7988_v29  ;;  %v2751_v24 = vsub.f32 %v7983_v25, %v7988_v29  ;;  %v6213_v30 = vld [vmem:[#allocation9 + $0x20] sm:$0xff] }
 0x367   : > { %v2746_v45 = vsub.f32 %v7950_v43, %v7988_v29  ;;  %v2747_v58 = vsub.f32 %v7959_v5, %v7988_v29  ;;  %v2748_v32 = vsub.f32 %v7965_v22, %v7988_v29  ;;  %v2749_v4 = vsub.f32 %v7971_v28, %v7988_v29  ;;  %3830 = vmatpush.bf16.msrb.mxu3 %v6226_v17 }
 0x368   : > { %v2675_v11 = vsub.f32 %v2673_v26, %v2674_v62  ;;  %v2720_v16 = vsub.f32 %v7657_v35, %v7988_v29  ;;  %v2721_v21 = vsub.f32 %v9477_v57, %v7988_v29  ;;  %v2722_v13 = vsub.f32 %v9478_v63, %v7988_v29  ;;  %v6215_v62 = vld [vmem:[#allocation9 + $0x30] sm:$0xff] }
 0x369   : > { %v2723_v0 = vsub.f32 %v7678_v44, %v7988_v29  ;;  %v2724_v19 = vsub.f32 %v7683_v3, %v7988_v29  ;;  %v2725_v37 = vsub.f32 %v7691_v48, %v7988_v29  ;;  %v2726_v35 = vsub.f32 %v7696_v52, %v7988_v29  ;;  %3671 = vmatpush.bf16.msrb.mxu2 %v6215_v62  ;;  %v6212_v62 = vld [vmem:[#allocation9 + $0x18] sm:$0xff] }
 0x36a   : > { %v2676_v42 = vmax.f32 %v2675_v11, 0.0  ;;  %v2727_v6 = vsub.f32 %v7703_v54, %v7988_v29  ;;  %v2728_v44 = vsub.f32 %v7710_v33, %v7988_v29  ;;  %v2729_v26 = vsub.f32 %v7827_v60, %v7988_v29 }
 0x36b   : > { %v2730_v48 = vsub.f32 %v7726_v61, %v7988_v29  ;;  %v2731_v52 = vsub.f32 %v7844_v10, %v7988_v29  ;;  %v2732_v11 = vsub.f32 %v7739_v31, %v7988_v29  ;;  %v2733_v54 = vsub.f32 %v7859_v18, %v7988_v29 }
 0x36c   : > { %v2677_v14 = vadd.f32 1e-05, %v2676_v42  ;;  %v6237_v42 = vld [vmem:[#allocation9 + $0x60] sm:$0xff]  ;;  %v2734_v33 = vsub.f32 %v7748_v49, %v7988_v29  ;;  %v2735_v60 = vsub.f32 %v7875_v7, %v7988_v29  ;;  %v2736_v10 = vsub.f32 %v7757_v39, %v7988_v29  ;;  %v6218_v39 = vld [vmem:[#allocation9 + $0xc8] sm:$0xff] }
 0x36d   : > { %v2737_v31 = vsub.f32 %v7888_v23, %v7988_v29  ;;  %v2738_v18 = vsub.f32 %v7768_v47, %v7988_v29  ;;  %4029 = vmatpush.bf16.msrb.mxu0 %v6237_v42  ;;  %v2739_v49 = vsub.f32 %v7904_v12, %v7988_v29  ;;  %v2740_v7 = vsub.f32 %v9470_v41, %v7988_v29  ;;  %v6236_v41 = vld [vmem:[#allocation9 + $0x58] sm:$0xff] }
 0x36e   : > { %6749 = vrsqrt.f32 %v2677_v14  ;;  %vm2684_vm7 = vweird.f32 %v2677_v14  ;;  %v2741_v36 = vsub.f32 %v7919_v38, %v7988_v29  ;;  %v2743_v47 = vsub.f32 %v7933_v51, %v7988_v29  ;;  %3539 = vmatpush.bf16.msra.mxu1 %v6218_v39  ;;  %v6217_v51 = vld [vmem:[#allocation9 + $0xc0] sm:$0xff]  ;;  %3672 = vmatpush.bf16.msrb.mxu2 %v6214_v15 }
 0x36f   : > { %v2744_v9 = vsub.f32 %v7939_v34, %v7988_v29  ;;  %v2745_v12 = vsub.f32 %v7944_v46, %v7988_v29  ;;  %v6233_v39 = vld [vmem:[#allocation9 + $0x40] sm:$0xff] }
 0x371   : > { %4030 = vmatpush.bf16.msrb.mxu0 %v6236_v41 }
 0x372   : > { %3540 = vmatpush.bf16.msra.mxu1 %v6217_v51  ;;  %3673 = vmatpush.bf16.msrb.mxu2 %v6213_v30 }
 0x374   : > { %v6750_v59 = vpop.eup %6749 }
 0x375   : > { %v2679_v2 = vmul.f32 %v6750_v59, %v2677_v14  ;;  %vm2685_vm6 = vweird.f32 %v6750_v59  ;;  %v2742_v14 = vsub.f32 %v7927_v20, %v7988_v29 }
 0x376   : > { %vm2686_vm8 = vmor %vm2684_vm7, %vm2685_vm6  ;;  %3674 = vmatpush.bf16.msrb.mxu2 %v6212_v62 }
 0x377   : > { %v2680_v1 = vmul.f32 %v6750_v59, %v2679_v2 }
 0x379   : > { %v2681_v8 = vmul.f32 0.5, %v2680_v1 }
 0x37b   : > { %v2682_v3 = vsub.f32 1.5, %v2681_v8 }
 0x37d   : > { %v2683_v61 = vmul.f32 %v6750_v59, %v2682_v3 }
 0x37f   : > { %v2687_v23 = vsel %vm2686_vm8, %v6750_v59, %v2683_v61 }
 0x380   : > { %v2782_v38 = vmul.f32 %v2750_v53, %v2687_v23  ;;  %v2783_v20 = vmul.f32 %v2751_v24, %v2687_v23  ;;  %v8063_v55 = vmul.f32 %v2720_v16, %v2687_v23  ;;  %v8065_v59 = vmul.f32 %v2721_v21, %v2687_v23  ;;  %v6235_v21 = vld [vmem:[#allocation9 + $0x50] sm:$0xff] }
 0x381   : > { %v8067_v2 = vmul.f32 %v2722_v13, %v2687_v23  ;;  %v8069_v34 = vmul.f32 %v2723_v0, %v2687_v23  ;;  %v8071_v46 = vmul.f32 %v2724_v19, %v2687_v23  ;;  %v8073_v56 = vmul.f32 %v2725_v37, %v2687_v23  ;;  %v6225_v19 = vld [vmem:[#allocation9 + $0x180] sm:$0xff]  ;;  %v6248_v37 = vld [vmem:[#allocation9 + $0x138] sm:$0xff]  ;;  %4031 = vmatpush.bf16.msrb.mxu0 %v6235_v21 }
 0x382   : > { %v2814_v53 = vmax.f32 %v2782_v38, 0.0  ;;  %v2815_v27 = vmax.f32 %v2783_v20, 0.0  ;;  %v8075_v25 = vmul.f32 %v2726_v35, %v2687_v23  ;;  %v8077_v24 = vmul.f32 %v2727_v6, %v2687_v23  ;;  %3831 = vmatpush.bf16.msrb.mxu3 %v6225_v19  ;;  %4213 = vmatpush.bf16.msrb.mxu1 %v6248_v37  ;;  %v6210_v20 = vld [vmem:[#allocation9 + $0x8] sm:$0xff]  ;;  %v6209_v21 = vld [vmem:[#allocation9] sm:$0xff] }
 0x383   : > { %v8079_v1 = vmul.f32 %v2728_v44, %v2687_v23  ;;  %v8081_v16 = vmul.f32 %v2729_v26, %v2687_v23  ;;  %v8083_v40 = vmul.f32 %v2730_v48, %v2687_v23  ;;  %v8085_v57 = vmul.f32 %v2731_v52, %v2687_v23 }
 0x384   : > { %v6522_v63 = vpack.c.bf16 %v2815_v27, %v2814_v53  ;;  %v8087_v13 = vmul.f32 %v2732_v11, %v2687_v23  ;;  %v8089_v0 = vmul.f32 %v2733_v54, %v2687_v23  ;;  %v8091_v8 = vmul.f32 %v2734_v33, %v2687_v23 }
 0x385   : > { %v8093_v35 = vmul.f32 %v2735_v60, %v2687_v23  ;;  %v8095_v6 = vmul.f32 %v2736_v10, %v2687_v23  ;;  %v8097_v44 = vmul.f32 %v2737_v31, %v2687_v23  ;;  %v8099_v26 = vmul.f32 %v2738_v18, %v2687_v23  ;;  %v6234_v60 = vld [vmem:[#allocation9 + $0x48] sm:$0xff] }
 0x386   : > { %6642 = vst [vmem:[#allocation2 + $0x80] sm:$0xff] %v6522_v63   ;;  %v8101_v50 = vmul.f32 %v2739_v49, %v2687_v23  ;;  %v8103_v3 = vmul.f32 %v2740_v7, %v2687_v23  ;;  %v8105_v48 = vmul.f32 %v2741_v36, %v2687_v23  ;;  %v8107_v52 = vmul.f32 %v2742_v14, %v2687_v23 }
 0x387   : > { %v8109_v11 = vmul.f32 %v2743_v47, %v2687_v23  ;;  %v8111_v42 = vmul.f32 %v2744_v9, %v2687_v23  ;;  %v2777_v54 = vmul.f32 %v2745_v12, %v2687_v23  ;;  %v2778_v33 = vmul.f32 %v2746_v45, %v2687_v23  ;;  %4032 = vmatpush.bf16.msrb.mxu0 %v6234_v60 }
 0x388   : > { %v2779_v61 = vmul.f32 %v2747_v58, %v2687_v23  ;;  %v2780_v10 = vmul.f32 %v2748_v32, %v2687_v23  ;;  %v2781_v31 = vmul.f32 %v2749_v4, %v2687_v23  ;;  %v2784_v18 = vmax.f32 %v8063_v55, 0.0  ;;  %v6211_v58 = vld [vmem:[#allocation9 + $0x10] sm:$0xff] }
 0x389   : > { %v2785_v43 = vmax.f32 %v8065_v59, 0.0  ;;  %v2786_v45 = vmax.f32 %v8067_v2, 0.0  ;;  %v2787_v49 = vmax.f32 %v8069_v34, 0.0  ;;  %v2788_v5 = vmax.f32 %v8071_v46, 0.0  ;;  %3675 = vmatpush.bf16.msrb.mxu2 %v6211_v58  ;;  %v6247_v58 = vld [vmem:[#allocation9 + $0x130] sm:$0xff] }
 0x38a   : > { %v2789_v22 = vmax.f32 %v8073_v56, 0.0  ;;  %v2790_v32 = vmax.f32 %v8075_v25, 0.0  ;;  %v2791_v28 = vmax.f32 %v8077_v24, 0.0  ;;  %v2792_v29 = vmax.f32 %v8079_v1, 0.0  ;;  %4214 = vmatpush.bf16.msrb.mxu1 %v6247_v58 }
 0x38b   : > { %v2793_v4 = vmax.f32 %v8081_v16, 0.0  ;;  %v2794_v7 = vmax.f32 %v8083_v40, 0.0  ;;  %v2795_v36 = vmax.f32 %v8085_v57, 0.0  ;;  %v2796_v14 = vmax.f32 %v8087_v13, 0.0  ;;  %4033 = vmatpush.bf16.msrb.mxu0 %v6233_v39 }
 0x38c   : > { %v2797_v15 = vmax.f32 %v8089_v0, 0.0  ;;  %v2798_v17 = vmax.f32 %v8091_v8, 0.0  ;;  %v2799_v23 = vmax.f32 %v8093_v35, 0.0  ;;  %v2800_v47 = vmax.f32 %v8095_v6, 0.0 }
 0x38d   : > { %v2801_v9 = vmax.f32 %v8097_v44, 0.0  ;;  %v2802_v12 = vmax.f32 %v8099_v26, 0.0  ;;  %v2803_v41 = vmax.f32 %v8101_v50, 0.0  ;;  %v2804_v38 = vmax.f32 %v8103_v3, 0.0  ;;  %3676 = vmatpush.bf16.msrb.mxu2 %v6210_v20 }
 0x38e   : > { %v2805_v55 = vmax.f32 %v8105_v48, 0.0  ;;  %v2806_v59 = vmax.f32 %v8107_v52, 0.0  ;;  %v2807_v51 = vmax.f32 %v8109_v11, 0.0  ;;  %v2808_v2 = vmax.f32 %v8111_v42, 0.0 }
 0x38f   : > { %v2809_v34 = vmax.f32 %v2777_v54, 0.0  ;;  %v2810_v46 = vmax.f32 %v2778_v33, 0.0  ;;  %v2811_v56 = vmax.f32 %v2779_v61, 0.0  ;;  %v2812_v30 = vmax.f32 %v2780_v10, 0.0 }
 0x390   : > { %v2813_v53 = vmax.f32 %v2781_v31, 0.0  ;;  %v8150_v27 = vpack.c.bf16 %v2785_v43, %v2784_v18  ;;  %v8152_v25 = vpack.c.bf16 %v2787_v49, %v2786_v45  ;;  %v8154_v24 = vpack.c.bf16 %v2789_v22, %v2788_v5 }
 0x391   : > { %v8156_v1 = vpack.c.bf16 %v2791_v28, %v2790_v32  ;;  %v8158_v16 = vpack.c.bf16 %v2793_v4, %v2792_v29  ;;  %v8160_v40 = vpack.c.bf16 %v2795_v36, %v2794_v7  ;;  %v8162_v57 = vpack.c.bf16 %v2797_v15, %v2796_v14  ;;  %3677 = vmatpush.bf16.msrb.mxu2 %v6209_v21 }
 0x392   : > { %v8164_v63 = vpack.c.bf16 %v2799_v23, %v2798_v17  ;;  %v8166_v13 = vpack.c.bf16 %v2801_v9, %v2800_v47  ;;  %v8168_v0 = vpack.c.bf16 %v2803_v41, %v2802_v12  ;;  %v8170_v8 = vpack.c.bf16 %v2805_v55, %v2804_v38  ;;  %6628 = vst [vmem:[#allocation2 + $0x10] sm:$0xff] %v8152_v25  }
 0x393   : > { %v8173_v19 = vpack.c.bf16 %v2807_v51, %v2806_v59  ;;  %v8175_v37 = vpack.c.bf16 %v2809_v34, %v2808_v2  ;;  %v8177_v35 = vpack.c.bf16 %v2811_v56, %v2810_v46  ;;  %v8179_v6 = vpack.c.bf16 %v2813_v53, %v2812_v30  ;;  %6631 = vst [vmem:[#allocation2 + $0x28] sm:$0xff] %v8158_v16  }
 0x394   : > { %v6530_v44 = vunpack.c.l.b16 %v8150_v27  ;;  %v3118_v26 = vshrl.u32 %v8150_v27, 16  ;;  %v6534_v62 = vunpack.c.l.b16 %v8152_v25  ;;  %v3125_v50 = vshrl.u32 %v8152_v25, 16  ;;  %6632 = vst [vmem:[#allocation2 + $0x30] sm:$0xff] %v8160_v40  }
 0x395   : > { %v3121_v52 = vshll.u32 %v8150_v27, 16  ;;  %v3128_v54 = vshll.u32 %v8152_v25, 16  ;;  %6633 = vst [vmem:[#allocation2 + $0x38] sm:$0xff] %v8162_v57   ;;  %v6538_v49 = vunpack.c.l.b16 %v8154_v24  ;;  %v3132_v5 = vshrl.u32 %v8154_v24, 16 }
 0x396   : > { %v2967_v3 = vpack.c.b16 %v6530_v44, %v6530_v44  ;;  %v3120_v48 = vrot.slane %v3118_v26, 7  ;;  %v2968_v11 = vpack.c.b16 %v6534_v62, %v6534_v62  ;;  %v3127_v42 = vrot.slane %v3125_v50, 7  ;;  %6634 = vst [vmem:[#allocation2 + $0x40] sm:$0xff] %v8164_v63  }
 0x397   : > { %6635 = vst [vmem:[#allocation2 + $0x48] sm:$0xff] %v8166_v13   ;;  %v2969_v22 = vpack.c.b16 %v6538_v49, %v6538_v49  ;;  %v3134_v32 = vrot.slane %v3132_v5, 7  ;;  %v3135_v28 = vshll.u32 %v8154_v24, 16  ;;  %v6542_v38 = vunpack.c.l.b16 %v8156_v1 }
 0x398   : > { %v2988_v33 = vshrl.u32 %v2967_v3, 16  ;;  %v3123_v60 = vor.u32 %v3121_v52, %v3120_v48  ;;  %v2991_v61 = vshrl.u32 %v2968_v11, 16  ;;  %v3130_v10 = vor.u32 %v3128_v54, %v3127_v42  ;;  %6636 = vst [vmem:[#allocation2 + $0x50] sm:$0xff] %v8168_v0  }
 0x399   : > { %6637 = vst [vmem:[#allocation2 + $0x58] sm:$0xff] %v8170_v8   ;;  %v2885_v45 = vld [vmem:[#allocation2 + $0x10] sm:$0xff]   ;;  %v2994_v29 = vshrl.u32 %v2969_v22, 16  ;;  %v3137_v4 = vor.u32 %v3135_v28, %v3134_v32  ;;  %v3139_v20 = vshrl.u32 %v8156_v1, 16  ;;  %v2970_v55 = vpack.c.b16 %v6542_v38, %v6542_v38 }
 0x39a   : > { %v8198_v18 = vsel %vm7111_vm2, %v2988_v33, %v3123_v60  ;;  %v8204_v43 = vsel %vm7111_vm2, %v2991_v61, %v3130_v10  ;;  %6638 = vst [vmem:[#allocation2 + $0x60] sm:$0xff] %v8173_v19   ;;  %v3142_v51 = vshll.u32 %v8156_v1, 16  ;;  %v3274_v30 = vrot.slane %v3121_v52, 1 }
 0x39b   : > { %3541 = vmatmul.bf16.vlgmr.msra.gmra.mxu1 %v8198_v18  ;;  %3832 = vmatmul.bf16.vlgmr.msrb.gmra.mxu3 %v8204_v43  ;;  %6639 = vst [vmem:[#allocation2 + $0x68] sm:$0xff] %v8175_v37   ;;  %v8218_v47 = vsel %vm7111_vm2, %v2994_v29, %v3137_v4  ;;  %v3141_v59 = vrot.slane %v3139_v20, 7  ;;  %v2997_v46 = vshrl.u32 %v2970_v55, 16  ;;  %v3149_v62 = vshll.u32 %v8158_v16, 16 }
 0x39c   : > { %6640 = vst [vmem:[#allocation2 + $0x70] sm:$0xff] %v8177_v35   ;;  %v8231_v44 = vor.u32 %v3274_v30, %v3118_v26  ;;  %v3276_v48 = vrot.slane %v3128_v54, 1  ;;  %v3278_v11 = vrot.slane %v3135_v28, 1  ;;  %v6546_v60 = vunpack.c.l.b16 %v8158_v16 }
 0x39d   : > { %6641 = vst [vmem:[#allocation2 + $0x78] sm:$0xff] %v8179_v6   ;;  %v3144_v56 = vor.u32 %v3142_v51, %v3141_v59  ;;  %v3156_v54 = vshll.u32 %v8160_v40, 16  ;;  %v3280_v61 = vrot.slane %v3142_v51, 1  ;;  %v3146_v10 = vshrl.u32 %v8158_v16, 16 }
 0x39e   : > { %2887 = vst [vmem:[#allocation2] sm:$0xff] %v2885_v45   ;;  %v8244_v33 = vor.u32 %v3276_v48, %v3125_v50  ;;  %v8246_v26 = vor.u32 %v3278_v11, %v3132_v5  ;;  %v3163_v45 = vshll.u32 %v8162_v57, 16  ;;  %v3282_v22 = vrot.slane %v3149_v62, 1  ;;  %v6246_v50 = vld [vmem:[#allocation9 + $0x128] sm:$0xff] }
 0x39f   : > { %v8237_v42 = vsel %vm7111_vm2, %v2997_v46, %v3144_v56  ;;  %v8256_v32 = vor.u32 %v3280_v61, %v3139_v20  ;;  %v3170_v5 = vshll.u32 %v8164_v63, 16  ;;  %v3153_v29 = vshrl.u32 %v8160_v40, 16  ;;  %4215 = vmatpush.bf16.msrb.mxu1 %v6246_v50  ;;  %v8309_v61 = vld [vmem:[#allocation2 + $0x80] sm:$0xff]  }
 0x3a0   : > { %v8260_v28 = vor.u32 %v3282_v22, %v3146_v10  ;;  %v3177_v4 = vshll.u32 %v8166_v13, 16  ;;  %v3191_v38 = vshll.u32 %v8170_v8, 16  ;;  %v3181_v46 = vshrl.u32 %v8168_v0, 16 }
 0x3a1   : > { %v3188_v30 = vshrl.u32 %v8170_v8, 16  ;;  %v9382_v11 = vshrl.u32 %v8173_v19, 16  ;;  %v9383_v50 = vshll.u32 %v8179_v6, 16 }
 0x3a2   : > { %v3290_v20 = vrot.slane %v3177_v4, 1 }
 0x3a3   : > { %v3302_v58 = vrot.slane %v9383_v50, 1 }
 0x3a4   : > { %v2890_v7 = vld [vmem:[#allocation2 + $0x78] sm:$0xff]  }
 0x3a5   : > { %v6525_v36 = vld [vmem:[#allocation2] sm:$0xff]   ;;  %2892 = vst [vmem:[#allocation2 + $0x88] sm:$0xff] %v2890_v7   ;;  %v3284_v7 = vrot.slane %v3156_v54, 1 }
 0x3a6   : > { %v3111_v14 = vshrl.u32 %v6525_v36, 16  ;;  %4034 = vmatmul.bf16.vlgmr.msrb.gmra.mxu0 %v6525_v36  ;;  %v6526_v39 = vunpack.c.l.b16 %v6525_v36  ;;  %v3114_v15 = vshll.u32 %v6525_v36, 16  ;;  %v6527_v2 = vunpack.c.h.b16 %v6525_v36 }
 0x3a7   : > { %v2971_v36 = vpack.c.b16 %v6546_v60, %v6546_v60  ;;  %v9380_v60 = vshll.u32 %v8177_v35, 16 }
 0x3a8   : > { %v2966_v17 = vpack.c.b16 %v6526_v39, %v6526_v39  ;;  %v3113_v23 = vrot.slane %v3111_v14, 7  ;;  %v3272_v34 = vrot.slane %v3114_v15, 1  ;;  %v3326_v21 = vpack.c.b16 %v6527_v2, %v6527_v2 }
 0x3a9   : > { %v3160_v39 = vshrl.u32 %v8162_v57, 16  ;;  %v3000_v55 = vshrl.u32 %v2971_v36, 16  ;;  %v9379_v2 = vshll.u32 %v8173_v19, 16 }
 0x3aa   : > { %v2985_v9 = vshrl.u32 %v2966_v17, 16  ;;  %v3116_v12 = vor.u32 %v3114_v15, %v3113_v23  ;;  %v8226_v53 = vor.u32 %v3272_v34, %v3111_v14  ;;  %v3345_v3 = vshll.u32 %v3326_v21, 16 }
 0x3ab   : > { %3546 = vmatmul.bf16.gmra.mxu1 %v8204_v43  ;;  %3837 = vmatmul.bf16.gmra.mxu3 %v8218_v47  ;;  %v3148_v14 = vrot.slane %v3146_v10, 7  ;;  %v8269_v15 = vor.u32 %v3284_v7, %v3153_v29  ;;  %v3167_v17 = vshrl.u32 %v8164_v63, 16  ;;  %v3184_v23 = vshll.u32 %v8168_v0, 16 }
 0x3ac   : > { %v3254_v41 = vsel %vm7111_vm2, %v2985_v9, %v3116_v12  ;;  %v8240_v52 = vrot.slane %v3345_v3, 4  ;;  %v3288_v12 = vrot.slane %v3170_v5, 1  ;;  %v9378_v21 = vshll.u32 %v8175_v37, 16  ;;  %v8319_v36 = vld [vmem:[#allocation2 + $0x88] sm:$0xff]  }
 0x3ad   : > { %3678 = vmatmul.bf16.vlgmr.msrb.gmra.mxu2 %v3254_v41  ;;  %v3174_v41 = vshrl.u32 %v8166_v13, 16  ;;  %v3151_v59 = vor.u32 %v3149_v62, %v3148_v14  ;;  %v3292_v56 = vrot.slane %v3184_v23, 1  ;;  %v3294_v62 = vrot.slane %v3191_v38, 1 }
 0x3ae   : > { %v8285_v51 = vor.u32 %v3288_v12, %v3167_v17  ;;  %v3296_v22 = vrot.slane %v9379_v2, 1  ;;  %v9381_v7 = vshrl.u32 %v8175_v37, 16  ;;  %v9388_v12 = vshll.u32 %v8309_v61, 16 }
 0x3af   : > { %v8290_v34 = vor.u32 %v3290_v20, %v3174_v41  ;;  %v3259_v3 = vsel %vm7111_vm2, %v3000_v55, %v3151_v59  ;;  %v8304_v48 = vor.u32 %v3292_v56, %v3181_v46  ;;  %v8313_v10 = vor.u32 %v3294_v62, %v3188_v30 }
 0x3b0   : > { %v8323_v14 = vor.u32 %v3296_v22, %v9382_v11  ;;  %v6550_v20 = vunpack.c.l.b16 %v8160_v40  ;;  %v9384_v55 = vshrl.u32 %v8177_v35, 16  ;;  %v3300_v56 = vrot.slane %v9380_v60, 1 }
 0x3b1   : > { %v9385_v62 = vshrl.u32 %v8179_v6, 16  ;;  %v9386_v22 = vshll.u32 %v8319_v36, 16  ;;  %v9389_v2 = vshrl.u32 %v8309_v61, 16  ;;  %v9387_v11 = vshrl.u32 %v8319_v36, 16 }
 0x3b2   : > { %9481 = vst [vmem:[#allocation23_spill] sm:$0xff] %v8323_v14  ;;  %v2972_v60 = vpack.c.b16 %v6550_v20, %v6550_v20  ;;  %v6554_v20 = vunpack.c.l.b16 %v8162_v57 }
 0x3b6   : > { %4039 = vmatmul.bf16.gmra.mxu0 %v8150_v27 }
 0x3bb   : > { %3551 = vmatmul.bf16.gmra.mxu1 %v8218_v47  ;;  %3842 = vmatmul.bf16.gmra.mxu3 %v8237_v42 }
 0x3bd   : > { %3683 = vmatmul.bf16.gmra.mxu2 %v8198_v18  ;;  %v3286_v18 = vrot.slane %v3163_v45, 1 }
 0x3bf   : > { %v8275_v9 = vor.u32 %v3286_v18, %v3160_v39  ;;  %v3298_v18 = vrot.slane %v9378_v21, 1  ;;  %v8343_v21 = vor.u32 %v3300_v56, %v9384_v55  ;;  %v3306_v56 = vrot.slane %v9386_v22, 1 }
 0x3c0   : > { %v2973_v22 = vpack.c.b16 %v6554_v20, %v6554_v20  ;;  %v6562_v20 = vunpack.c.l.b16 %v8166_v13 }
 0x3c1   : > { %v8332_v59 = vor.u32 %v3298_v18, %v9381_v7  ;;  %9483 = vst [vmem:[#allocation26_spill] sm:$0xff] %v8343_v21  ;;  %v8348_v18 = vor.u32 %v3302_v58, %v9385_v62  ;;  %v3155_v7 = vrot.slane %v3153_v29, 7  ;;  %v8361_v55 = vor.u32 %v3306_v56, %v9387_v11  ;;  %v6269_v21 = vld [vmem:[#allocation9 + $0x160] sm:$0xff] }
 0x3c2   : > { %v3003_v58 = vshrl.u32 %v2972_v60, 16  ;;  %v3162_v60 = vrot.slane %v3160_v39, 7  ;;  %v3006_v56 = vshrl.u32 %v2973_v22, 16 }
 0x3c3   : > { %9482 = vst [vmem:[#allocation16_spill] sm:$0xff] %v8332_v59  ;;  %v3158_v62 = vor.u32 %v3156_v54, %v3155_v7 }
 0x3c4   : > { %9484 = vst [vmem:[#allocation27_spill] sm:$0xff] %v8348_v18  ;;  %v3165_v54 = vor.u32 %v3163_v45, %v3162_v60  ;;  %v6244_v60 = vld [vmem:[#allocation9 + $0x118] sm:$0xff] }
 0x3c5   : > { %9486 = vst [vmem:[#allocation17_spill] sm:$0xff] %v8361_v55  ;;  %v3260_v29 = vsel %vm7111_vm2, %v3003_v58, %v3158_v62  ;;  %v6558_v62 = vunpack.c.l.b16 %v8164_v63  ;;  %v3169_v58 = vrot.slane %v3167_v17, 7  ;;  %v6272_v18 = vld [vmem:[#allocation9 + $0x178] sm:$0xff] }
 0x3c6   : > { %4044 = vmatmul.bf16.gmra.mxu0 %v8152_v25  ;;  %v3261_v7 = vsel %vm7111_vm2, %v3006_v56, %v3165_v54 }
 0x3c7   : > { %v3172_v22 = vor.u32 %v3170_v5, %v3169_v58  ;;  %v6566_v5 = vunpack.c.l.b16 %v8168_v0  ;;  %4772 = vmatpush.bf16.msra.mxu0 %v6272_v18  ;;  %v6270_v18 = vld [vmem:[#allocation9 + $0x168] sm:$0xff] }
 0x3cb   : > { %3556 = vmatmul.bf16.gmra.mxu1 %v8237_v42  ;;  %3847 = vmatmul.bf16.gmra.mxu3 %v3259_v3 }
 0x3cd   : > { %3688 = vmatmul.bf16.gmra.mxu2 %v8204_v43  ;;  %v3304_v43 = vrot.slane %v9388_v12, 1 }
 0x3cf   : > { %v8355_v50 = vor.u32 %v3304_v43, %v9389_v2  ;;  %v6245_v43 = vld [vmem:[#allocation9 + $0x120] sm:$0xff] }
 0x3d0   : > { %4216 = vmatpush.bf16.msrb.mxu1 %v6245_v43  ;;  %v2975_v43 = vpack.c.b16 %v6562_v20, %v6562_v20 }
 0x3d1   : > { %9485 = vst [vmem:[#allocation14_spill] sm:$0xff] %v8355_v50 }
 0x3d2   : > { %v3012_v17 = vshrl.u32 %v2975_v43, 16 }
 0x3d4   : > { %4217 = vmatpush.bf16.msrb.mxu1 %v6244_v60 }
 0x3d6   : > { %4049 = vmatmul.bf16.gmra.mxu0 %v8154_v24 }
 0x3db   : > { %3561 = vmatmul.bf16.gmra.mxu1 %v3259_v3  ;;  %3852 = vmatmul.bf16.gmra.mxu3 %v3260_v29 }
 0x3dd   : > { %3693 = vmatmul.bf16.gmra.mxu2 %v8218_v47  ;;  %v2974_v47 = vpack.c.b16 %v6558_v62, %v6558_v62 }
 0x3df   : > { %v3009_v39 = vshrl.u32 %v2974_v47, 16 }
 0x3e1   : > { %v3262_v45 = vsel %vm7111_vm2, %v3009_v39, %v3172_v22  ;;  %v3190_v39 = vrot.slane %v3188_v30, 7  ;;  %v6243_v22 = vld [vmem:[#allocation9 + $0x110] sm:$0xff] }
 0x3e2   : > { %4218 = vmatpush.bf16.msrb.mxu1 %v6243_v22 }
 0x3e3   : > { %v3193_v43 = vor.u32 %v3191_v38, %v3190_v39  ;;  %v9488_v39 = vshll.u32 %v8173_v19, 16 }
 0x3e6   : > { %4054 = vmatmul.bf16.gmra.mxu0 %v8156_v1 }
 0x3eb   : > { %3566 = vmatmul.bf16.gmra.mxu1 %v3260_v29  ;;  %3857 = vmatmul.bf16.gmra.mxu3 %v3261_v7 }
 0x3ed   : > { %3698 = vmatmul.bf16.gmra.mxu2 %v8237_v42  ;;  %v3176_v42 = vrot.slane %v3174_v41, 7  ;;  %v3183_v41 = vrot.slane %v3181_v46, 7 }
 0x3ef   : > { %v3179_v56 = vor.u32 %v3177_v4, %v3176_v42  ;;  %v3186_v62 = vor.u32 %v3184_v23, %v3183_v41 }
 0x3f6   : > { %4059 = vmatmul.bf16.gmra.mxu0 %v8158_v16  ;;  %v3263_v16 = vsel %vm7111_vm2, %v3012_v17, %v3179_v56  ;;  %v6574_v17 = vunpack.c.l.b16 %v8173_v19 }
 0x3f8   : > { %v2978_v38 = vpack.c.b16 %v6574_v17, %v6574_v17 }
 0x3fb   : > { %3571 = vmatmul.bf16.gmra.mxu1 %v3261_v7  ;;  %3862 = vmatmul.bf16.gmra.mxu3 %v3262_v45 }
 0x3fd   : > { %3703 = vmatmul.bf16.gmra.mxu2 %v3259_v3  ;;  %v2976_v3 = vpack.c.b16 %v6566_v5, %v6566_v5 }
 0x3ff   : > { %v3015_v54 = vshrl.u32 %v2976_v3, 16  ;;  %v9487_v3 = vshrl.u32 %v8173_v19, 16 }
 0x401   : > { %v3197_v41 = vrot.slane %v9487_v3, 7 }
 0x403   : > { %v3200_v22 = vor.u32 %v9488_v39, %v3197_v41  ;;  %v9489_v39 = vshrl.u32 %v8175_v37, 16 }
 0x405   : > { %v3204_v11 = vrot.slane %v9489_v39, 7  ;;  %v9491_v39 = vshrl.u32 %v8177_v35, 16 }
 0x406   : > { %4064 = vmatmul.bf16.gmra.mxu0 %v8160_v40  ;;  %v8402_v40 = vsel %vm7111_vm2, %v3015_v54, %v3186_v62 }
 0x40b   : > { %3576 = vmatmul.bf16.gmra.mxu1 %v3262_v45  ;;  %3867 = vmatmul.bf16.gmra.mxu3 %v3263_v16 }
 0x40d   : > { %3708 = vmatmul.bf16.gmra.mxu2 %v3260_v29  ;;  %v6570_v29 = vunpack.c.l.b16 %v8170_v8 }
 0x40f   : > { %v2977_v46 = vpack.c.b16 %v6570_v29, %v6570_v29 }
 0x416   : > { %4069 = vmatmul.bf16.gmra.mxu0 %v8162_v57  ;;  %v3018_v57 = vshrl.u32 %v2977_v46, 16  ;;  %v3021_v46 = vshrl.u32 %v2978_v38, 16  ;;  %v6578_v38 = vunpack.c.l.b16 %v8175_v37 }
 0x418   : > { %v3542_v4 = vpop.f32.mrf.mxu1 }
 0x41b   : > { %3581 = vmatmul.bf16.gmra.mxu1 %v3263_v16  ;;  %3872 = vmatmul.bf16.gmra.mxu3 %v8402_v40 }
 0x41d   : > { %3713 = vmatmul.bf16.gmra.mxu2 %v3261_v7  ;;  %v8414_v7 = vsel %vm7111_vm2, %v3018_v57, %v3193_v43 }
 0x41e   : > { %v3833_v47 = vpop.f32.mrf.mxu3 }
 0x420   : > { %v3544_v58 = vpop.f32.mrf.mxu1 }
 0x423   : > { %v4035_v23 = vpop.f32.mrf.mxu0 }
 0x426   : > { %v3835_v20 = vpop.f32.mrf.mxu3  ;;  %4074 = vmatmul.bf16.gmra.mxu0 %v8164_v63 }
 0x428   : > { %v3547_v42 = vpop.f32.mrf.mxu1 }
 0x42b   : > { %3586 = vmatmul.bf16.gmra.mxu1 %v8402_v40  ;;  %3877 = vmatmul.bf16.gmra.mxu3 %v8414_v7  ;;  %v4037_v30 = vpop.f32.mrf.mxu0 }
 0x42d   : > { %3718 = vmatmul.bf16.gmra.mxu2 %v3262_v45  ;;  %v8426_v45 = vsel %vm7111_vm2, %v3021_v46, %v3200_v22 }
 0x42e   : > { %v3838_v60 = vpop.f32.mrf.mxu3 }
 0x430   : > { %v3549_v56 = vpop.f32.mrf.mxu1  ;;  %v3679_v5 = vpop.f32.mrf.mxu2 }
 0x431   : > { %v3680_v63 = vadd.f32 %v3679_v5, %v3542_v4 }
 0x433   : > { %v3913_v54 = vadd.f32 %v3833_v47, %v3680_v63  ;;  %v4040_v62 = vpop.f32.mrf.mxu0  ;;  %v2979_v63 = vpack.c.b16 %v6578_v38, %v6578_v38 }
 0x435   : > { %v8430_v41 = vadd.f32 %v4035_v23, %v3913_v54  ;;  %v3024_v2 = vshrl.u32 %v2979_v63, 16 }
 0x436   : > { %v3840_v29 = vpop.f32.mrf.mxu3  ;;  %4079 = vmatmul.bf16.gmra.mxu0 %v8166_v13 }
 0x438   : > { %v3552_v57 = vpop.f32.mrf.mxu1  ;;  %v3681_v43 = vpop.f32.mrf.mxu2 }
 0x439   : > { %v3682_v17 = vadd.f32 %v3681_v43, %v3544_v58  ;;  %v6242_v58 = vld [vmem:[#allocation9 + $0x108] sm:$0xff] }
 0x43a   : > { %4219 = vmatpush.bf16.msrb.mxu1 %v6242_v58  ;;  %v3211_v58 = vrot.slane %v9491_v39, 7 }
 0x43b   : > { %3591 = vmatmul.bf16.gmra.mxu1 %v8414_v7  ;;  %3882 = vmatmul.bf16.gmra.mxu3 %v8426_v45  ;;  %v3914_v4 = vadd.f32 %v3835_v20, %v3682_v17  ;;  %v4042_v47 = vpop.f32.mrf.mxu0  ;;  %v9490_v20 = vshll.u32 %v8175_v37, 16 }
 0x43d   : > { %3723 = vmatmul.bf16.gmra.mxu2 %v3263_v16  ;;  %v3207_v17 = vor.u32 %v9490_v20, %v3204_v11  ;;  %v6582_v11 = vunpack.c.l.b16 %v8177_v35 }
 0x43e   : > { %v3843_v5 = vpop.f32.mrf.mxu3 }
 0x43f   : > { %v8440_v23 = vsel %vm7111_vm2, %v3024_v2, %v3207_v17  ;;  %v2980_v63 = vpack.c.b16 %v6582_v11, %v6582_v11 }
 0x440   : > { %v3554_v3 = vpop.f32.mrf.mxu1  ;;  %v3684_v13 = vpop.f32.mrf.mxu2 }
 0x441   : > { %v3685_v12 = vadd.f32 %v3684_v13, %v3547_v42 }
 0x443   : > { %v3915_v46 = vadd.f32 %v3838_v60, %v3685_v12  ;;  %v4045_v22 = vpop.f32.mrf.mxu0  ;;  %v8443_v12 = vadd.f32 %v4037_v30, %v3914_v4  ;;  %v9492_v4 = vshll.u32 %v8177_v35, 16 }
 0x445   : > { %v8449_v20 = vadd.f32 %v4040_v62, %v3915_v46 }
 0x446   : > { %v3845_v43 = vpop.f32.mrf.mxu3  ;;  %4084 = vmatmul.bf16.gmra.mxu0 %v8168_v0 }
 0x448   : > { %v3557_v55 = vpop.f32.mrf.mxu1  ;;  %v3686_v16 = vpop.f32.mrf.mxu2 }
 0x449   : > { %v3687_v42 = vadd.f32 %v3686_v16, %v3549_v56  ;;  %v3214_v16 = vor.u32 %v9492_v4, %v3211_v58 }
 0x44b   : > { %3596 = vmatmul.bf16.gmra.mxu1 %v8426_v45  ;;  %3887 = vmatmul.bf16.gmra.mxu3 %v8440_v23  ;;  %v3916_v60 = vadd.f32 %v3840_v29, %v3687_v42  ;;  %v4047_v54 = vpop.f32.mrf.mxu0  ;;  %v3027_v29 = vshrl.u32 %v2980_v63, 16  ;;  %v6586_v63 = vunpack.c.l.b16 %v8179_v6 }
 0x44d   : > { %3728 = vmatmul.bf16.gmra.mxu2 %v8402_v40  ;;  %v8459_v11 = vsel %vm7111_vm2, %v3027_v29, %v3214_v16  ;;  %v2981_v58 = vpack.c.b16 %v6586_v63, %v6586_v63  ;;  %v6264_v63 = vld [vmem:[#allocation9 + $0xb8] sm:$0xff] }
 0x44e   : > { %v3848_v38 = vpop.f32.mrf.mxu3  ;;  %4586 = vmatpush.bf16.msra.mxu3 %v6264_v63 }
 0x450   : > { %v3559_v0 = vpop.f32.mrf.mxu1  ;;  %v3689_v13 = vpop.f32.mrf.mxu2 }
 0x451   : > { %v3690_v2 = vadd.f32 %v3689_v13, %v3552_v57  ;;  %v8462_v57 = vadd.f32 %v4042_v47, %v3916_v60 }
 0x453   : > { %v3917_v56 = vadd.f32 %v3843_v5, %v3690_v2  ;;  %v8451_v17 = vpop.f32.mrf.mxu0  ;;  %v9493_v2 = vshrl.u32 %v8179_v6, 16 }
 0x455   : > { %v3218_v29 = vrot.slane %v9493_v2, 7  ;;  %v8472_v4 = vadd.f32 %v4045_v22, %v3917_v56 }
 0x456   : > { %v3850_v30 = vpop.f32.mrf.mxu3  ;;  %4089 = vmatmul.bf16.gmra.mxu0 %v8170_v8 }
 0x458   : > { %v3562_v42 = vpop.f32.mrf.mxu1  ;;  %v3691_v40 = vpop.f32.mrf.mxu2 }
 0x459   : > { %v3692_v62 = vadd.f32 %v3691_v40, %v3554_v3  ;;  %v3030_v40 = vshrl.u32 %v2981_v58, 16  ;;  %v6271_v58 = vld [vmem:[#allocation9 + $0x170] sm:$0xff] }
 0x45a   : > { %4773 = vmatpush.bf16.msra.mxu0 %v6271_v58  ;;  %v9496_v58 = vshll.u32 %v8309_v61, 16 }
 0x45b   : > { %3601 = vmatmul.bf16.gmra.mxu1 %v8440_v23  ;;  %3892 = vmatmul.bf16.gmra.mxu3 %v8459_v11  ;;  %v3918_v5 = vadd.f32 %v3845_v43, %v3692_v62  ;;  %v8464_v46 = vpop.f32.mrf.mxu0  ;;  %v6241_v43 = vld [vmem:[#allocation9 + $0x100] sm:$0xff]  ;;  %v9494_v62 = vshll.u32 %v8179_v6, 16 }
 0x45c   : > { %4220 = vmatpush.bf16.msrb.mxu1 %v6241_v43  ;;  %v6262_v43 = vld [vmem:[#allocation9 + $0xa8] sm:$0xff] }
 0x45d   : > { %3733 = vmatmul.bf16.gmra.mxu2 %v8414_v7  ;;  %v3221_v50 = vor.u32 %v9494_v62, %v3218_v29  ;;  %v6590_v29 = vunpack.c.l.b16 %v8309_v61  ;;  %v9495_v62 = vshrl.u32 %v8309_v61, 16 }
 0x45e   : > { %v3853_v13 = vpop.f32.mrf.mxu3  ;;  %4774 = vmatpush.bf16.msra.mxu0 %v6270_v18 }
 0x45f   : > { %v3225_v63 = vrot.slane %v9495_v62, 7  ;;  %v6267_v62 = vld [vmem:[#allocation9 + $0x150] sm:$0xff] }
 0x460   : > { %v8468_v8 = vpop.f32.mrf.mxu1  ;;  %v3694_v39 = vpop.f32.mrf.mxu2 }
 0x461   : > { %v3695_v3 = vadd.f32 %v3694_v39, %v3557_v55  ;;  %v8484_v55 = vsel %vm7111_vm2, %v3030_v40, %v3221_v50  ;;  %v6263_v39 = vld [vmem:[#allocation9 + $0xb0] sm:$0xff]  ;;  %v2982_v40 = vpack.c.b16 %v6590_v29, %v6590_v29 }
 0x462   : > { %4587 = vmatpush.bf16.msra.mxu3 %v6263_v39  ;;  %4775 = vmatpush.bf16.msra.mxu0 %v6269_v21 }
 0x463   : > { %v3919_v47 = vadd.f32 %v3848_v38, %v3695_v3  ;;  %v8474_v60 = vpop.f32.mrf.mxu0  ;;  %v8492_v3 = vadd.f32 %v4047_v54, %v3918_v5  ;;  %v3033_v59 = vshrl.u32 %v2982_v40, 16  ;;  %v6259_v40 = vld [vmem:[#allocation9 + $0x90] sm:$0xff] }
 0x465   : > { %v8506_v29 = vadd.f32 %v8451_v17, %v3919_v47 }
 0x466   : > { %v3855_v16 = vpop.f32.mrf.mxu3  ;;  %4094 = vmatmul.bf16.gmra.mxu0 %v8173_v19  ;;  %4588 = vmatpush.bf16.msra.mxu3 %v6262_v43  ;;  %v6268_v43 = vld [vmem:[#allocation9 + $0x158] sm:$0xff] }
 0x467   : > { %4776 = vmatpush.bf16.msra.mxu0 %v6268_v43 }
 0x468   : > { %v8478_v7 = vpop.f32.mrf.mxu1  ;;  %v3696_v2 = vpop.f32.mrf.mxu2 }
 0x469   : > { %v3697_v22 = vadd.f32 %v3696_v2, %v3559_v0  ;;  %v6256_v0 = vld [vmem:[#allocation9 + $0x1f8] sm:$0xff] }
 0x46a   : > { %4400 = vmatpush.bf16.msra.mxu2 %v6256_v0  ;;  %v3228_v0 = vor.u32 %v9496_v58, %v3225_v63  ;;  %v6594_v63 = vunpack.c.l.b16 %v8319_v36 }
 0x46b   : > { %3606 = vmatmul.bf16.gmra.mxu1 %v8459_v11  ;;  %3897 = vmatmul.bf16.gmra.mxu3 %v8484_v55  ;;  %v3920_v38 = vadd.f32 %v3850_v30, %v3697_v22  ;;  %v8487_v56 = vpop.f32.mrf.mxu0  ;;  %v6261_v22 = vld [vmem:[#allocation9 + $0xa0] sm:$0xff] }
 0x46c   : > { %4589 = vmatpush.bf16.msra.mxu3 %v6261_v22  ;;  %v3270_v61 = vsel %vm7111_vm2, %v3033_v59, %v3228_v0  ;;  %v6252_v59 = vld [vmem:[#allocation9 + $0x1d8] sm:$0xff]  ;;  %4777 = vmatpush.bf16.msra.mxu0 %v6267_v62  ;;  %v2983_v58 = vpack.c.b16 %v6594_v63, %v6594_v63  ;;  %v9498_v0 = vshrl.u32 %v8319_v36, 16 }
 0x46d   : > { %3738 = vmatmul.bf16.gmra.mxu2 %v8426_v45  ;;  %v6255_v45 = vld [vmem:[#allocation9 + $0x1f0] sm:$0xff] }
 0x46e   : > { %v8489_v19 = vpop.f32.mrf.mxu3  ;;  %4401 = vmatpush.bf16.msra.mxu2 %v6255_v45  ;;  %v8520_v45 = vadd.f32 %v8464_v46, %v3920_v38  ;;  %v6265_v46 = vld [vmem:[#allocation9 + $0x140] sm:$0xff] }
 0x470   : > { %v8495_v50 = vpop.f32.mrf.mxu1  ;;  %v3699_v30 = vpop.f32.mrf.mxu2  ;;  %9497 = vst [vmem:[#allocation18_spill] sm:$0xff] %v8520_v45  ;;  %v6280_v45 = vld [vmem:[#allocation9 + $0x238] sm:$0xff] }
 0x471   : > { %v3700_v2 = vadd.f32 %v3699_v30, %v3562_v42  ;;  %v6254_v42 = vld [vmem:[#allocation9 + $0x1e8] sm:$0xff]  ;;  %4958 = vmatpush.bf16.msra.mxu1 %v6280_v45 }
 0x472   : > { %4402 = vmatpush.bf16.msra.mxu2 %v6254_v42  ;;  %v3232_v42 = vrot.slane %v9498_v0, 7 }
 0x473   : > { %v3921_v54 = vadd.f32 %v3853_v13, %v3700_v2  ;;  %v8499_v5 = vpop.f32.mrf.mxu0  ;;  %v6260_v13 = vld [vmem:[#allocation9 + $0x98] sm:$0xff] }
 0x474   : > { %4590 = vmatpush.bf16.msra.mxu3 %v6260_v13 }
 0x476   : > { %v8501_v39 = vpop.f32.mrf.mxu3  ;;  %4099 = vmatmul.bf16.gmra.mxu0 %v8175_v37  ;;  %v6253_v37 = vld [vmem:[#allocation9 + $0x1e0] sm:$0xff] }
 0x477   : > { %4403 = vmatpush.bf16.msra.mxu2 %v6253_v37  ;;  %v3036_v37 = vshrl.u32 %v2983_v58, 16 }
 0x478   : > { %v8508_v14 = vpop.f32.mrf.mxu1  ;;  %v3701_v18 = vpop.f32.mrf.mxu2  ;;  %4591 = vmatpush.bf16.msra.mxu3 %v6259_v40  ;;  %v9499_v40 = vshll.u32 %v8319_v36, 16 }
 0x479   : > { %v3702_v30 = vadd.f32 %v3701_v18, %v8468_v8  ;;  %v6258_v8 = vld [vmem:[#allocation9 + $0x88] sm:$0xff]  ;;  %v6251_v18 = vld [vmem:[#allocation9 + $0x1d0] sm:$0xff] }
 0x47a   : > { %v3235_v62 = vor.u32 %v9499_v40, %v3232_v42 }
 0x47b   : > { %3611 = vmatmul.bf16.gmra.mxu1 %v8484_v55  ;;  %3902 = vmatmul.bf16.gmra.mxu3 %v3270_v61  ;;  %v3922_v17 = vadd.f32 %v3855_v16, %v3702_v30  ;;  %v8515_v47 = vpop.f32.mrf.mxu0  ;;  %v6266_v16 = vld [vmem:[#allocation9 + $0x148] sm:$0xff]  ;;  %v6257_v30 = vld [vmem:[#allocation9 + $0x80] sm:$0xff] }
 0x47c   : > { %4404 = vmatpush.bf16.msra.mxu2 %v6252_v59  ;;  %4592 = vmatpush.bf16.msra.mxu3 %v6258_v8  ;;  %v8532_v59 = vadd.f32 %v8474_v60, %v3921_v54  ;;  %v3271_v8 = vsel %vm7111_vm2, %v3036_v37, %v3235_v62  ;;  %v6279_v62 = vld [vmem:[#allocation9 + $0x230] sm:$0xff] }
 0x47d   : > { %3743 = vmatmul.bf16.gmra.mxu2 %v8440_v23  ;;  %4778 = vmatpush.bf16.msra.mxu0 %v6266_v16 }
 0x47e   : > { %v3863_v21 = vpop.f32.mrf.mxu3  ;;  %4959 = vmatpush.bf16.msra.mxu1 %v6279_v62 }
 0x480   : > { %v3574_v2 = vpop.f32.mrf.mxu1  ;;  %v3704_v22 = vpop.f32.mrf.mxu2  ;;  %4405 = vmatpush.bf16.msra.mxu2 %v6251_v18  ;;  %4593 = vmatpush.bf16.msra.mxu3 %v6257_v30 }
 0x481   : > { %v3705_v13 = vadd.f32 %v3704_v22, %v8478_v7  ;;  %v6250_v7 = vld [vmem:[#allocation9 + $0x1c8] sm:$0xff]  ;;  %4779 = vmatpush.bf16.msra.mxu0 %v6265_v46  ;;  %v6249_v22 = vld [vmem:[#allocation9 + $0x1c0] sm:$0xff] }
 0x483   : > { %v3923_v23 = vadd.f32 %v8489_v19, %v3705_v13  ;;  %v8526_v43 = vpop.f32.mrf.mxu0  ;;  %v6531_v13 = vunpack.c.h.b16 %v8150_v27 }
 0x484   : > { %4406 = vmatpush.bf16.msra.mxu2 %v6250_v7 }
 0x486   : > { %v3865_v38 = vpop.f32.mrf.mxu3  ;;  %4104 = vmatmul.bf16.gmra.mxu0 %v8177_v35 }
 0x488   : > { %v3577_v63 = vpop.f32.mrf.mxu1  ;;  %v3706_v19 = vpop.f32.mrf.mxu2  ;;  %4407 = vmatpush.bf16.msra.mxu2 %v6249_v22 }
 0x489   : > { %v3707_v16 = vadd.f32 %v3706_v19, %v8495_v50 }
 0x48b   : > { %3616 = vmatmul.bf16.gmra.mxu1 %v3270_v61  ;;  %3907 = vmatmul.bf16.gmra.mxu3 %v3271_v8  ;;  %v3924_v36 = vadd.f32 %v8501_v39, %v3707_v16  ;;  %v4067_v35 = vpop.f32.mrf.mxu0  ;;  %v8540_v61 = vadd.f32 %v8487_v56, %v3922_v17  ;;  %v3327_v56 = vpack.c.b16 %v6531_v13, %v6531_v13 }
 0x48d   : > { %3748 = vmatmul.bf16.gmra.mxu2 %v8459_v11  ;;  %v8547_v11 = vadd.f32 %v8499_v5, %v3923_v23  ;;  %v8556_v5 = vadd.f32 %v8515_v47, %v3924_v36 }
 0x48e   : > { %v3868_v58 = vpop.f32.mrf.mxu3 }
 0x490   : > { %v3579_v60 = vpop.f32.mrf.mxu1  ;;  %v3709_v54 = vpop.f32.mrf.mxu2 }
 0x491   : > { %v3710_v31 = vadd.f32 %v3709_v54, %v8508_v14  ;;  %v9500_v14 = vsel %vm7534_vm5, %v8226_v53, %v8240_v52 }
 0x493   : > { %v3925_v0 = vadd.f32 %v3863_v21, %v3710_v31  ;;  %v4070_v50 = vpop.f32.mrf.mxu0 }
 0x495   : > { %v8566_v19 = vadd.f32 %v8526_v43, %v3925_v0 }
 0x496   : > { %v3870_v42 = vpop.f32.mrf.mxu3  ;;  %4109 = vmatmul.bf16.gmra.mxu0 %v8179_v6  ;;  %v3349_v6 = vshll.u32 %v3327_v56, 16 }
 0x498   : > { %v3582_v45 = vpop.f32.mrf.mxu1  ;;  %v3711_v39 = vpop.f32.mrf.mxu2  ;;  %v3351_v40 = vrot.slane %v3349_v6, 4 }
 0x499   : > { %v3712_v18 = vadd.f32 %v3711_v39, %v3574_v2 }
 0x49a   : > { %v3435_v52 = vsel %vm7534_vm5, %v8231_v44, %v3351_v40 }
 0x49b   : > { %4221 = vmatmul.bf16.vlgmr.msrb.gmra.mxu1 %v8150_v27  ;;  %4594 = vmatmul.bf16.vlgmr.msra.gmra.mxu3 %v9500_v14  ;;  %v3926_v17 = vadd.f32 %v3865_v38, %v3712_v18  ;;  %v4072_v21 = vpop.f32.mrf.mxu0 }
 0x49d   : > { %3753 = vmatmul.bf16.gmra.mxu2 %v8484_v55  ;;  %v6535_v55 = vunpack.c.h.b16 %v8152_v25  ;;  %v8571_v18 = vadd.f32 %v4067_v35, %v3926_v17 }
 0x49e   : > { %v3873_v30 = vpop.f32.mrf.mxu3 }
 0x49f   : > { %v3328_v47 = vpack.c.b16 %v6535_v55, %v6535_v55  ;;  %v6278_v55 = vld [vmem:[#allocation9 + $0x228] sm:$0xff] }
 0x4a0   : > { %v3584_v46 = vpop.f32.mrf.mxu1  ;;  %v3714_v37 = vpop.f32.mrf.mxu2  ;;  %4960 = vmatpush.bf16.msra.mxu1 %v6278_v55 }
 0x4a1   : > { %v3715_v27 = vadd.f32 %v3714_v37, %v3577_v63  ;;  %v3353_v44 = vshll.u32 %v3328_v47, 16 }
 0x4a3   : > { %v3927_v2 = vadd.f32 %v3868_v58, %v3715_v27  ;;  %v8558_v23 = vpop.f32.mrf.mxu0  ;;  %v3355_v31 = vrot.slane %v3353_v44, 4 }
 0x4a5   : > { %v8576_v43 = vsel %vm7534_vm5, %v8244_v33, %v3355_v31  ;;  %v8582_v17 = vadd.f32 %v4070_v50, %v3927_v2 }
 0x4a6   : > { %v3875_v53 = vpop.f32.mrf.mxu3  ;;  %4780 = vmatmul.bf16.vlgmr.msra.gmra.mxu0 %v3435_v52 }
 0x4a8   : > { %v3587_v38 = vpop.f32.mrf.mxu1  ;;  %v3716_v7 = vpop.f32.mrf.mxu2 }
 0x4a9   : > { %v3717_v63 = vadd.f32 %v3716_v7, %v3579_v60 }
 0x4ab   : > { %4226 = vmatmul.bf16.gmra.mxu1 %v8152_v25  ;;  %4599 = vmatmul.bf16.gmra.mxu3 %v3435_v52  ;;  %v3928_v8 = vadd.f32 %v3870_v42, %v3717_v63  ;;  %v4077_v16 = vpop.f32.mrf.mxu0  ;;  %v6539_v42 = vunpack.c.h.b16 %v8154_v24 }
 0x4ad   : > { %4408 = vmatmul.bf16.vlgmr.msra.gmra.mxu2 %v8152_v25  ;;  %v3329_v14 = vpack.c.b16 %v6539_v42, %v6539_v42 }
 0x4ae   : > { %v3878_v36 = vpop.f32.mrf.mxu3 }
 0x4af   : > { %v3357_v33 = vshll.u32 %v3329_v14, 16 }
 0x4b0   : > { %v3589_v22 = vpop.f32.mrf.mxu1  ;;  %v3719_v58 = vpop.f32.mrf.mxu2 }
 0x4b1   : > { %v3720_v54 = vadd.f32 %v3719_v58, %v3582_v45  ;;  %v3359_v40 = vrot.slane %v3357_v33, 4 }
 0x4b3   : > { %v3929_v13 = vadd.f32 %v3873_v30, %v3720_v54  ;;  %v8569_v39 = vpop.f32.mrf.mxu0  ;;  %v8592_v50 = vsel %vm7534_vm5, %v8246_v26, %v3359_v40 }
 0x4b6   : > { %v3880_v60 = vpop.f32.mrf.mxu3  ;;  %4785 = vmatmul.bf16.gmra.mxu0 %v8576_v43 }
 0x4b8   : > { %v3592_v0 = vpop.f32.mrf.mxu1  ;;  %v3721_v25 = vpop.f32.mrf.mxu2 }
 0x4b9   : > { %v3722_v45 = vadd.f32 %v3721_v25, %v3584_v46  ;;  %v8587_v46 = vadd.f32 %v4072_v21, %v3928_v8  ;;  %v8599_v8 = vadd.f32 %v8558_v23, %v3929_v13  ;;  %v6755_v13 = vld [vmem:[#allocation2 + $0x28] sm:$0xff] }
 0x4ba   : > { %v6547_v14 = vunpack.c.h.b16 %v6755_v13 }
 0x4bb   : > { %4231 = vmatmul.bf16.gmra.mxu1 %v8154_v24  ;;  %4604 = vmatmul.bf16.gmra.mxu3 %v8576_v43  ;;  %v3930_v35 = vadd.f32 %v3875_v53, %v3722_v45  ;;  %v4082_v56 = vpop.f32.mrf.mxu0 }
 0x4bd   : > { %4413 = vmatmul.bf16.gmra.mxu2 %v8154_v24  ;;  %v6543_v24 = vunpack.c.h.b16 %v8156_v1 }
 0x4be   : > { %v3883_v30 = vpop.f32.mrf.mxu3 }
 0x4bf   : > { %v3330_v21 = vpack.c.b16 %v6543_v24, %v6543_v24 }
 0x4c0   : > { %v3594_v6 = vpop.f32.mrf.mxu1  ;;  %v3724_v37 = vpop.f32.mrf.mxu2 }
 0x4c1   : > { %v3725_v27 = vadd.f32 %v3724_v37, %v3587_v38 }
 0x4c3   : > { %v3931_v62 = vadd.f32 %v3878_v36, %v3725_v27  ;;  %v8585_v52 = vpop.f32.mrf.mxu0  ;;  %v3361_v36 = vshll.u32 %v3330_v21, 16  ;;  %v6277_v21 = vld [vmem:[#allocation9 + $0x220] sm:$0xff] }
 0x4c4   : > { %4961 = vmatpush.bf16.msra.mxu1 %v6277_v21 }
 0x4c5   : > { %v3363_v31 = vrot.slane %v3361_v36, 4 }
 0x4c6   : > { %v3885_v7 = vpop.f32.mrf.mxu3  ;;  %4790 = vmatmul.bf16.gmra.mxu0 %v8592_v50 }
 0x4c8   : > { %v3597_v2 = vpop.f32.mrf.mxu1  ;;  %v3726_v53 = vpop.f32.mrf.mxu2 }
 0x4c9   : > { %v3727_v38 = vadd.f32 %v3726_v53, %v3589_v22  ;;  %v8604_v22 = vadd.f32 %v4077_v16, %v3930_v35  ;;  %v8614_v35 = vadd.f32 %v8569_v39, %v3931_v62  ;;  %v6756_v62 = vld [vmem:[#allocation2 + $0x30] sm:$0xff] }
 0x4cb   : > { %4236 = vmatmul.bf16.gmra.mxu1 %v8156_v1  ;;  %4609 = vmatmul.bf16.gmra.mxu3 %v8592_v50  ;;  %v3932_v63 = vadd.f32 %v3880_v60, %v3727_v38  ;;  %v4087_v47 = vpop.f32.mrf.mxu0  ;;  %v8609_v60 = vsel %vm7534_vm5, %v8256_v32, %v3363_v31 }
 0x4cd   : > { %4418 = vmatmul.bf16.gmra.mxu2 %v8156_v1 }
 0x4ce   : > { %v3888_v26 = vpop.f32.mrf.mxu3 }
 0x4d0   : > { %v3599_v44 = vpop.f32.mrf.mxu1  ;;  %v3729_v58 = vpop.f32.mrf.mxu2 }
 0x4d1   : > { %v3730_v54 = vadd.f32 %v3729_v58, %v3592_v0  ;;  %v6551_v58 = vunpack.c.h.b16 %v6756_v62 }
 0x4d3   : > { %v3933_v42 = vadd.f32 %v3883_v30, %v3730_v54  ;;  %v8602_v25 = vpop.f32.mrf.mxu0  ;;  %v3331_v30 = vpack.c.b16 %v6547_v14, %v6547_v14  ;;  %v3332_v54 = vpack.c.b16 %v6551_v58, %v6551_v58 }
 0x4d5   : > { %v3365_v32 = vshll.u32 %v3331_v30, 16  ;;  %v8628_v31 = vadd.f32 %v8585_v52, %v3933_v42  ;;  %v6757_v42 = vld [vmem:[#allocation2 + $0x38] sm:$0xff] }
 0x4d6   : > { %v3890_v45 = vpop.f32.mrf.mxu3  ;;  %4795 = vmatmul.bf16.gmra.mxu0 %v8609_v60 }
 0x4d7   : > { %v3367_v24 = vrot.slane %v3365_v32, 4 }
 0x4d8   : > { %v3602_v23 = vpop.f32.mrf.mxu1  ;;  %v3731_v1 = vpop.f32.mrf.mxu2 }
 0x4d9   : > { %v3732_v0 = vadd.f32 %v3731_v1, %v3594_v6  ;;  %v8618_v6 = vadd.f32 %v4082_v56, %v3932_v63 }
 0x4db   : > { %4241 = vmatmul.bf16.gmra.mxu1 %v6755_v13  ;;  %4614 = vmatmul.bf16.gmra.mxu3 %v8609_v60  ;;  %v3934_v33 = vadd.f32 %v3885_v7, %v3732_v0  ;;  %v4092_v16 = vpop.f32.mrf.mxu0  ;;  %v8623_v7 = vsel %vm7534_vm5, %v8260_v28, %v3367_v24  ;;  %v3369_v28 = vshll.u32 %v3332_v54, 16  ;;  %v6555_v24 = vunpack.c.h.b16 %v6757_v42 }
 0x4dd   : > { %4423 = vmatmul.bf16.gmra.mxu2 %v6755_v13  ;;  %v3371_v30 = vrot.slane %v3369_v28, 4 }
 0x4de   : > { %v3893_v37 = vpop.f32.mrf.mxu3 }
 0x4e0   : > { %v3604_v27 = vpop.f32.mrf.mxu1  ;;  %v3734_v40 = vpop.f32.mrf.mxu2 }
 0x4e1   : > { %v3735_v55 = vadd.f32 %v3734_v40, %v3597_v2 }
 0x4e3   : > { %v3935_v53 = vadd.f32 %v3888_v26, %v3735_v55  ;;  %v8616_v38 = vpop.f32.mrf.mxu0  ;;  %v8632_v55 = vadd.f32 %v4087_v47, %v3934_v33 }
 0x4e5   : > { %v8644_v33 = vadd.f32 %v8602_v25, %v3935_v53  ;;  %v6758_v53 = vld [vmem:[#allocation2 + $0x40] sm:$0xff] }
 0x4e6   : > { %v3895_v36 = vpop.f32.mrf.mxu3  ;;  %4800 = vmatmul.bf16.gmra.mxu0 %v8623_v7 }
 0x4e8   : > { %v3607_v39 = vpop.f32.mrf.mxu1  ;;  %v3736_v2 = vpop.f32.mrf.mxu2 }
 0x4e9   : > { %v3737_v26 = vadd.f32 %v3736_v2, %v3599_v44 }
 0x4eb   : > { %4246 = vmatmul.bf16.gmra.mxu1 %v6756_v62  ;;  %4619 = vmatmul.bf16.gmra.mxu3 %v8623_v7  ;;  %v3936_v56 = vadd.f32 %v3890_v45, %v3737_v26  ;;  %v4097_v63 = vpop.f32.mrf.mxu0  ;;  %v8637_v45 = vsel %vm7534_vm5, %v8269_v15, %v3371_v30 }
 0x4ec   : > { %9501 = vst [vmem:[#allocation19_spill] sm:$0xff] %v8637_v45 }
 0x4ed   : > { %4428 = vmatmul.bf16.gmra.mxu2 %v6756_v62  ;;  %v8648_v30 = vadd.f32 %v4092_v16, %v3936_v56 }
 0x4ee   : > { %v3898_v13 = vpop.f32.mrf.mxu3 }
 0x4f0   : > { %v3609_v14 = vpop.f32.mrf.mxu1  ;;  %v3739_v1 = vpop.f32.mrf.mxu2 }
 0x4f1   : > { %v3740_v0 = vadd.f32 %v3739_v1, %v3602_v23 }
 0x4f3   : > { %v3937_v32 = vadd.f32 %v3893_v37, %v3740_v0  ;;  %v8630_v40 = vpop.f32.mrf.mxu0  ;;  %v3333_v37 = vpack.c.b16 %v6555_v24, %v6555_v24 }
 0x4f5   : > { %v3373_v15 = vshll.u32 %v3333_v37, 16 }
 0x4f6   : > { %v3900_v44 = vpop.f32.mrf.mxu3  ;;  %4805 = vmatmul.bf16.gmra.mxu0 %v8637_v45 }
 0x4f7   : > { %v3375_v28 = vrot.slane %v3373_v15, 4 }
 0x4f8   : > { %v3612_v52 = vpop.f32.mrf.mxu1  ;;  %v3741_v21 = vpop.f32.mrf.mxu2 }
 0x4f9   : > { %v3742_v23 = vadd.f32 %v3741_v21, %v3604_v27  ;;  %v6276_v27 = vld [vmem:[#allocation9 + $0x218] sm:$0xff] }
 0x4fa   : > { %4962 = vmatpush.bf16.msra.mxu1 %v6276_v27 }
 0x4fb   : > { %4251 = vmatmul.bf16.gmra.mxu1 %v6757_v42  ;;  %4624 = vmatmul.bf16.gmra.mxu3 %v8637_v45  ;;  %v3938_v62 = vadd.f32 %v3895_v36, %v3742_v23  ;;  %v8641_v47 = vpop.f32.mrf.mxu0  ;;  %v8653_v36 = vsel %vm7534_vm5, %v8275_v9, %v3375_v28  ;;  %v8660_v23 = vadd.f32 %v8616_v38, %v3937_v32  ;;  %v6759_v32 = vld [vmem:[#allocation2 + $0x48] sm:$0xff] }
 0x4fc   : > { %9502 = vst [vmem:[#allocation20_spill] sm:$0xff] %v8653_v36 }
 0x4fd   : > { %4433 = vmatmul.bf16.gmra.mxu2 %v6757_v42  ;;  %v6559_v42 = vunpack.c.h.b16 %v6758_v53 }
 0x4fe   : > { %v3903_v58 = vpop.f32.mrf.mxu3 }
 0x4ff   : > { %v3334_v21 = vpack.c.b16 %v6559_v42, %v6559_v42  ;;  %v6563_v42 = vunpack.c.h.b16 %v6759_v32 }
 0x500   : > { %v3614_v2 = vpop.f32.mrf.mxu1  ;;  %v3744_v26 = vpop.f32.mrf.mxu2 }
 0x501   : > { %v3745_v54 = vadd.f32 %v3744_v26, %v3607_v39  ;;  %v3377_v37 = vshll.u32 %v3334_v21, 16 }
 0x503   : > { %v3939_v1 = vadd.f32 %v3898_v13, %v3745_v54  ;;  %v8646_v0 = vpop.f32.mrf.mxu0  ;;  %v3379_v28 = vrot.slane %v3377_v37, 4 }
 0x505   : > { %v8677_v21 = vadd.f32 %v8630_v40, %v3939_v1 }
 0x506   : > { %v3905_v24 = vpop.f32.mrf.mxu3  ;;  %4810 = vmatmul.bf16.gmra.mxu0 %v8653_v36 }
 0x508   : > { %v3617_v25 = vpop.f32.mrf.mxu1  ;;  %v3746_v39 = vpop.f32.mrf.mxu2 }
 0x509   : > { %v3747_v13 = vadd.f32 %v3746_v39, %v3609_v14  ;;  %v8664_v14 = vadd.f32 %v4097_v63, %v3938_v62  ;;  %v3335_v63 = vpack.c.b16 %v6563_v42, %v6563_v42 }
 0x50b   : > { %4256 = vmatmul.bf16.gmra.mxu1 %v6758_v53  ;;  %4629 = vmatmul.bf16.gmra.mxu3 %v8653_v36  ;;  %v3940_v16 = vadd.f32 %v3900_v44, %v3747_v13  ;;  %v8657_v56 = vpop.f32.mrf.mxu0  ;;  %v8669_v44 = vsel %vm7534_vm5, %v8285_v51, %v3379_v28  ;;  %v3381_v37 = vshll.u32 %v3335_v63, 16 }
 0x50d   : > { %4438 = vmatmul.bf16.gmra.mxu2 %v6758_v53 }
 0x50e   : > { %v3908_v9 = vpop.f32.mrf.mxu3 }
 0x510   : > { %v3619_v15 = vpop.f32.mrf.mxu1  ;;  %v3749_v26 = vpop.f32.mrf.mxu2 }
 0x511   : > { %v3750_v54 = vadd.f32 %v3749_v26, %v3612_v52 }
 0x513   : > { %v3941_v27 = vadd.f32 %v3903_v58, %v3750_v54  ;;  %v8662_v45 = vpop.f32.mrf.mxu0 }
 0x515   : > { %v8694_v63 = vadd.f32 %v8646_v0, %v3941_v27 }
 0x516   : > { %v3910_v39 = vpop.f32.mrf.mxu3  ;;  %4815 = vmatmul.bf16.gmra.mxu0 %v8669_v44 }
 0x518   : > { %v4222_v38 = vpop.f32.mrf.mxu1  ;;  %v3751_v52 = vpop.f32.mrf.mxu2 }
 0x519   : > { %v4302_v53 = vadd.f32 %v4222_v38, %v8430_v41  ;;  %v3752_v58 = vadd.f32 %v3751_v52, %v3614_v2  ;;  %v3383_v38 = vrot.slane %v3381_v37, 4  ;;  %v6275_v52 = vld [vmem:[#allocation9 + $0x210] sm:$0xff] }
 0x51a   : > { %4963 = vmatpush.bf16.msra.mxu1 %v6275_v52 }
 0x51b   : > { %4261 = vmatmul.bf16.gmra.mxu1 %v6759_v32  ;;  %4634 = vmatmul.bf16.gmra.mxu3 %v8669_v44  ;;  %v3942_v62 = vadd.f32 %v3905_v24, %v3752_v58  ;;  %v8674_v13 = vpop.f32.mrf.mxu0  ;;  %v8683_v24 = vadd.f32 %v8641_v47, %v3940_v16  ;;  %v8688_v40 = vsel %vm7534_vm5, %v8290_v34, %v3383_v38 }
 0x51c   : > { %9503 = vst [vmem:[#allocation21_spill] sm:$0xff] %v8688_v40 }
 0x51d   : > { %4443 = vmatmul.bf16.gmra.mxu2 %v6759_v32  ;;  %v6760_v32 = vld [vmem:[#allocation2 + $0x50] sm:$0xff] }
 0x51e   : > { %v4595_v51 = vpop.f32.mrf.mxu3  ;;  %v6567_v58 = vunpack.c.h.b16 %v6760_v32 }
 0x520   : > { %v4224_v26 = vpop.f32.mrf.mxu1  ;;  %v3754_v28 = vpop.f32.mrf.mxu2  ;;  %v3336_v47 = vpack.c.b16 %v6567_v58, %v6567_v58 }
 0x521   : > { %v4303_v54 = vadd.f32 %v4224_v26, %v8443_v12  ;;  %v3755_v41 = vadd.f32 %v3754_v28, %v3617_v25 }
 0x522   : > { %v3385_v26 = vshll.u32 %v3336_v47, 16 }
 0x523   : > { %v3943_v36 = vadd.f32 %v3908_v9, %v3755_v41  ;;  %v8680_v2 = vpop.f32.mrf.mxu0 }
 0x524   : > { %v3387_v52 = vrot.slane %v3385_v26, 4 }
 0x526   : > { %v4597_v42 = vpop.f32.mrf.mxu3  ;;  %4820 = vmatmul.bf16.gmra.mxu0 %v8688_v40  ;;  %v8705_v0 = vsel %vm7534_vm5, %v8304_v48, %v3387_v52 }
 0x528   : > { %v4227_v1 = vpop.f32.mrf.mxu1  ;;  %v3756_v25 = vpop.f32.mrf.mxu2 }
 0x529   : > { %v4304_v12 = vadd.f32 %v4227_v1, %v8449_v20  ;;  %v3757_v9 = vadd.f32 %v3756_v25, %v3619_v15  ;;  %v8700_v15 = vadd.f32 %v8657_v56, %v3942_v62 }
 0x52b   : > { %4266 = vmatmul.bf16.gmra.mxu1 %v6760_v32  ;;  %4639 = vmatmul.bf16.gmra.mxu3 %v8688_v40  ;;  %v3944_v16 = vadd.f32 %v3910_v39, %v3757_v9  ;;  %v8696_v34 = vpop.f32.mrf.mxu0  ;;  %v6761_v39 = vld [vmem:[#allocation2 + $0x58] sm:$0xff]  ;;  %v8711_v9 = vadd.f32 %v8662_v45, %v3943_v36 }
 0x52c   : > { %v6274_v40 = vld [vmem:[#allocation9 + $0x208] sm:$0xff] }
 0x52d   : > { %4448 = vmatmul.bf16.gmra.mxu2 %v6760_v32  ;;  %v6571_v32 = vunpack.c.h.b16 %v6761_v39  ;;  %4964 = vmatpush.bf16.msra.mxu1 %v6274_v40  ;;  %v9505_v40 = vld [vmem:[#allocation18_spill] sm:$0xff] }
 0x52e   : > { %v4600_v37 = vpop.f32.mrf.mxu3 }
 0x52f   : > { %v3337_v56 = vpack.c.b16 %v6571_v32, %v6571_v32 }
 0x530   : > { %v4229_v28 = vpop.f32.mrf.mxu1  ;;  %v4409_v38 = vpop.f32.mrf.mxu2 }
 0x531   : > { %v4305_v41 = vadd.f32 %v4229_v28, %v8462_v57  ;;  %v4489_v20 = vadd.f32 %v4409_v38, %v4302_v53  ;;  %v3389_v47 = vshll.u32 %v3337_v56, 16 }
 0x533   : > { %v4675_v1 = vadd.f32 %v4595_v51, %v4489_v20  ;;  %v4786_v25 = vpop.f32.mrf.mxu0 }
 0x536   : > { %v4602_v58 = vpop.f32.mrf.mxu3  ;;  %4825 = vmatmul.bf16.gmra.mxu0 %v8705_v0 }
 0x538   : > { %v4232_v27 = vpop.f32.mrf.mxu1  ;;  %v4411_v53 = vpop.f32.mrf.mxu2 }
 0x539   : > { %v4306_v57 = vadd.f32 %v4232_v27, %v8472_v4  ;;  %v4490_v51 = vadd.f32 %v4411_v53, %v4303_v54  ;;  %v3391_v4 = vrot.slane %v3389_v47, 4  ;;  %v8715_v54 = vadd.f32 %v8674_v13, %v3944_v16 }
 0x53b   : > { %4271 = vmatmul.bf16.gmra.mxu1 %v6761_v39  ;;  %4644 = vmatmul.bf16.gmra.mxu3 %v8705_v0  ;;  %v4676_v62 = vadd.f32 %v4597_v42, %v4490_v51  ;;  %v4788_v38 = vpop.f32.mrf.mxu0  ;;  %v8720_v45 = vsel %vm7534_vm5, %v8313_v10, %v3391_v4  ;;  %v6762_v42 = vld [vmem:[#allocation2 + $0x60] sm:$0xff]  ;;  %v8726_v51 = vadd.f32 %v8680_v2, %v4675_v1 }
 0x53c   : > { %9504 = vst [vmem:[#allocation22_spill] sm:$0xff] %v8720_v45 }
 0x53d   : > { %4453 = vmatmul.bf16.gmra.mxu2 %v6761_v39  ;;  %v6575_v39 = vunpack.c.h.b16 %v6762_v42 }
 0x53e   : > { %v4605_v48 = vpop.f32.mrf.mxu3 }
 0x53f   : > { %v3338_v13 = vpack.c.b16 %v6575_v39, %v6575_v39 }
 0x540   : > { %v4234_v26 = vpop.f32.mrf.mxu1  ;;  %v4414_v20 = vpop.f32.mrf.mxu2 }
 0x541   : > { %v4307_v28 = vadd.f32 %v4234_v26, %v8492_v3  ;;  %v4491_v52 = vadd.f32 %v4414_v20, %v4304_v12  ;;  %v3393_v56 = vshll.u32 %v3338_v13, 16 }
 0x543   : > { %v4677_v27 = vadd.f32 %v4600_v37, %v4491_v52  ;;  %v4791_v16 = vpop.f32.mrf.mxu0 }
 0x545   : > { %v8740_v13 = vadd.f32 %v4786_v25, %v4677_v27 }
 0x546   : > { %v4607_v32 = vpop.f32.mrf.mxu3  ;;  %4830 = vmatmul.bf16.gmra.mxu0 %v8720_v45 }
 0x548   : > { %v4237_v36 = vpop.f32.mrf.mxu1  ;;  %v4416_v12 = vpop.f32.mrf.mxu2 }
 0x549   : > { %v4308_v3 = vadd.f32 %v4237_v36, %v8506_v29  ;;  %v4492_v37 = vadd.f32 %v4416_v12, %v4305_v41  ;;  %v3395_v29 = vrot.slane %v3393_v56, 4  ;;  %v8730_v41 = vadd.f32 %v8696_v34, %v4676_v62  ;;  %v9507_v12 = vld [vmem:[#allocation23_spill] sm:$0xff] }
 0x54b   : > { %4276 = vmatmul.bf16.gmra.mxu1 %v6762_v42  ;;  %4649 = vmatmul.bf16.gmra.mxu3 %v8720_v45  ;;  %v4678_v53 = vadd.f32 %v4602_v58, %v4492_v37  ;;  %9506 = vst [vmem:[#allocation25_spill] sm:$0xff] %v8730_v41  ;;  %v4793_v36 = vpop.f32.mrf.mxu0  ;;  %v8735_v2 = vsel %vm7534_vm5, %v9507_v12, %v3395_v29  ;;  %v6763_v58 = vld [vmem:[#allocation2 + $0x68] sm:$0xff] }
 0x54d   : > { %4458 = vmatmul.bf16.gmra.mxu2 %v6762_v42  ;;  %v6579_v42 = vunpack.c.h.b16 %v6763_v58  ;;  %v8743_v41 = vadd.f32 %v4788_v38, %v4678_v53 }
 0x54e   : > { %v4610_v10 = vpop.f32.mrf.mxu3 }
 0x54f   : > { %v3339_v34 = vpack.c.b16 %v6579_v42, %v6579_v42 }
 0x550   : > { %v4239_v47 = vpop.f32.mrf.mxu1  ;;  %v4419_v20 = vpop.f32.mrf.mxu2 }
 0x551   : > { %v4309_v26 = vadd.f32 %v4239_v47, %v9505_v40  ;;  %v4493_v52 = vadd.f32 %v4419_v20, %v4306_v57  ;;  %v3397_v47 = vshll.u32 %v3339_v34, 16 }
 0x553   : > { %v4679_v4 = vadd.f32 %v4605_v48, %v4493_v52  ;;  %v4796_v20 = vpop.f32.mrf.mxu0  ;;  %v3399_v45 = vrot.slane %v3397_v47, 4 }
 0x556   : > { %v4612_v39 = vpop.f32.mrf.mxu3  ;;  %4835 = vmatmul.bf16.gmra.mxu0 %v8735_v2 }
 0x558   : > { %v4242_v1 = vpop.f32.mrf.mxu1  ;;  %v4421_v57 = vpop.f32.mrf.mxu2 }
 0x559   : > { %v4310_v37 = vadd.f32 %v4242_v1, %v8532_v59  ;;  %v4494_v48 = vadd.f32 %v4421_v57, %v4307_v28  ;;  %v6273_v1 = vld [vmem:[#allocation9 + $0x200] sm:$0xff]  ;;  %v9508_v57 = vld [vmem:[#allocation16_spill] sm:$0xff] }
 0x55a   : > { %v8748_v25 = vsel %vm7534_vm5, %v9508_v57, %v3399_v45  ;;  %4965 = vmatpush.bf16.msra.mxu1 %v6273_v1 }
 0x55b   : > { %4281 = vmatmul.bf16.gmra.mxu1 %v6763_v58  ;;  %4654 = vmatmul.bf16.gmra.mxu3 %v8735_v2  ;;  %v4680_v62 = vadd.f32 %v4607_v32, %v4494_v48  ;;  %v6764_v32 = vld [vmem:[#allocation2 + $0x70] sm:$0xff]  ;;  %v8753_v48 = vadd.f32 %v4791_v16, %v4679_v4  ;;  %v6765_v4 = vld [vmem:[#allocation2 + $0x78] sm:$0xff] }
 0x55d   : > { %4463 = vmatmul.bf16.gmra.mxu2 %v6763_v58  ;;  %v6583_v58 = vunpack.c.h.b16 %v6764_v32 }
 0x55e   : > { %v4615_v56 = vpop.f32.mrf.mxu3 }
 0x55f   : > { %v3340_v38 = vpack.c.b16 %v6583_v58, %v6583_v58 }
 0x560   : > { %v4244_v40 = vpop.f32.mrf.mxu1  ;;  %v4424_v29 = vpop.f32.mrf.mxu2 }
 0x561   : > { %v4311_v52 = vadd.f32 %v4244_v40, %v8540_v61  ;;  %v4495_v12 = vadd.f32 %v4424_v29, %v4308_v3  ;;  %v4798_v3 = vpop.f32.mrf.mxu0  ;;  %v3401_v45 = vshll.u32 %v3340_v38, 16 }
 0x563   : > { %v4681_v59 = vadd.f32 %v4610_v10, %v4495_v12  ;;  %v3403_v1 = vrot.slane %v3401_v45, 4 }
 0x566   : > { %v4617_v28 = vpop.f32.mrf.mxu3  ;;  %4840 = vmatmul.bf16.gmra.mxu0 %v8748_v25 }
 0x568   : > { %v4247_v27 = vpop.f32.mrf.mxu1  ;;  %v4426_v42 = vpop.f32.mrf.mxu2 }
 0x569   : > { %v4312_v61 = vadd.f32 %v4247_v27, %v8547_v11  ;;  %v4496_v10 = vadd.f32 %v4426_v42, %v4309_v26  ;;  %v4801_v11 = vpop.f32.mrf.mxu0  ;;  %v8756_v27 = vadd.f32 %v4793_v36, %v4680_v62  ;;  %v9509_v26 = vld [vmem:[#allocation26_spill] sm:$0xff] }
 0x56a   : > { %v8761_v58 = vsel %vm7534_vm5, %v9509_v26, %v3403_v1 }
 0x56b   : > { %4286 = vmatmul.bf16.gmra.mxu1 %v6764_v32  ;;  %4659 = vmatmul.bf16.gmra.mxu3 %v8748_v25  ;;  %v4682_v53 = vadd.f32 %v4612_v39, %v4496_v10  ;;  %v6587_v39 = vunpack.c.h.b16 %v6765_v4 }
 0x56d   : > { %4468 = vmatmul.bf16.gmra.mxu2 %v6764_v32  ;;  %v3341_v36 = vpack.c.b16 %v6587_v39, %v6587_v39 }
 0x56e   : > { %v4620_v47 = vpop.f32.mrf.mxu3 }
 0x56f   : > { %v3405_v38 = vshll.u32 %v3341_v36, 16 }
 0x570   : > { %v4249_v34 = vpop.f32.mrf.mxu1  ;;  %v4429_v29 = vpop.f32.mrf.mxu2 }
 0x571   : > { %v4313_v40 = vadd.f32 %v4249_v34, %v8556_v5  ;;  %v4497_v12 = vadd.f32 %v4429_v29, %v4310_v37  ;;  %v4803_v10 = vpop.f32.mrf.mxu0  ;;  %v3407_v1 = vrot.slane %v3405_v38, 4 }
 0x573   : > { %v4683_v57 = vadd.f32 %v4615_v56, %v4497_v12  ;;  %v8766_v56 = vadd.f32 %v4796_v20, %v4681_v59  ;;  %v6766_v59 = vld [vmem:[#allocation2 + $0x80] sm:$0xff]  }
 0x576   : > { %4845 = vmatmul.bf16.gmra.mxu0 %v8761_v58  ;;  %v4622_v42 = vpop.f32.mrf.mxu3 }
 0x578   : > { %v4252_v16 = vpop.f32.mrf.mxu1  ;;  %v4431_v5 = vpop.f32.mrf.mxu2 }
 0x579   : > { %v4314_v32 = vadd.f32 %v4252_v16, %v8566_v19  ;;  %v4498_v37 = vadd.f32 %v4431_v5, %v4311_v52  ;;  %v8769_v16 = vadd.f32 %v4798_v3, %v4682_v53  ;;  %v9510_v52 = vld [vmem:[#allocation27_spill] sm:$0xff] }
 0x57a   : > { %v8774_v39 = vsel %vm7534_vm5, %v9510_v52, %v3407_v1 }
 0x57b   : > { %4291 = vmatmul.bf16.gmra.mxu1 %v6765_v4  ;;  %4664 = vmatmul.bf16.gmra.mxu3 %v8761_v58  ;;  %v4684_v62 = vadd.f32 %v4617_v28, %v4498_v37  ;;  %v6591_v28 = vunpack.c.h.b16 %v6766_v59 }
 0x57d   : > { %4473 = vmatmul.bf16.gmra.mxu2 %v6765_v4  ;;  %v4806_v4 = vpop.f32.mrf.mxu0  ;;  %v3342_v3 = vpack.c.b16 %v6591_v28, %v6591_v28 }
 0x57e   : > { %v4625_v19 = vpop.f32.mrf.mxu3 }
 0x57f   : > { %v3409_v36 = vshll.u32 %v3342_v3, 16 }
 0x580   : > { %v4254_v45 = vpop.f32.mrf.mxu1  ;;  %v4434_v29 = vpop.f32.mrf.mxu2 }
 0x581   : > { %v4315_v34 = vadd.f32 %v4254_v45, %v8571_v18  ;;  %v4499_v12 = vadd.f32 %v4434_v29, %v4312_v61  ;;  %v3411_v52 = vrot.slane %v3409_v36, 4 }
 0x583   : > { %v4685_v26 = vadd.f32 %v4620_v47, %v4499_v12  ;;  %v8779_v47 = vadd.f32 %v4801_v11, %v4683_v57 }
 0x585   : > { %v4808_v29 = vpop.f32.mrf.mxu0 }
 0x586   : > { %4850 = vmatmul.bf16.gmra.mxu0 %v8774_v39  ;;  %v4627_v37 = vpop.f32.mrf.mxu3 }
 0x588   : > { %v4257_v20 = vpop.f32.mrf.mxu1  ;;  %v4436_v5 = vpop.f32.mrf.mxu2 }
 0x589   : > { %v4316_v18 = vadd.f32 %v4257_v20, %v8582_v17  ;;  %v4500_v61 = vadd.f32 %v4436_v5, %v4313_v40  ;;  %v8782_v20 = vadd.f32 %v4803_v10, %v4684_v62  ;;  %v9511_v40 = vld [vmem:[#allocation14_spill] sm:$0xff]  ;;  %v8794_v62 = vld [vmem:[#allocation2 + $0x88] sm:$0xff]  }
 0x58a   : > { %v8787_v28 = vsel %vm7534_vm5, %v9511_v40, %v3411_v52 }
 0x58b   : > { %4296 = vmatmul.bf16.gmra.mxu1 %v6766_v59  ;;  %4669 = vmatmul.bf16.gmra.mxu3 %v8774_v39  ;;  %v4686_v53 = vadd.f32 %v4622_v42, %v4500_v61 }
 0x58d   : > { %4478 = vmatmul.bf16.gmra.mxu2 %v6766_v59 }
 0x58e   : > { %v4630_v57 = vpop.f32.mrf.mxu3 }
 0x590   : > { %v4259_v38 = vpop.f32.mrf.mxu1  ;;  %v4439_v12 = vpop.f32.mrf.mxu2 }
 0x591   : > { %v4317_v45 = vadd.f32 %v4259_v38, %v8587_v46  ;;  %v4501_v1 = vadd.f32 %v4439_v12, %v4314_v32  ;;  %v4811_v32 = vpop.f32.mrf.mxu0 }
 0x593   : > { %v4687_v17 = vadd.f32 %v4625_v19, %v4501_v1  ;;  %v8792_v19 = vadd.f32 %v4806_v4, %v4685_v26 }
 0x595   : > { %v8802_v40 = vadd.f32 %v4811_v32, %v4687_v17 }
 0x596   : > { %4855 = vmatmul.bf16.gmra.mxu0 %v8787_v28  ;;  %v4632_v36 = vpop.f32.mrf.mxu3 }
 0x598   : > { %v4262_v11 = vpop.f32.mrf.mxu1  ;;  %v4441_v59 = vpop.f32.mrf.mxu2 }
 0x599   : > { %v4318_v42 = vadd.f32 %v4262_v11, %v8599_v8  ;;  %v4502_v46 = vadd.f32 %v4441_v59, %v4315_v34  ;;  %v8798_v8 = vadd.f32 %v4808_v29, %v4686_v53  ;;  %v4813_v1 = vpop.f32.mrf.mxu0 }
 0x59b   : > { %4966 = vmatmul.bf16.vlgmr.msra.gmra.mxu1 %v8576_v43  ;;  %v4688_v5 = vadd.f32 %v4627_v37, %v4502_v46 }
 0x59d   : > { %4483 = vmatmul.bf16.gmra.mxu2 %v8794_v62  ;;  %v8805_v29 = vadd.f32 %v4813_v1, %v4688_v5 }
 0x59e   : > { %v4635_v4 = vpop.f32.mrf.mxu3 }
 0x5a0   : > { %v4264_v10 = vpop.f32.mrf.mxu1  ;;  %v4444_v3 = vpop.f32.mrf.mxu2 }
 0x5a1   : > { %v4319_v61 = vadd.f32 %v4264_v10, %v8604_v22  ;;  %v4503_v38 = vadd.f32 %v4444_v3, %v4316_v18  ;;  %v4816_v22 = vpop.f32.mrf.mxu0 }
 0x5a3   : > { %v4689_v12 = vadd.f32 %v4630_v57, %v4503_v38 }
 0x5a5   : > { %v8809_v32 = vadd.f32 %v4816_v22, %v4689_v12 }
 0x5a6   : > { %v4637_v46 = vpop.f32.mrf.mxu3 }
 0x5a8   : > { %v4267_v43 = vpop.f32.mrf.mxu1  ;;  %v4446_v37 = vpop.f32.mrf.mxu2 }
 0x5a9   : > { %v4320_v34 = vadd.f32 %v4267_v43, %v8614_v35  ;;  %v4504_v26 = vadd.f32 %v4446_v37, %v4317_v45  ;;  %v4818_v3 = vpop.f32.mrf.mxu0 }
 0x5ab   : > { %4971 = vmatmul.bf16.gmra.mxu1 %v8592_v50  ;;  %v4690_v52 = vadd.f32 %v4632_v36, %v4504_v26 }
 0x5ad   : > { %v8814_v37 = vadd.f32 %v4818_v3, %v4690_v52 }
 0x5ae   : > { %v4640_v38 = vpop.f32.mrf.mxu3 }
 0x5b0   : > { %v4269_v11 = vpop.f32.mrf.mxu1  ;;  %v4449_v18 = vpop.f32.mrf.mxu2 }
 0x5b1   : > { %v4321_v59 = vadd.f32 %v4269_v11, %v8618_v6  ;;  %v4505_v57 = vadd.f32 %v4449_v18, %v4318_v42  ;;  %v4821_v1 = vpop.f32.mrf.mxu0 }
 0x5b3   : > { %v4691_v53 = vadd.f32 %v4635_v4, %v4505_v57 }
 0x5b5   : > { %v8820_v11 = vadd.f32 %v4821_v1, %v4691_v53 }
 0x5b8   : > { %v4272_v10 = vpop.f32.mrf.mxu1  ;;  %v4451_v50 = vpop.f32.mrf.mxu2 }
 0x5b9   : > { %v4322_v35 = vadd.f32 %v4272_v10, %v8628_v31  ;;  %v4506_v45 = vadd.f32 %v4451_v50, %v4319_v61 }
 0x5bb   : > { %4976 = vmatmul.bf16.gmra.mxu1 %v8609_v60  ;;  %v4692_v17 = vadd.f32 %v4637_v46, %v4506_v45  ;;  %v4642_v60 = vpop.f32.mrf.mxu3 }
 0x5c0   : > { %v4274_v36 = vpop.f32.mrf.mxu1  ;;  %v4454_v42 = vpop.f32.mrf.mxu2 }
 0x5c1   : > { %v8812_v6 = vadd.f32 %v4274_v36, %v8632_v55  ;;  %v4507_v5 = vadd.f32 %v4454_v42, %v4320_v34  ;;  %v4823_v55 = vpop.f32.mrf.mxu0 }
 0x5c2   : > { %v8825_v10 = vadd.f32 %v4823_v55, %v4692_v17 }
 0x5c3   : > { %v4693_v43 = vadd.f32 %v4640_v38, %v4507_v5  ;;  %v4645_v57 = vpop.f32.mrf.mxu3  ;;  %v9513_v38 = vld [vmem:[#allocation20_spill] sm:$0xff] }
 0x5c8   : > { %v4277_v31 = vpop.f32.mrf.mxu1  ;;  %v4456_v61 = vpop.f32.mrf.mxu2 }
 0x5c9   : > { %v8817_v26 = vadd.f32 %v4277_v31, %v8644_v33  ;;  %v4508_v12 = vadd.f32 %v4456_v61, %v4321_v59  ;;  %v4826_v3 = vpop.f32.mrf.mxu0 }
 0x5ca   : > { %v8831_v59 = vadd.f32 %v4826_v3, %v4693_v43 }
 0x5cb   : > { %4981 = vmatmul.bf16.gmra.mxu1 %v8623_v7  ;;  %v4694_v4 = vadd.f32 %v4642_v60, %v4508_v12  ;;  %v9512_v7 = vld [vmem:[#allocation19_spill] sm:$0xff]  ;;  %v9514_v12 = vld [vmem:[#allocation21_spill] sm:$0xff] }
 0x5d0   : > { %v4279_v22 = vpop.f32.mrf.mxu1  ;;  %v4459_v18 = vpop.f32.mrf.mxu2 }
 0x5d1   : > { %v8823_v34 = vadd.f32 %v4279_v22, %v8648_v30  ;;  %v4509_v52 = vadd.f32 %v4459_v18, %v4322_v35  ;;  %v4828_v30 = vpop.f32.mrf.mxu0  ;;  %v9515_v22 = vld [vmem:[#allocation25_spill] sm:$0xff] }
 0x5d2   : > { %v8836_v36 = vadd.f32 %v4828_v30, %v4694_v4 }
 0x5d3   : > { %v4695_v46 = vadd.f32 %v4645_v57, %v4509_v52  ;;  %v9516_v52 = vld [vmem:[#allocation22_spill] sm:$0xff] }
 0x5d8   : > { %v4282_v33 = vpop.f32.mrf.mxu1 }
 0x5d9   : > { %v8828_v50 = vadd.f32 %v4282_v33, %v8660_v23  ;;  %v4831_v42 = vpop.f32.mrf.mxu0 }
 0x5da   : > { %v8842_v23 = vadd.f32 %v4831_v42, %v4695_v46 }
 0x5db   : > { %4986 = vmatmul.bf16.gmra.mxu1 %v9512_v7 }
 0x5e0   : > { %v4284_v53 = vpop.f32.mrf.mxu1 }
 0x5e1   : > { %v8834_v45 = vadd.f32 %v4284_v53, %v8664_v14  ;;  %v8930_v49 = vpop.f32.mrf.mxu0 }
 0x5e8   : > { %v4287_v35 = vpop.f32.mrf.mxu1 }
 0x5e9   : > { %v8839_v17 = vadd.f32 %v4287_v35, %v8677_v21 }
 0x5eb   : > { %4991 = vmatmul.bf16.gmra.mxu1 %v9513_v38 }
 0x5f0   : > { %v4289_v5 = vpop.f32.mrf.mxu1 }
 0x5f1   : > { %v8845_v1 = vadd.f32 %v4289_v5, %v8683_v24 }
 0x5f8   : > { %v4292_v43 = vpop.f32.mrf.mxu1 }
 0x5f9   : > { %v8848_v14 = vadd.f32 %v4292_v43, %v8694_v63 }
 0x5fb   : > { %4996 = vmatmul.bf16.gmra.mxu1 %v8669_v44 }
 0x600   : > { %v4294_v31 = vpop.f32.mrf.mxu1 }
 0x601   : > { %v8852_v60 = vadd.f32 %v4294_v31, %v8700_v15 }
 0x608   : > { %v4297_v21 = vpop.f32.mrf.mxu1 }
 0x609   : > { %v8855_v61 = vadd.f32 %v4297_v21, %v8711_v9 }
 0x60b   : > { %5001 = vmatmul.bf16.gmra.mxu1 %v9514_v12 }
 0x610   : > { %v4299_v4 = vpop.f32.mrf.mxu1 }
 0x611   : > { %v8859_v24 = vadd.f32 %v4299_v4, %v8715_v54 }
 0x618   : > { %v4967_v55 = vpop.f32.mrf.mxu1 }
 0x619   : > { %v8862_v63 = vadd.f32 %v4967_v55, %v8726_v51 }
 0x61b   : > { %5006 = vmatmul.bf16.gmra.mxu1 %v8705_v0 }
 0x620   : > { %v4969_v44 = vpop.f32.mrf.mxu1 }
 0x621   : > { %v8866_v15 = vadd.f32 %v4969_v44, %v9515_v22 }
 0x628   : > { %v4972_v18 = vpop.f32.mrf.mxu1 }
 0x629   : > { %v8869_v9 = vadd.f32 %v4972_v18, %v8740_v13 }
 0x62b   : > { %5011 = vmatmul.bf16.gmra.mxu1 %v9516_v52  ;;  %v8940_v52 = vpop.f32.mrf.mxu0 }
 0x630   : > { %v4974_v57 = vpop.f32.mrf.mxu1 }
 0x631   : > { %v8873_v54 = vadd.f32 %v4974_v57, %v8743_v41 }
 0x638   : > { %v4977_v46 = vpop.f32.mrf.mxu1 }
 0x639   : > { %v8876_v51 = vadd.f32 %v4977_v46, %v8753_v48 }
 0x63b   : > { %5016 = vmatmul.bf16.gmra.mxu1 %v8735_v2 }
 0x640   : > { %v4979_v0 = vpop.f32.mrf.mxu1 }
 0x641   : > { %v8880_v33 = vadd.f32 %v4979_v0, %v8756_v27 }
 0x648   : > { %v4982_v3 = vpop.f32.mrf.mxu1 }
 0x649   : > { %v8883_v13 = vadd.f32 %v4982_v3, %v8766_v56  ;;  %v8947_v3 = vpop.f32.mrf.mxu0 }
 0x64b   : > { %5021 = vmatmul.bf16.gmra.mxu1 %v8748_v25 }
 0x650   : > { %v4984_v7 = vpop.f32.mrf.mxu1 }
 0x651   : > { %v8887_v41 = vadd.f32 %v4984_v7, %v8769_v16 }
 0x658   : > { %v4987_v53 = vpop.f32.mrf.mxu1 }
 0x659   : > { %v8890_v48 = vadd.f32 %v4987_v53, %v8779_v47  ;;  %v5111_v53 = vadd.f32 %v8866_v15, %v8862_v63 }
 0x65b   : > { %5026 = vmatmul.bf16.gmra.mxu1 %v8761_v58  ;;  %v6595_v58 = vunpack.c.h.b16 %v8794_v62 }
 0x660   : > { %v4989_v2 = vpop.f32.mrf.mxu1 }
 0x661   : > { %v8894_v27 = vadd.f32 %v4989_v2, %v8782_v20  ;;  %v3343_v20 = vpack.c.b16 %v6595_v58, %v6595_v58  ;;  %v5151_v2 = vmul.f32 %v8869_v9, %v8869_v9 }
 0x668   : > { %v4992_v30 = vpop.f32.mrf.mxu1 }
 0x669   : > { %v8897_v56 = vadd.f32 %v4992_v30, %v8792_v19  ;;  %v3413_v19 = vshll.u32 %v3343_v20, 16 }
 0x66b   : > { %9517 = vst [vmem:[#allocation15_spill] sm:$0xff] %v8897_v56  ;;  %5031 = vmatmul.bf16.gmra.mxu1 %v8774_v39  ;;  %v3415_v5 = vrot.slane %v3413_v19, 4 }
 0x670   : > { %v4994_v25 = vpop.f32.mrf.mxu1 }
 0x671   : > { %v8901_v16 = vadd.f32 %v4994_v25, %v8798_v8  ;;  %v9519_v8 = vld [vmem:[#allocation17_spill] sm:$0xff]  ;;  %v5112_v25 = vadd.f32 %v5111_v53, %v8869_v9 }
 0x673   : > { %9518 = vst [vmem:[#allocation24_spill] sm:$0xff] %v8901_v16  ;;  %v5113_v20 = vadd.f32 %v5112_v25, %v8873_v54 }
 0x678   : > { %v4997_v35 = vpop.f32.mrf.mxu1 }
 0x679   : > { %v8904_v47 = vadd.f32 %v4997_v35, %v8802_v40  ;;  %v3451_v40 = vsel %vm7534_vm5, %v9519_v8, %v3415_v5  ;;  %v5152_v35 = vmul.f32 %v8873_v54, %v8873_v54  ;;  %v5154_v8 = vmul.f32 %v8880_v33, %v8880_v33 }
 0x67b   : > { %5036 = vmatmul.bf16.gmra.mxu1 %v8787_v28 }
 0x680   : > { %v4999_v38 = vpop.f32.mrf.mxu1 }
 0x681   : > { %v8909_v42 = vadd.f32 %v4999_v38, %v8805_v29  ;;  %v8923_v29 = vpop.f32.mrf.mxu2  ;;  %v5153_v38 = vmul.f32 %v8876_v51, %v8876_v51 }
 0x688   : > { %v5002_v39 = vpop.f32.mrf.mxu1 }
 0x689   : > { %v8912_v43 = vadd.f32 %v5002_v39, %v8809_v32  ;;  %v8928_v32 = vpop.f32.mrf.mxu3  ;;  %v5114_v39 = vadd.f32 %v5113_v20, %v8876_v51 }
 0x68b   : > { %5041 = vmatmul.bf16.gmra.mxu1 %v3451_v40  ;;  %v8972_v40 = vpop.f32.mrf.mxu0 }
 0x690   : > { %v5004_v31 = vpop.f32.mrf.mxu1 }
 0x691   : > { %v8918_v62 = vadd.f32 %v5004_v31, %v8814_v37  ;;  %v4464_v37 = vpop.f32.mrf.mxu2  ;;  %v8935_v22 = vpop.f32.mrf.mxu3 }
 0x698   : > { %v5007_v28 = vpop.f32.mrf.mxu1 }
 0x699   : > { %v8921_v21 = vadd.f32 %v5007_v28, %v8820_v11  ;;  %v4466_v57 = vpop.f32.mrf.mxu2  ;;  %v8945_v0 = vpop.f32.mrf.mxu3  ;;  %v5115_v28 = vadd.f32 %v5114_v39, %v8880_v33  ;;  %v5159_v39 = vmul.f32 %v8897_v56, %v8897_v56 }
 0x6a0   : > { %v5009_v12 = vpop.f32.mrf.mxu1 }
 0x6a1   : > { %v8926_v4 = vadd.f32 %v5009_v12, %v8825_v10  ;;  %v8951_v7 = vpop.f32.mrf.mxu2  ;;  %v8967_v19 = vpop.f32.mrf.mxu3  ;;  %v5155_v12 = vmul.f32 %v8883_v13, %v8883_v13 }
 0x6a8   : > { %v5012_v55 = vpop.f32.mrf.mxu1 }
 0x6a9   : > { %v8933_v44 = vadd.f32 %v5012_v55, %v8831_v59  ;;  %v5150_v59 = vmul.f32 %v8866_v15, %v8866_v15  ;;  %v4471_v55 = vpop.f32.mrf.mxu2  ;;  %v4657_v20 = vpop.f32.mrf.mxu3 }
 0x6b0   : > { %v5014_v18 = vpop.f32.mrf.mxu1 }
 0x6b1   : > { %v8938_v11 = vadd.f32 %v5014_v18, %v8836_v36  ;;  %v5149_v36 = vmul.f32 %v8862_v63, %v8862_v63 }
 0x6b3   : > { %v5181_v30 = vadd.f32 %v5150_v59, %v5149_v36  ;;  %v5116_v59 = vadd.f32 %v5115_v28, %v8883_v13  ;;  %v5156_v36 = vmul.f32 %v8887_v41, %v8887_v41 }
 0x6b5   : > { %v5182_v58 = vadd.f32 %v5181_v30, %v5151_v2  ;;  %v5117_v2 = vadd.f32 %v5116_v59, %v8887_v41  ;;  %v5157_v30 = vmul.f32 %v8890_v48, %v8890_v48  ;;  %v4474_v59 = vpop.f32.mrf.mxu2 }
 0x6b7   : > { %v5183_v5 = vadd.f32 %v5182_v58, %v5152_v35  ;;  %v5118_v35 = vadd.f32 %v5117_v2, %v8890_v48  ;;  %v5158_v58 = vmul.f32 %v8894_v27, %v8894_v27  ;;  %v5161_v2 = vmul.f32 %v8904_v47, %v8904_v47 }
 0x6b8   : > { %v5017_v10 = vpop.f32.mrf.mxu1 }
 0x6b9   : > { %v8943_v46 = vadd.f32 %v5017_v10, %v8842_v23  ;;  %v5184_v31 = vadd.f32 %v5183_v5, %v5153_v38  ;;  %v5119_v5 = vadd.f32 %v5118_v35, %v8894_v27  ;;  %v5162_v35 = vmul.f32 %v8909_v42, %v8909_v42 }
 0x6bb   : > { %v5185_v10 = vadd.f32 %v5184_v31, %v5154_v8  ;;  %v8991_v31 = vpop.f32.mrf.mxu0 }
 0x6bd   : > { %v5186_v53 = vadd.f32 %v5185_v10, %v5155_v12  ;;  %v5120_v12 = vadd.f32 %v5119_v5, %v8897_v56  ;;  %v5160_v10 = vmul.f32 %v8901_v16, %v8901_v16 }
 0x6bf   : > { %v5187_v25 = vadd.f32 %v5186_v53, %v5156_v36  ;;  %v5121_v53 = vadd.f32 %v5120_v12, %v8901_v16  ;;  %v4660_v12 = vpop.f32.mrf.mxu3 }
 0x6c0   : > { %v8959_v23 = vpop.f32.mrf.mxu1 }
 0x6c1   : > { %v5188_v38 = vadd.f32 %v5187_v25, %v5157_v30  ;;  %v5122_v25 = vadd.f32 %v5121_v53, %v8904_v47  ;;  %v4512_v53 = vadd.f32 %v4466_v57, %v8823_v34  ;;  %v5166_v34 = vmul.f32 %v8926_v4, %v8926_v4 }
 0x6c3   : > { %v5189_v28 = vadd.f32 %v5188_v38, %v5158_v58  ;;  %v4510_v58 = vadd.f32 %v8923_v29, %v8812_v6  ;;  %v5123_v5 = vadd.f32 %v5122_v25, %v8909_v42  ;;  %v4846_v29 = vpop.f32.mrf.mxu0  ;;  %v5165_v25 = vmul.f32 %v8921_v21, %v8921_v21 }
 0x6c5   : > { %v5190_v36 = vadd.f32 %v5189_v28, %v5159_v39  ;;  %v5163_v39 = vmul.f32 %v8912_v43, %v8912_v43  ;;  %v4511_v28 = vadd.f32 %v4464_v37, %v8817_v26  ;;  %v4696_v6 = vadd.f32 %v8928_v32, %v4510_v58 }
 0x6c6   : > { %v4513_v37 = vadd.f32 %v8951_v7, %v8828_v50  ;;  %v4698_v32 = vadd.f32 %v8945_v0, %v4512_v53  ;;  %v4515_v7 = vadd.f32 %v4474_v59, %v8839_v17  ;;  %v5169_v17 = vmul.f32 %v8943_v46, %v8943_v46 }
 0x6c7   : > { %v5191_v30 = vadd.f32 %v5190_v36, %v5160_v10  ;;  %v5124_v10 = vadd.f32 %v5123_v5, %v8912_v43  ;;  %v5164_v36 = vmul.f32 %v8918_v62, %v8918_v62  ;;  %v4697_v26 = vadd.f32 %v8935_v22, %v4511_v28 }
 0x6c8   : > { %v8977_v18 = vpop.f32.mrf.mxu1  ;;  %v5167_v22 = vmul.f32 %v8933_v44, %v8933_v44  ;;  %v4699_v50 = vadd.f32 %v8967_v19, %v4513_v37  ;;  %v4701_v59 = vadd.f32 %v4660_v12, %v4515_v7 }
 0x6c9   : > { %v5192_v38 = vadd.f32 %v5191_v30, %v5161_v2  ;;  %v5125_v30 = vadd.f32 %v5124_v10, %v8918_v62  ;;  %v4883_v28 = vadd.f32 %v8940_v52, %v4697_v26 }
 0x6cb   : > { %v5193_v56 = vadd.f32 %v5192_v38, %v5162_v35  ;;  %v4476_v35 = vpop.f32.mrf.mxu2  ;;  %v5126_v5 = vadd.f32 %v5125_v30, %v8921_v21  ;;  %v9042_v52 = vadd.f32 %v8977_v18, %v4883_v28  ;;  %v4885_v30 = vadd.f32 %v8972_v40, %v4699_v50 }
 0x6cc   : > { %v4516_v37 = vadd.f32 %v4476_v35, %v8845_v1 }
 0x6cd   : > { %v5194_v2 = vadd.f32 %v5193_v56, %v5163_v39  ;;  %v4514_v56 = vadd.f32 %v4471_v55, %v8834_v45  ;;  %v5127_v58 = vadd.f32 %v5126_v5, %v8926_v4  ;;  %v4882_v39 = vadd.f32 %v8930_v49, %v4696_v6 }
 0x6ce   : > { %v5168_v45 = vmul.f32 %v8938_v11, %v8938_v11  ;;  %v4884_v49 = vadd.f32 %v8947_v3, %v4698_v32  ;;  %v5171_v40 = vmul.f32 %v9042_v52, %v9042_v52  ;;  %v4887_v32 = vadd.f32 %v4846_v29, %v4701_v59 }
 0x6cf   : > { %v5195_v38 = vadd.f32 %v5194_v2, %v5164_v36  ;;  %v5128_v0 = vadd.f32 %v5127_v58, %v8933_v44  ;;  %v9035_v55 = vadd.f32 %v8959_v23, %v4882_v39  ;;  %v4700_v53 = vadd.f32 %v4657_v20, %v4514_v56  ;;  %v4662_v2 = vpop.f32.mrf.mxu3 }
 0x6d0   : > { %v5024_v8 = vpop.f32.mrf.mxu1  ;;  %v4702_v35 = vadd.f32 %v4662_v2, %v4516_v37 }
 0x6d1   : > { %v5196_v57 = vadd.f32 %v5195_v38, %v5165_v25  ;;  %v5129_v19 = vadd.f32 %v5128_v0, %v8938_v11  ;;  %v4848_v25 = vpop.f32.mrf.mxu0  ;;  %v5170_v20 = vmul.f32 %v9035_v55, %v9035_v55  ;;  %v9048_v3 = vadd.f32 %v5024_v8, %v4884_v49 }
 0x6d2   : > { %v4886_v5 = vadd.f32 %v8991_v31, %v4700_v53  ;;  %v4888_v2 = vadd.f32 %v4848_v25, %v4702_v35 }
 0x6d3   : > { %v5197_v36 = vadd.f32 %v5196_v57, %v5166_v34  ;;  %v5130_v23 = vadd.f32 %v5129_v19, %v8943_v46  ;;  %v4479_v38 = vpop.f32.mrf.mxu2  ;;  %v5172_v8 = vmul.f32 %v9048_v3, %v9048_v3 }
 0x6d5   : > { %v5198_v6 = vadd.f32 %v5197_v36, %v5167_v22  ;;  %v5131_v18 = vadd.f32 %v5130_v23, %v9035_v55  ;;  %v4517_v36 = vadd.f32 %v4479_v38, %v8848_v14 }
 0x6d7   : > { %v5199_v26 = vadd.f32 %v5198_v6, %v5168_v45  ;;  %v5132_v58 = vadd.f32 %v5131_v18, %v9042_v52 }
 0x6d8   : > { %v5027_v16 = vpop.f32.mrf.mxu1 }
 0x6d9   : > { %v5200_v34 = vadd.f32 %v5199_v26, %v5169_v17  ;;  %v9055_v12 = vadd.f32 %v5027_v16, %v4885_v30  ;;  %v5133_v22 = vadd.f32 %v5132_v58, %v9048_v3  ;;  %v4665_v16 = vpop.f32.mrf.mxu3 }
 0x6da   : > { %v4703_v30 = vadd.f32 %v4665_v16, %v4517_v36 }
 0x6db   : > { %v5201_v57 = vadd.f32 %v5200_v34, %v5170_v20  ;;  %v5173_v39 = vmul.f32 %v9055_v12, %v9055_v12  ;;  %v5134_v7 = vadd.f32 %v5133_v22, %v9055_v12  ;;  %v4481_v49 = vpop.f32.mrf.mxu2 }
 0x6dc   : > { %v4518_v38 = vadd.f32 %v4481_v49, %v8852_v60 }
 0x6dd   : > { %v5202_v31 = vadd.f32 %v5201_v57, %v5171_v40 }
 0x6df   : > { %v5203_v29 = vadd.f32 %v5202_v31, %v5172_v8 }
 0x6e0   : > { %v5029_v10 = vpop.f32.mrf.mxu1 }
 0x6e1   : > { %v9060_v1 = vadd.f32 %v5029_v10, %v4886_v5  ;;  %v4851_v10 = vpop.f32.mrf.mxu0  ;;  %v5204_v0 = vadd.f32 %v5203_v29, %v5173_v39  ;;  %v4667_v37 = vpop.f32.mrf.mxu3 }
 0x6e2   : > { %v4889_v5 = vadd.f32 %v4851_v10, %v4703_v30 }
 0x6e3   : > { %v5174_v28 = vmul.f32 %v9060_v1, %v9060_v1  ;;  %v5135_v45 = vadd.f32 %v5134_v7, %v9060_v1  ;;  %v4484_v40 = vpop.f32.mrf.mxu2 }
 0x6e4   : > { %v4519_v8 = vadd.f32 %v4484_v40, %v8855_v61 }
 0x6e5   : > { %v5205_v19 = vadd.f32 %v5204_v0, %v5174_v28 }
 0x6e8   : > { %v5032_v56 = vpop.f32.mrf.mxu1 }
 0x6e9   : > { %v9065_v50 = vadd.f32 %v5032_v56, %v4887_v32  ;;  %v4853_v18 = vpop.f32.mrf.mxu0  ;;  %v4704_v32 = vadd.f32 %v4667_v37, %v4518_v38  ;;  %v4670_v31 = vpop.f32.mrf.mxu3 }
 0x6ea   : > { %v4705_v60 = vadd.f32 %v4670_v31, %v4519_v8 }
 0x6eb   : > { %v5175_v53 = vmul.f32 %v9065_v50, %v9065_v50  ;;  %v5136_v17 = vadd.f32 %v5135_v45, %v9065_v50  ;;  %v4890_v35 = vadd.f32 %v4853_v18, %v4704_v32  ;;  %v4486_v28 = vpop.f32.mrf.mxu2 }
 0x6ec   : > { %v4520_v10 = vadd.f32 %v4486_v28, %v8859_v24 }
 0x6ed   : > { %v5206_v26 = vadd.f32 %v5205_v19, %v5175_v53 }
 0x6f0   : > { %v5034_v6 = vpop.f32.mrf.mxu1 }
 0x6f1   : > { %v9075_v59 = vadd.f32 %v5034_v6, %v4888_v2  ;;  %v4856_v7 = vpop.f32.mrf.mxu0  ;;  %v4672_v61 = vpop.f32.mrf.mxu3 }
 0x6f2   : > { %v4891_v0 = vadd.f32 %v4856_v7, %v4705_v60  ;;  %v4706_v2 = vadd.f32 %v4672_v61, %v4520_v10 }
 0x6f3   : > { %v5137_v23 = vadd.f32 %v5136_v17, %v9075_v59  ;;  %v5176_v14 = vmul.f32 %v9075_v59, %v9075_v59 }
 0x6f5   : > { %v5207_v20 = vadd.f32 %v5206_v26, %v5176_v14 }
 0x6f8   : > { %v5037_v25 = vpop.f32.mrf.mxu1 }
 0x6f9   : > { %v9081_v34 = vadd.f32 %v5037_v25, %v4889_v5  ;;  %v4858_v17 = vpop.f32.mrf.mxu0 }
 0x6fa   : > { %v4892_v30 = vadd.f32 %v4858_v17, %v4706_v2 }
 0x6fb   : > { %v5138_v56 = vadd.f32 %v5137_v23, %v9081_v34  ;;  %v5177_v57 = vmul.f32 %v9081_v34, %v9081_v34 }
 0x6fd   : > { %v5208_v58 = vadd.f32 %v5207_v20, %v5177_v57 }
 0x700   : > { %v5039_v22 = vpop.f32.mrf.mxu1 }
 0x701   : > { %v9087_v39 = vadd.f32 %v5039_v22, %v4890_v35 }
 0x703   : > { %v5139_v16 = vadd.f32 %v5138_v56, %v9087_v39  ;;  %v5178_v29 = vmul.f32 %v9087_v39, %v9087_v39 }
 0x705   : > { %v5209_v36 = vadd.f32 %v5208_v58, %v5178_v29 }
 0x708   : > { %v5042_v45 = vpop.f32.mrf.mxu1 }
 0x709   : > { %v9093_v53 = vadd.f32 %v5042_v45, %v4891_v0 }
 0x70b   : > { %v5140_v49 = vadd.f32 %v5139_v16, %v9093_v53  ;;  %v5179_v6 = vmul.f32 %v9093_v53, %v9093_v53 }
 0x70d   : > { %v5210_v19 = vadd.f32 %v5209_v36, %v5179_v6 }
 0x710   : > { %v5044_v26 = vpop.f32.mrf.mxu1 }
 0x711   : > { %v9098_v23 = vadd.f32 %v5044_v26, %v4892_v30 }
 0x713   : > { %v5141_v14 = vadd.f32 %v5140_v49, %v9098_v23  ;;  %v5180_v24 = vmul.f32 %v9098_v23, %v9098_v23 }
 0x715   : > { %v5142_v20 = vrot.slane %v5141_v14, 4  ;;  %v5211_v37 = vadd.f32 %v5210_v19, %v5180_v24 }
 0x717   : > { %v5143_v38 = vadd.f32 %v5142_v20, %v5141_v14  ;;  %v5212_v5 = vrot.slane %v5211_v37, 4 }
 0x719   : > { %v5144_v25 = vrot.slane %v5143_v38, 2  ;;  %v5213_v18 = vadd.f32 %v5212_v5, %v5211_v37 }
 0x71b   : > { %v5145_v40 = vadd.f32 %v5144_v25, %v5143_v38  ;;  %v5214_v32 = vrot.slane %v5213_v18, 2 }
 0x71d   : > { %v5146_v56 = vrot.slane %v5145_v40, 1  ;;  %v5215_v57 = vadd.f32 %v5214_v32, %v5213_v18  ;;  %v5363_v32 = vld [vmem:[%s7060_s30 + $0xf8] sm:$0xff] }
 0x71f   : > { %v5147_v58 = vadd.f32 %v5146_v56, %v5145_v40  ;;  %v5216_v8 = vrot.slane %v5215_v57, 1 }
 0x721   : > { %v5217_v35 = vadd.f32 %v5216_v8, %v5215_v57  ;;  %v9103_v31 = vmul.f32 0.00390625, %v5147_v58 }
 0x723   : > { %v5220_v22 = vmul.f32 0.00390625, %v5217_v35  ;;  %v5221_v60 = vmul.f32 %v9103_v31, %v9103_v31  ;;  %v5298_v16 = vsub.f32 %v9098_v23, %v9103_v31  ;;  %v5293_v36 = vsub.f32 %v9065_v50, %v9103_v31  ;;  %v5337_v50 = vld [vmem:[%s7060_s30 + $0x28] sm:$0xff] }
 0x724   : > { %v5294_v10 = vsub.f32 %v9075_v59, %v9103_v31  ;;  %v5295_v0 = vsub.f32 %v9081_v34, %v9103_v31  ;;  %v5296_v45 = vsub.f32 %v9087_v39, %v9103_v31  ;;  %v5297_v61 = vsub.f32 %v9093_v53, %v9103_v31  ;;  %v5339_v39 = vld [vmem:[%s7060_s30 + $0x38] sm:$0xff]  ;;  %v5341_v53 = vld [vmem:[%s7060_s30 + $0x48] sm:$0xff] }
 0x725   : > { %v5222_v29 = vsub.f32 %v5220_v22, %v5221_v60  ;;  %v5267_v19 = vsub.f32 %v8862_v63, %v9103_v31  ;;  %v5268_v17 = vsub.f32 %v8866_v15, %v9103_v31  ;;  %v5269_v30 = vsub.f32 %v8869_v9, %v9103_v31 }
 0x726   : > { %v5270_v26 = vsub.f32 %v8873_v54, %v9103_v31  ;;  %v5271_v14 = vsub.f32 %v8876_v51, %v9103_v31  ;;  %v5272_v24 = vsub.f32 %v8880_v33, %v9103_v31  ;;  %v5273_v20 = vsub.f32 %v8883_v13, %v9103_v31  ;;  %v9520_v54 = vld [vmem:[#allocation15_spill] sm:$0xff]  ;;  %v9521_v51 = vld [vmem:[#allocation24_spill] sm:$0xff] }
 0x727   : > { %v5223_v7 = vmax.f32 %v5222_v29, 0.0  ;;  %v5274_v63 = vsub.f32 %v8887_v41, %v9103_v31  ;;  %v5275_v15 = vsub.f32 %v8890_v48, %v9103_v31  ;;  %v5276_v9 = vsub.f32 %v8894_v27, %v9103_v31 }
 0x728   : > { %v5277_v37 = vsub.f32 %v9520_v54, %v9103_v31  ;;  %v5278_v33 = vsub.f32 %v9521_v51, %v9103_v31  ;;  %v5279_v13 = vsub.f32 %v8904_v47, %v9103_v31  ;;  %v5280_v41 = vsub.f32 %v8909_v42, %v9103_v31 }
 0x729   : > { %v5224_v28 = vadd.f32 1e-05, %v5223_v7  ;;  %v5281_v48 = vsub.f32 %v8912_v43, %v9103_v31  ;;  %v5282_v27 = vsub.f32 %v8918_v62, %v9103_v31  ;;  %v5283_v5 = vsub.f32 %v8921_v21, %v9103_v31 }
 0x72a   : > { %v5284_v18 = vsub.f32 %v8926_v4, %v9103_v31  ;;  %v5285_v47 = vsub.f32 %v8933_v44, %v9103_v31  ;;  %v5286_v42 = vsub.f32 %v8938_v11, %v9103_v31  ;;  %v5287_v43 = vsub.f32 %v8943_v46, %v9103_v31 }
 0x72b   : > { %6751 = vrsqrt.f32 %v5224_v28  ;;  %vm5231_vm10 = vweird.f32 %v5224_v28  ;;  %v5288_v62 = vsub.f32 %v9035_v55, %v9103_v31  ;;  %v5289_v21 = vsub.f32 %v9042_v52, %v9103_v31 }
 0x72c   : > { %v5290_v4 = vsub.f32 %v9048_v3, %v9103_v31  ;;  %v5291_v44 = vsub.f32 %v9055_v12, %v9103_v31  ;;  %v5292_v11 = vsub.f32 %v9060_v1, %v9103_v31 }
 0x731   : > { %v6752_v2 = vpop.eup %6751 }
 0x732   : > { %v5226_v49 = vmul.f32 %v6752_v2, %v5224_v28  ;;  %vm5232_vm9 = vweird.f32 %v6752_v2 }
 0x733   : > { %vm5233_vm11 = vmor %vm5231_vm10, %vm5232_vm9 }
 0x734   : > { %v5227_v6 = vmul.f32 %v6752_v2, %v5226_v49 }
 0x736   : > { %v5228_v23 = vmul.f32 0.5, %v5227_v6 }
 0x738   : > { %v5229_v38 = vsub.f32 1.5, %v5228_v23 }
 0x73a   : > { %v5230_v25 = vmul.f32 %v6752_v2, %v5229_v38 }
 0x73c   : > { %v5234_v40 = vsel %vm5233_vm11, %v6752_v2, %v5230_v25  ;;  %v5343_v25 = vld [vmem:[%s7060_s30 + $0x58] sm:$0xff] }
 0x73d   : > { %v5330_v56 = vmul.f32 %v5298_v16, %v5234_v40  ;;  %v5299_v46 = vmul.f32 %v5267_v19, %v5234_v40  ;;  %v5300_v57 = vmul.f32 %v5268_v17, %v5234_v40  ;;  %v5301_v58 = vmul.f32 %v5269_v30, %v5234_v40  ;;  %v5332_v19 = vld [vmem:[%s7060_s30] sm:$0xff]  ;;  %v5333_v17 = vld [vmem:[%s7060_s30 + $0x8] sm:$0xff]  ;;  %v5334_v30 = vld [vmem:[%s7060_s30 + $0x10] sm:$0xff] }
 0x73e   : > { %v5302_v55 = vmul.f32 %v5270_v26, %v5234_v40  ;;  %v5303_v8 = vmul.f32 %v5271_v14, %v5234_v40  ;;  %v5304_v35 = vmul.f32 %v5272_v24, %v5234_v40  ;;  %v5305_v52 = vmul.f32 %v5273_v20, %v5234_v40  ;;  %v5335_v20 = vld [vmem:[%s7060_s30 + $0x18] sm:$0xff] }
 0x73f   : > { %v5395_v22 = vadd.f32 %v5363_v32, %v5330_v56  ;;  %v5306_v3 = vmul.f32 %v5274_v63, %v5234_v40  ;;  %v5307_v60 = vmul.f32 %v5275_v15, %v5234_v40  ;;  %v5308_v29 = vmul.f32 %v5276_v9, %v5234_v40  ;;  %v5347_v32 = vld [vmem:[%s7060_s30 + $0x78] sm:$0xff]  ;;  %v5349_v56 = vld [vmem:[%s7060_s30 + $0x88] sm:$0xff] }
 0x740   : > { %v5309_v12 = vmul.f32 %v5277_v37, %v5234_v40  ;;  %v5310_v7 = vmul.f32 %v5278_v33, %v5234_v40  ;;  %v5311_v1 = vmul.f32 %v5279_v13, %v5234_v40  ;;  %v5312_v16 = vmul.f32 %v5280_v41, %v5234_v40  ;;  %v5336_v37 = vld [vmem:[%s7060_s30 + $0x20] sm:$0xff] }
 0x741   : > { %5428 = vst [vmem:[%s9174_s18 + $0xf8] sm:$0xff] %v5395_v22  ;;  %v5313_v28 = vmul.f32 %v5281_v48, %v5234_v40  ;;  %v5314_v2 = vmul.f32 %v5282_v27, %v5234_v40  ;;  %v9177_v49 = vmul.f32 %v5283_v5, %v5234_v40  ;;  %v9179_v6 = vmul.f32 %v5284_v18, %v5234_v40  ;;  %v5340_v48 = vld [vmem:[%s7060_s30 + $0x40] sm:$0xff]  ;;  %v5353_v22 = vld [vmem:[%s7060_s30 + $0xa8] sm:$0xff] }
 0x742   : > { %v9184_v26 = vmul.f32 %v5285_v47, %v5234_v40  ;;  %v9186_v23 = vmul.f32 %v5286_v42, %v5234_v40  ;;  %v9188_v14 = vmul.f32 %v5287_v43, %v5234_v40  ;;  %v9190_v24 = vmul.f32 %v5288_v62, %v5234_v40  ;;  %v5344_v47 = vld [vmem:[%s7060_s30 + $0x60] sm:$0xff]  ;;  %v5345_v43 = vld [vmem:[%s7060_s30 + $0x68] sm:$0xff] }
 0x743   : > { %v9193_v63 = vmul.f32 %v5289_v21, %v5234_v40  ;;  %v9195_v15 = vmul.f32 %v5290_v4, %v5234_v40  ;;  %v9197_v9 = vmul.f32 %v5291_v44, %v5234_v40  ;;  %v9199_v54 = vmul.f32 %v5292_v11, %v5234_v40  ;;  %v5346_v21 = vld [vmem:[%s7060_s30 + $0x70] sm:$0xff]  ;;  %v5348_v44 = vld [vmem:[%s7060_s30 + $0x80] sm:$0xff] }
 0x744   : > { %v9205_v38 = vmul.f32 %v5293_v36, %v5234_v40  ;;  %v9210_v51 = vmul.f32 %v5294_v10, %v5234_v40  ;;  %v9215_v33 = vmul.f32 %v5295_v0, %v5234_v40  ;;  %v9220_v13 = vmul.f32 %v5296_v45, %v5234_v40  ;;  %v5338_v0 = vld [vmem:[%s7060_s30 + $0x30] sm:$0xff] }
 0x745   : > { %v9226_v59 = vmul.f32 %v5297_v61, %v5234_v40  ;;  %v5364_v36 = vadd.f32 %v5332_v19, %v5299_v46  ;;  %v5365_v10 = vadd.f32 %v5333_v17, %v5300_v57  ;;  %v5366_v34 = vadd.f32 %v5334_v30, %v5301_v58  ;;  %v5342_v61 = vld [vmem:[%s7060_s30 + $0x50] sm:$0xff]  ;;  %v5359_v19 = vld [vmem:[%s7060_s30 + $0xd8] sm:$0xff]  ;;  %v5360_v30 = vld [vmem:[%s7060_s30 + $0xe0] sm:$0xff] }
 0x746   : > { %v5367_v41 = vadd.f32 %v5335_v20, %v5302_v55  ;;  %v5368_v45 = vadd.f32 %v5336_v37, %v5303_v8  ;;  %v5369_v27 = vadd.f32 %v5337_v50, %v5304_v35  ;;  %v5370_v31 = vadd.f32 %v5338_v0, %v5305_v52  ;;  %v5350_v57 = vld [vmem:[%s7060_s30 + $0x90] sm:$0xff]  ;;  %v5351_v55 = vld [vmem:[%s7060_s30 + $0x98] sm:$0xff]  ;;  %v5352_v35 = vld [vmem:[%s7060_s30 + $0xa0] sm:$0xff] }
 0x747   : > { %5397 = vst [vmem:[%s9174_s18] sm:$0xff] %v5364_v36  ;;  %v5371_v5 = vadd.f32 %v5339_v39, %v5306_v3  ;;  %v5372_v18 = vadd.f32 %v5340_v48, %v5307_v60  ;;  %v5373_v42 = vadd.f32 %v5341_v53, %v5308_v29  ;;  %v5374_v62 = vadd.f32 %v5342_v61, %v5309_v12  ;;  %v5354_v60 = vld [vmem:[%s7060_s30 + $0xb0] sm:$0xff]  ;;  %v5355_v12 = vld [vmem:[%s7060_s30 + $0xb8] sm:$0xff] }
 0x748   : > { %5398 = vst [vmem:[%s9174_s18 + $0x8] sm:$0xff] %v5365_v10  ;;  %v5375_v40 = vadd.f32 %v5343_v25, %v5310_v7  ;;  %v5376_v4 = vadd.f32 %v5344_v47, %v5311_v1  ;;  %v5377_v11 = vadd.f32 %v5345_v43, %v5312_v16  ;;  %v5378_v46 = vadd.f32 %v5346_v21, %v5313_v28  ;;  %v5356_v1 = vld [vmem:[%s7060_s30 + $0xc0] sm:$0xff]  ;;  %v5357_v28 = vld [vmem:[%s7060_s30 + $0xc8] sm:$0xff] }
 0x749   : > { %5399 = vst [vmem:[%s9174_s18 + $0x10] sm:$0xff] %v5366_v34  ;;  %v5379_v58 = vadd.f32 %v5347_v32, %v5314_v2  ;;  %v5380_v8 = vadd.f32 %v5348_v44, %v9177_v49  ;;  %v5381_v52 = vadd.f32 %v5349_v56, %v9179_v6  ;;  %v5382_v3 = vadd.f32 %v5350_v57, %v9184_v26  ;;  %v5358_v49 = vld [vmem:[%s7060_s30 + $0xd0] sm:$0xff] }
 0x74a   : > { %5400 = vst [vmem:[%s9174_s18 + $0x18] sm:$0xff] %v5367_v41  ;;  %v5383_v29 = vadd.f32 %v5351_v55, %v9186_v23  ;;  %v5384_v7 = vadd.f32 %v5352_v35, %v9188_v14  ;;  %v5385_v16 = vadd.f32 %v5353_v22, %v9190_v24  ;;  %v5386_v2 = vadd.f32 %v5354_v60, %v9193_v63  ;;  %v5361_v23 = vld [vmem:[%s7060_s30 + $0xe8] sm:$0xff]  ;;  %v5362_v24 = vld [vmem:[%s7060_s30 + $0xf0] sm:$0xff] }
 0x74b   : > { %5401 = vst [vmem:[%s9174_s18 + $0x20] sm:$0xff] %v5368_v45  ;;  %v5387_v6 = vadd.f32 %v5355_v12, %v9195_v15  ;;  %v5388_v17 = vadd.f32 %v5356_v1, %v9197_v9  ;;  %v5389_v26 = vadd.f32 %v5357_v28, %v9199_v54  ;;  %v5390_v14 = vadd.f32 %v5358_v49, %v9205_v38 }
 0x74c   : > { %5402 = vst [vmem:[%s9174_s18 + $0x28] sm:$0xff] %v5369_v27  ;;  %v5391_v20 = vadd.f32 %v5359_v19, %v9210_v51  ;;  %v5392_v63 = vadd.f32 %v5360_v30, %v9215_v33  ;;  %v5393_v15 = vadd.f32 %v5361_v23, %v9220_v13  ;;  %v5394_v9 = vadd.f32 %v5362_v24, %v9226_v59 }
 0x74d   : > { %5403 = vst [vmem:[%s9174_s18 + $0x30] sm:$0xff] %v5370_v31 }
 0x74e   : > { %5404 = vst [vmem:[%s9174_s18 + $0x38] sm:$0xff] %v5371_v5 }
 0x74f   : > { %5405 = vst [vmem:[%s9174_s18 + $0x40] sm:$0xff] %v5372_v18 }
 0x750   : > { %5406 = vst [vmem:[%s9174_s18 + $0x48] sm:$0xff] %v5373_v42 }
 0x751   : > { %5407 = vst [vmem:[%s9174_s18 + $0x50] sm:$0xff] %v5374_v62 }
 0x752   : > { %5408 = vst [vmem:[%s9174_s18 + $0x58] sm:$0xff] %v5375_v40 }
 0x753   : > { %5409 = vst [vmem:[%s9174_s18 + $0x60] sm:$0xff] %v5376_v4 }
 0x754   : > { %5410 = vst [vmem:[%s9174_s18 + $0x68] sm:$0xff] %v5377_v11 }
 0x755   : > { %5411 = vst [vmem:[%s9174_s18 + $0x70] sm:$0xff] %v5378_v46 }
 0x756   : > { %5412 = vst [vmem:[%s9174_s18 + $0x78] sm:$0xff] %v5379_v58 }
 0x757   : > { %5413 = vst [vmem:[%s9174_s18 + $0x80] sm:$0xff] %v5380_v8 }
 0x758   : > { %5414 = vst [vmem:[%s9174_s18 + $0x88] sm:$0xff] %v5381_v52 }
 0x759   : > { %5415 = vst [vmem:[%s9174_s18 + $0x90] sm:$0xff] %v5382_v3 }
 0x75a   : > { %5416 = vst [vmem:[%s9174_s18 + $0x98] sm:$0xff] %v5383_v29 }
 0x75b   : > { %5417 = vst [vmem:[%s9174_s18 + $0xa0] sm:$0xff] %v5384_v7 }
 0x75c   : > { %5418 = vst [vmem:[%s9174_s18 + $0xa8] sm:$0xff] %v5385_v16 }
 0x75d   : > { %5419 = vst [vmem:[%s9174_s18 + $0xb0] sm:$0xff] %v5386_v2 }
 0x75e   : > { %5420 = vst [vmem:[%s9174_s18 + $0xb8] sm:$0xff] %v5387_v6 }
 0x75f   : > { %5421 = vst [vmem:[%s9174_s18 + $0xc0] sm:$0xff] %v5388_v17 }
 0x760   : > { %5422 = vst [vmem:[%s9174_s18 + $0xc8] sm:$0xff] %v5389_v26 }
 0x761   : > { %5423 = vst [vmem:[%s9174_s18 + $0xd0] sm:$0xff] %v5390_v14 }
 0x762   : > { %5424 = vst [vmem:[%s9174_s18 + $0xd8] sm:$0xff] %v5391_v20 }
 0x763   : > { %5425 = vst [vmem:[%s9174_s18 + $0xe0] sm:$0xff] %v5392_v63 }
 0x764   : > { %5426 = vst [vmem:[%s9174_s18 + $0xe8] sm:$0xff] %v5393_v15 }
 0x765   : > { %5427 = vst [vmem:[%s9174_s18 + $0xf0] sm:$0xff] %v5394_v9 }
 0x766   : > { %6885 = shalt.err (!%p6882_p10)
}
 0x767   : > { %s6936_s22 = smov 128   ;;  %s6937_s24 = smov 8  }
 0x768   : > { %6686 = dma.vmem_to_hbm [thread:$0]  (%p7024_p3), %s5443_s28, 4096, %s5445_s29, %s5430_s4, %s6936_s22, %s6936_s22, %s6937_s24  }
 0x769 PF: > { %s5459_s25 = sand.u32 1, %s6916_s12   ;;  %p9522_p12 = scmp.ge.s32.totalorder %s6928_s15, 2 }
 0x76a   : > { %s5460_s30 = scalar_lea.sflag [#allocation6], %s5459_s25 }
 0x76b   : > { %p6700_p13 = pnand %p9522_p12, %p6993_p6 }
 0x76d   : > { %p6701_p0 = pneg %p6700_p13 }
 0x76f   : > { %6911 = dma.done.wait (%p6701_p0), %s5460_s30, 4096  }
 0x770   : > { %6913 = vsyncadd (%p6701_p0), %s5460_s30, 4294963200  ;;  %p17_p5 = scmp.ge.s32.totalorder %s7014_s6, 4   ;;  %s9523_s12 = smov %s6920_s13 }
 0x771   : > { %s9524_s13 = smov %s6924_s14  ;;  %s9525_s14 = smov %s7030_s10 }
 0x772   : > { %s9526_s15 = smov %s7014_s6  ;;  %19 = sbr.rel (!%p17_p5) target bundleno = 6 (0x6), region = 112 }
 0x777   :  { %5466 = vsyncpa [#allocation5], 1 }
 0x778   :  { %5468 = vsyncpa [#allocation5 + $0x1], 1 }
 0x779   :  { %5469 = vsyncpa [#allocation8], 1 }
 0x77a   :  { %5470 = vsyncpa [#allocation6], 1 }
 0x77b   :  { %5472 = vsyncpa [#allocation6 + $0x1], 1 }

</bundles_post_ra>
